<compile_context>
chip_gen: v6e
topology: v6e:2x2x1
jax: 0.10.0
libtpu: 0.0.40
codegen_flags: <defaults>
</compile_context>

<pallas_src>
import jax
import jax.numpy as jnp
from jax import lax
from jax.experimental import pallas as pl
from jax.experimental.pallas import tpu as pltpu


def _round_up(x, m):
    return (x + m - 1) // m * m


# (name, in_ch, out_ch, kernel, stride) — fixed by the PyTorch module.
CONV_CFG = [
    ("conv1", 3, 32, 7, 2),
    ("conv2", 32, 64, 5, 2),
    ("conv3", 64, 128, 3, 2),
    ("conv4", 128, 256, 3, 2),
]


# ----------------------------- Pallas kernels -----------------------------

def _mm_bias_relu_kernel(x_ref, w_ref, b_ref, o_ref):
    # bf16 x bf16 -> f32 accumulation on the MXU; bias + ReLU epilogue in f32
    # (keeps the VPU path f32-only, safe on v5e); store bf16.
    acc = jnp.dot(x_ref[...], w_ref[...], preferred_element_type=jnp.float32)
    acc = jnp.maximum(acc + b_ref[...], 0.0)
    o_ref[...] = acc.astype(o_ref.dtype)


def _conv_matmul(cols_p, w_p, b_p, num_tiles):
    """cols_p: [Mp, Kp] bf16, w_p: [Kp, Op] bf16, b_p: [1, Op] f32 -> [Mp, Op] bf16."""
    Mp, Kp = cols_p.shape
    _, Op = w_p.shape
    tm = Mp // num_tiles
    return pl.pallas_call(
        _mm_bias_relu_kernel,
        out_shape=jax.ShapeDtypeStruct((Mp, Op), jnp.bfloat16),
        grid=(num_tiles,),
        in_specs=[
            pl.BlockSpec((tm, Kp), lambda i: (i, 0)),
            pl.BlockSpec((Kp, Op), lambda i: (0, 0)),
            pl.BlockSpec((1, Op), lambda i: (0, 0)),
        ],
        out_specs=pl.BlockSpec((tm, Op), lambda i: (i, 0)),
        compiler_params=pltpu.CompilerParams(
            dimension_semantics=("parallel",)),
    )(cols_p, w_p, b_p)


def _head_kernel(y_ref, w1_ref, b1_ref, w2_ref, b2_ref, w3_ref, b3_ref, o_ref):
    # output1
    y = jnp.dot(y_ref[...], w1_ref[...],
                preferred_element_type=jnp.float32) + b1_ref[...]
    # 10x output2 (no activation, exactly like the PyTorch forward).
    # Statically unrolled: short fixed trip-count of serially dependent dots.
    w2 = w2_ref[...]
    b2 = b2_ref[...]
    for _ in range(10):
        y = jnp.dot(y.astype(jnp.bfloat16), w2,
                    preferred_element_type=jnp.float32) + b2
    # output3 (output dim padded 1 -> 128 for a lane-dense store)
    o_ref[...] = jnp.dot(y.astype(jnp.bfloat16), w3_ref[...],
                         preferred_element_type=jnp.float32) + b3_ref[...]


def pallas_head(flat, w1, b1, w2, b2, w3, b3):
    """flat: [B, 1024] bf16 -> [B, 1] f32."""
    B = flat.shape[0]
    Bp = _round_up(B, 8)
    yp = jnp.pad(flat, ((0, Bp - B), (0, 0)))
    out = pl.pallas_call(
        _head_kernel,
        out_shape=jax.ShapeDtypeStruct((Bp, 128), jnp.float32),
        grid=(1,),
        in_specs=[
            pl.BlockSpec((Bp, 1024), lambda i: (0, 0)),
            pl.BlockSpec((1024, 256), lambda i: (0, 0)),
            pl.BlockSpec((1, 256), lambda i: (0, 0)),
            pl.BlockSpec((256, 256), lambda i: (0, 0)),
            pl.BlockSpec((1, 256), lambda i: (0, 0)),
            pl.BlockSpec((256, 128), lambda i: (0, 0)),
            pl.BlockSpec((1, 128), lambda i: (0, 0)),
        ],
        out_specs=pl.BlockSpec((Bp, 128), lambda i: (0, 0)),
    )(yp, w1, b1, w2, b2, w3, b3)
    return out[:B, :1]


# ------------------------------ JAX glue ----------------------------------

def im2col_nhwc(x, kh, kw, stride):
    """x: [N, H, W, C] -> patches [N*Ho*Wo, kh*kw*C] in (u, v, c) ordering.

    Pure strided slices + concat + reshape; no transposes.
    """
    N, H, W, C = x.shape
    Ho = (H - kh) // stride + 1
    Wo = (W - kw) // stride + 1
    cols = [x[:, u:u + stride * (Ho - 1) + 1:stride,
              v:v + stride * (Wo - 1) + 1:stride, :]
            for u in range(kh) for v in range(kw)]
    cols = jnp.concatenate(cols, axis=-1)            # [N, Ho, Wo, kh*kw*C]
    return cols.reshape(N * Ho * Wo, kh * kw * C), Ho, Wo


def conv2d_pallas(x, w_p, b_p, out_ch, kh, kw, stride):
    """Conv2d (VALID, stride) + fused ReLU.  x NHWC bf16 -> NHWC bf16."""
    N = x.shape[0]
    cols, Ho, Wo = im2col_nhwc(x, kh, kw, stride)
    M, K = cols.shape
    Kp, Op = w_p.shape
    # conv1's M (~1700) gets 2 tiles so both v7x TensorCores get work; the
    # small layers run as a single full-M tile (per-grid-step overhead
    # dominates their tiny MXU time).
    if M >= 1024:
        num_tiles = 2
        Mp = _round_up(M, 2 * 8)
    else:
        num_tiles = 1
        Mp = _round_up(M, 8)
    cols = jnp.pad(cols, ((0, Mp - M), (0, Kp - K)))   # single pad pass
    out = _conv_matmul(cols, w_p, b_p, num_tiles)      # [Mp, Op] bf16
    return out[:M, :out_ch].reshape(N, Ho, Wo, out_ch)


def prepare_params(params):
    """One-time prep: pre-transpose / pad / cast weights into kernel layout."""
    prepped = {}
    for name, cin, cout, k, _ in CONV_CFG:
        w, b = params[name]                        # w: [O, C, kh, kw] (OIHW)
        K = cin * k * k
        Kp = _round_up(K, 128)
        Op = _round_up(cout, 128)
        wmat = w.transpose(2, 3, 1, 0).reshape(K, cout)      # (u, v, c) x O
        wmat = jnp.pad(wmat, ((0, Kp - K), (0, Op - cout))).astype(jnp.bfloat16)
        bias = jnp.pad(b, (0, Op - cout)).reshape(1, Op).astype(jnp.float32)
        prepped[name] = (wmat, bias)

    (w1, b1), (w2, b2), (w3, b3) = (params["output1"], params["output2"],
                                    params["output3"])
    # conv4 output here is NHWC [B, 2, 2, 256] (input must be 64x64 so the
    # flatten is 1024).  PyTorch flattens NCHW (c, h, w); permute output1's
    # input rows once so the head consumes the NHWC (h, w, c) flatten directly.
    w1t = w1.T                                   # [1024, 256], row = c*4 + hw
    w1_nhwc = w1t.reshape(256, 4, 256).transpose(1, 0, 2).reshape(1024, 256)
    prepped["head"] = (
        w1_nhwc.astype(jnp.bfloat16),
        b1.reshape(1, 256).astype(jnp.float32),
        w2.T.astype(jnp.bfloat16),
        b2.reshape(1, 256).astype(jnp.float32),
        jnp.pad(w3.T, ((0, 0), (0, 127))).astype(jnp.bfloat16),
        jnp.pad(b3, (0, 127)).reshape(1, 128).astype(jnp.float32),
    )
    return prepped


def convnet_forward(prepped, x):
    # NCHW input (PyTorch layout) -> NHWC once; bf16 activations for the MXU.
    y = x.transpose(0, 2, 3, 1).astype(jnp.bfloat16)
    for name, _, cout, k, stride in CONV_CFG:
        w_p, b_p = prepped[name]
        y = conv2d_pallas(y, w_p, b_p, cout, k, k, stride)
    flat = y.reshape(y.shape[0], -1)     # NHWC flatten; w1 rows pre-permuted
    return pallas_head(flat, *prepped["head"])


# ------------------------------ reference ---------------------------------

def init_params(key):
    ks = jax.random.split(key, 14)

    def conv_p(kw_, kb_, o, c, k):
        s = 1.0 / (c * k * k) ** 0.5
        return (jax.random.normal(kw_, (o, c, k, k), jnp.float32) * s,
                jax.random.normal(kb_, (o,), jnp.float32) * s)

    def lin_p(kw_, kb_, o, i):
        s = 1.0 / i ** 0.5
        return (jax.random.normal(kw_, (o, i), jnp.float32) * s,
                jax.random.normal(kb_, (o,), jnp.float32) * s)

    return {
        "conv1": conv_p(ks[0], ks[1], 32, 3, 7),
        "conv2": conv_p(ks[2], ks[3], 64, 32, 5),
        "conv3": conv_p(ks[4], ks[5], 128, 64, 3),
        "conv4": conv_p(ks[6], ks[7], 256, 128, 3),
        "output1": lin_p(ks[8], ks[9], 256, 1024),
        "output2": lin_p(ks[10], ks[11], 256, 256),
        "output3": lin_p(ks[12], ks[13], 1, 256),
    }


def reference_forward(params, x):
    y = x
    for name, s in [("conv1", 2), ("conv2", 2), ("conv3", 2), ("conv4", 2)]:
        w, b = params[name]
        y = lax.conv_general_dilated(
            y, w, (s, s), "VALID",
            dimension_numbers=("NCHW", "OIHW", "NCHW"),
            precision=lax.Precision.HIGHEST)
        y = jnp.maximum(y + b[None, :, None, None], 0.0)
    h = y.reshape(y.shape[0], -1)
    (w1, b1), (w2, b2), (w3, b3) = (params["output1"], params["output2"],
                                    params["output3"])
    h = jnp.dot(h, w1.T, precision=lax.Precision.HIGHEST) + b1
    for _ in range(10):
        h = jnp.dot(h, w2.T, precision=lax.Precision.HIGHEST) + b2
    return jnp.dot(h, w3.T, precision=lax.Precision.HIGHEST) + b3


if __name__ == "__main__":
    key = jax.random.PRNGKey(0)
    kx, kp = jax.random.split(key)
    # Input 64x64 is required so conv4 output flattens to 256*2*2 = 1024.
    x = jax.random.normal(kx, (2, 3, 64, 64), jnp.float32)
    params = init_params(kp)
    prepped = prepare_params(params)     # one-time prep, outside the forward

    fwd = jax.jit(convnet_forward)
    out = jax.block_until_ready(fwd(prepped, x))
    assert out.shape == (2, 1), out.shape

    ref = reference_forward(params, x)
    # bf16 MXU inputs (f32 accumulation) -> slightly looser tolerance than f32.
    assert jnp.allclose(out, ref, rtol=2e-2, atol=2e-2), (out, ref)

    print("KERNEL_OK")
</pallas_src>

<mosaic_0001>
module attributes {stable_mosaic.version = 11 : i64} {
  func.func @_mm_bias_relu_kernel(%arg0: i32, %arg1: memref<848x256xbf16, #tpu.memory_space<vmem>>, %arg2: memref<256x128xbf16, #tpu.memory_space<vmem>>, %arg3: memref<1x128xf32, #tpu.memory_space<vmem>>, %arg4: memref<848x128xbf16, #tpu.memory_space<vmem>>) attributes {dimension_semantics = [#tpu.dimension_semantics<parallel>], iteration_bounds = array<i64: 2>, scalar_prefetch = 0 : i64, scratch_operands = 0 : i64, tpu.core_type = #tpu.core_type<tc>, window_params = [{transform_indices = @transform_0, window_bounds = array<i64: 848, 256>}, {pipeline_mode = #tpu.pipeline_mode<synchronous>, transform_indices = @transform_1, window_bounds = array<i64: 256, 128>}, {pipeline_mode = #tpu.pipeline_mode<synchronous>, transform_indices = @transform_2, window_bounds = array<i64: 1, 128>}, {transform_indices = @transform_3, window_bounds = array<i64: 848, 128>}]} {
    %c0 = arith.constant 0 : index
    %c0_0 = arith.constant 0 : index
    %0 = vector.load %arg1[%c0, %c0_0] : memref<848x256xbf16, #tpu.memory_space<vmem>>, vector<848x256xbf16>
    %c0_1 = arith.constant 0 : index
    %c0_2 = arith.constant 0 : index
    %1 = vector.load %arg2[%c0_1, %c0_2] : memref<256x128xbf16, #tpu.memory_space<vmem>>, vector<256x128xbf16>
    %cst = arith.constant dense<0.000000e+00> : vector<848x128xf32>
    %2 = tpu.matmul %0, %1, %cst {dimension_numbers = #tpu.dot_dimension_numbers<[1], [0], [0], [1], [0, 0, 1, 1], [], []>} : vector<848x256xbf16>, vector<256x128xbf16>, vector<848x128xf32> -> vector<848x128xf32>
    %c0_3 = arith.constant 0 : index
    %c0_4 = arith.constant 0 : index
    %3 = vector.load %arg3[%c0_3, %c0_4] : memref<1x128xf32, #tpu.memory_space<vmem>>, vector<1x128xf32>
    %4 = vector.broadcast %3 : vector<1x128xf32> to vector<848x128xf32>
    %5 = arith.addf %2, %4 : vector<848x128xf32>
    %cst_5 = arith.constant 0.000000e+00 : f32
    %6 = vector.broadcast %cst_5 : f32 to vector<848x128xf32>
    %7 = arith.maximumf %5, %6 : vector<848x128xf32>
    %8 = arith.truncf %7 : vector<848x128xf32> to vector<848x128xbf16>
    %c0_6 = arith.constant 0 : index
    %c0_7 = arith.constant 0 : index
    %9 = vector.load %arg4[%c0_6, %c0_7] : memref<848x128xbf16, #tpu.memory_space<vmem>>, vector<848x128xbf16>
    tpu.vector_store %arg4[%c0_6, %c0_7], %8 {strides = array<i32>} : memref<848x128xbf16, #tpu.memory_space<vmem>>, vector<848x128xbf16>,
    return
  }
  func.func @transform_0(%arg0: i32) -> (i32, i32) {
    %c0_i32 = arith.constant 0 : i32
    %c0_i32_0 = arith.constant 0 : i32
    return %arg0, %c0_i32 : i32, i32
  }
  func.func @transform_1(%arg0: i32) -> (i32, i32) {
    %c0_i32 = arith.constant 0 : i32
    %c0_i32_0 = arith.constant 0 : i32
    %c0_i32_1 = arith.constant 0 : i32
    return %c0_i32, %c0_i32_0 : i32, i32
  }
  func.func @transform_2(%arg0: i32) -> (i32, i32) {
    %c0_i32 = arith.constant 0 : i32
    %c0_i32_0 = arith.constant 0 : i32
    %c0_i32_1 = arith.constant 0 : i32
    return %c0_i32, %c0_i32_0 : i32, i32
  }
  func.func @transform_3(%arg0: i32) -> (i32, i32) {
    %c0_i32 = arith.constant 0 : i32
    %c0_i32_0 = arith.constant 0 : i32
    return %arg0, %c0_i32 : i32, i32
  }
}

module attributes {stable_mosaic.version = 11 : i64} {
  func.func @_mm_bias_relu_kernel(%arg0: i32, %arg1: memref<344x896xbf16, #tpu.memory_space<vmem>>, %arg2: memref<896x128xbf16, #tpu.memory_space<vmem>>, %arg3: memref<1x128xf32, #tpu.memory_space<vmem>>, %arg4: memref<344x128xbf16, #tpu.memory_space<vmem>>) attributes {dimension_semantics = [#tpu.dimension_semantics<parallel>], iteration_bounds = array<i64: 1>, scalar_prefetch = 0 : i64, scratch_operands = 0 : i64, tpu.core_type = #tpu.core_type<tc>, window_params = [{transform_indices = @transform_0, window_bounds = array<i64: 344, 896>}, {pipeline_mode = #tpu.pipeline_mode<synchronous>, transform_indices = @transform_1, window_bounds = array<i64: 896, 128>}, {pipeline_mode = #tpu.pipeline_mode<synchronous>, transform_indices = @transform_2, window_bounds = array<i64: 1, 128>}, {transform_indices = @transform_3, window_bounds = array<i64: 344, 128>}]} {
    %c0 = arith.constant 0 : index
    %c0_0 = arith.constant 0 : index
    %0 = vector.load %arg1[%c0, %c0_0] : memref<344x896xbf16, #tpu.memory_space<vmem>>, vector<344x896xbf16>
    %c0_1 = arith.constant 0 : index
    %c0_2 = arith.constant 0 : index
    %1 = vector.load %arg2[%c0_1, %c0_2] : memref<896x128xbf16, #tpu.memory_space<vmem>>, vector<896x128xbf16>
    %cst = arith.constant dense<0.000000e+00> : vector<344x128xf32>
    %2 = tpu.matmul %0, %1, %cst {dimension_numbers = #tpu.dot_dimension_numbers<[1], [0], [0], [1], [0, 0, 1, 1], [], []>} : vector<344x896xbf16>, vector<896x128xbf16>, vector<344x128xf32> -> vector<344x128xf32>
    %c0_3 = arith.constant 0 : index
    %c0_4 = arith.constant 0 : index
    %3 = vector.load %arg3[%c0_3, %c0_4] : memref<1x128xf32, #tpu.memory_space<vmem>>, vector<1x128xf32>
    %4 = vector.broadcast %3 : vector<1x128xf32> to vector<344x128xf32>
    %5 = arith.addf %2, %4 : vector<344x128xf32>
    %cst_5 = arith.constant 0.000000e+00 : f32
    %6 = vector.broadcast %cst_5 : f32 to vector<344x128xf32>
    %7 = arith.maximumf %5, %6 : vector<344x128xf32>
    %8 = arith.truncf %7 : vector<344x128xf32> to vector<344x128xbf16>
    %c0_6 = arith.constant 0 : index
    %c0_7 = arith.constant 0 : index
    %9 = vector.load %arg4[%c0_6, %c0_7] : memref<344x128xbf16, #tpu.memory_space<vmem>>, vector<344x128xbf16>
    tpu.vector_store %arg4[%c0_6, %c0_7], %8 {strides = array<i32>} : memref<344x128xbf16, #tpu.memory_space<vmem>>, vector<344x128xbf16>,
    return
  }
  func.func @transform_0(%arg0: i32) -> (i32, i32) {
    %c0_i32 = arith.constant 0 : i32
    %c0_i32_0 = arith.constant 0 : i32
    return %arg0, %c0_i32 : i32, i32
  }
  func.func @transform_1(%arg0: i32) -> (i32, i32) {
    %c0_i32 = arith.constant 0 : i32
    %c0_i32_0 = arith.constant 0 : i32
    %c0_i32_1 = arith.constant 0 : i32
    return %c0_i32, %c0_i32_0 : i32, i32
  }
  func.func @transform_2(%arg0: i32) -> (i32, i32) {
    %c0_i32 = arith.constant 0 : i32
    %c0_i32_0 = arith.constant 0 : i32
    %c0_i32_1 = arith.constant 0 : i32
    return %c0_i32, %c0_i32_0 : i32, i32
  }
  func.func @transform_3(%arg0: i32) -> (i32, i32) {
    %c0_i32 = arith.constant 0 : i32
    %c0_i32_0 = arith.constant 0 : i32
    return %arg0, %c0_i32 : i32, i32
  }
}

module attributes {stable_mosaic.version = 11 : i64} {
  func.func @_mm_bias_relu_kernel(%arg0: i32, %arg1: memref<72x640xbf16, #tpu.memory_space<vmem>>, %arg2: memref<640x128xbf16, #tpu.memory_space<vmem>>, %arg3: memref<1x128xf32, #tpu.memory_space<vmem>>, %arg4: memref<72x128xbf16, #tpu.memory_space<vmem>>) attributes {dimension_semantics = [#tpu.dimension_semantics<parallel>], iteration_bounds = array<i64: 1>, scalar_prefetch = 0 : i64, scratch_operands = 0 : i64, tpu.core_type = #tpu.core_type<tc>, window_params = [{transform_indices = @transform_0, window_bounds = array<i64: 72, 640>}, {pipeline_mode = #tpu.pipeline_mode<synchronous>, transform_indices = @transform_1, window_bounds = array<i64: 640, 128>}, {pipeline_mode = #tpu.pipeline_mode<synchronous>, transform_indices = @transform_2, window_bounds = array<i64: 1, 128>}, {transform_indices = @transform_3, window_bounds = array<i64: 72, 128>}]} {
    %c0 = arith.constant 0 : index
    %c0_0 = arith.constant 0 : index
    %0 = vector.load %arg1[%c0, %c0_0] : memref<72x640xbf16, #tpu.memory_space<vmem>>, vector<72x640xbf16>
    %c0_1 = arith.constant 0 : index
    %c0_2 = arith.constant 0 : index
    %1 = vector.load %arg2[%c0_1, %c0_2] : memref<640x128xbf16, #tpu.memory_space<vmem>>, vector<640x128xbf16>
    %cst = arith.constant dense<0.000000e+00> : vector<72x128xf32>
    %2 = tpu.matmul %0, %1, %cst {dimension_numbers = #tpu.dot_dimension_numbers<[1], [0], [0], [1], [0, 0, 1, 1], [], []>} : vector<72x640xbf16>, vector<640x128xbf16>, vector<72x128xf32> -> vector<72x128xf32>
    %c0_3 = arith.constant 0 : index
    %c0_4 = arith.constant 0 : index
    %3 = vector.load %arg3[%c0_3, %c0_4] : memref<1x128xf32, #tpu.memory_space<vmem>>, vector<1x128xf32>
    %4 = vector.broadcast %3 : vector<1x128xf32> to vector<72x128xf32>
    %5 = arith.addf %2, %4 : vector<72x128xf32>
    %cst_5 = arith.constant 0.000000e+00 : f32
    %6 = vector.broadcast %cst_5 : f32 to vector<72x128xf32>
    %7 = arith.maximumf %5, %6 : vector<72x128xf32>
    %8 = arith.truncf %7 : vector<72x128xf32> to vector<72x128xbf16>
    %c0_6 = arith.constant 0 : index
    %c0_7 = arith.constant 0 : index
    %9 = vector.load %arg4[%c0_6, %c0_7] : memref<72x128xbf16, #tpu.memory_space<vmem>>, vector<72x128xbf16>
    tpu.vector_store %arg4[%c0_6, %c0_7], %8 {strides = array<i32>} : memref<72x128xbf16, #tpu.memory_space<vmem>>, vector<72x128xbf16>,
    return
  }
  func.func @transform_0(%arg0: i32) -> (i32, i32) {
    %c0_i32 = arith.constant 0 : i32
    %c0_i32_0 = arith.constant 0 : i32
    return %arg0, %c0_i32 : i32, i32
  }
  func.func @transform_1(%arg0: i32) -> (i32, i32) {
    %c0_i32 = arith.constant 0 : i32
    %c0_i32_0 = arith.constant 0 : i32
    %c0_i32_1 = arith.constant 0 : i32
    return %c0_i32, %c0_i32_0 : i32, i32
  }
  func.func @transform_2(%arg0: i32) -> (i32, i32) {
    %c0_i32 = arith.constant 0 : i32
    %c0_i32_0 = arith.constant 0 : i32
    %c0_i32_1 = arith.constant 0 : i32
    return %c0_i32, %c0_i32_0 : i32, i32
  }
  func.func @transform_3(%arg0: i32) -> (i32, i32) {
    %c0_i32 = arith.constant 0 : i32
    %c0_i32_0 = arith.constant 0 : i32
    return %arg0, %c0_i32 : i32, i32
  }
}

module attributes {stable_mosaic.version = 11 : i64} {
  func.func @_mm_bias_relu_kernel(%arg0: i32, %arg1: memref<8x1152xbf16, #tpu.memory_space<vmem>>, %arg2: memref<1152x256xbf16, #tpu.memory_space<vmem>>, %arg3: memref<1x256xf32, #tpu.memory_space<vmem>>, %arg4: memref<8x256xbf16, #tpu.memory_space<vmem>>) attributes {dimension_semantics = [#tpu.dimension_semantics<parallel>], iteration_bounds = array<i64: 1>, scalar_prefetch = 0 : i64, scratch_operands = 0 : i64, tpu.core_type = #tpu.core_type<tc>, window_params = [{transform_indices = @transform_0, window_bounds = array<i64: 8, 1152>}, {pipeline_mode = #tpu.pipeline_mode<synchronous>, transform_indices = @transform_1, window_bounds = array<i64: 1152, 256>}, {pipeline_mode = #tpu.pipeline_mode<synchronous>, transform_indices = @transform_2, window_bounds = array<i64: 1, 256>}, {transform_indices = @transform_3, window_bounds = array<i64: 8, 256>}]} {
    %c0 = arith.constant 0 : index
    %c0_0 = arith.constant 0 : index
    %0 = vector.load %arg1[%c0, %c0_0] : memref<8x1152xbf16, #tpu.memory_space<vmem>>, vector<8x1152xbf16>
    %c0_1 = arith.constant 0 : index
    %c0_2 = arith.constant 0 : index
    %1 = vector.load %arg2[%c0_1, %c0_2] : memref<1152x256xbf16, #tpu.memory_space<vmem>>, vector<1152x256xbf16>
    %cst = arith.constant dense<0.000000e+00> : vector<8x256xf32>
    %2 = tpu.matmul %0, %1, %cst {dimension_numbers = #tpu.dot_dimension_numbers<[1], [0], [0], [1], [0, 0, 1, 1], [], []>} : vector<8x1152xbf16>, vector<1152x256xbf16>, vector<8x256xf32> -> vector<8x256xf32>
    %c0_3 = arith.constant 0 : index
    %c0_4 = arith.constant 0 : index
    %3 = vector.load %arg3[%c0_3, %c0_4] : memref<1x256xf32, #tpu.memory_space<vmem>>, vector<1x256xf32>
    %4 = vector.broadcast %3 : vector<1x256xf32> to vector<8x256xf32>
    %5 = arith.addf %2, %4 : vector<8x256xf32>
    %cst_5 = arith.constant 0.000000e+00 : f32
    %6 = vector.broadcast %cst_5 : f32 to vector<8x256xf32>
    %7 = arith.maximumf %5, %6 : vector<8x256xf32>
    %8 = arith.truncf %7 : vector<8x256xf32> to vector<8x256xbf16>
    %c0_6 = arith.constant 0 : index
    %c0_7 = arith.constant 0 : index
    %9 = vector.load %arg4[%c0_6, %c0_7] : memref<8x256xbf16, #tpu.memory_space<vmem>>, vector<8x256xbf16>
    tpu.vector_store %arg4[%c0_6, %c0_7], %8 {strides = array<i32>} : memref<8x256xbf16, #tpu.memory_space<vmem>>, vector<8x256xbf16>,
    return
  }
  func.func @transform_0(%arg0: i32) -> (i32, i32) {
    %c0_i32 = arith.constant 0 : i32
    %c0_i32_0 = arith.constant 0 : i32
    return %arg0, %c0_i32 : i32, i32
  }
  func.func @transform_1(%arg0: i32) -> (i32, i32) {
    %c0_i32 = arith.constant 0 : i32
    %c0_i32_0 = arith.constant 0 : i32
    %c0_i32_1 = arith.constant 0 : i32
    return %c0_i32, %c0_i32_0 : i32, i32
  }
  func.func @transform_2(%arg0: i32) -> (i32, i32) {
    %c0_i32 = arith.constant 0 : i32
    %c0_i32_0 = arith.constant 0 : i32
    %c0_i32_1 = arith.constant 0 : i32
    return %c0_i32, %c0_i32_0 : i32, i32
  }
  func.func @transform_3(%arg0: i32) -> (i32, i32) {
    %c0_i32 = arith.constant 0 : i32
    %c0_i32_0 = arith.constant 0 : i32
    return %arg0, %c0_i32 : i32, i32
  }
}

module attributes {stable_mosaic.version = 11 : i64} {
  func.func @_head_kernel(%arg0: i32, %arg1: memref<8x1024xbf16, #tpu.memory_space<vmem>>, %arg2: memref<1024x256xbf16, #tpu.memory_space<vmem>>, %arg3: memref<1x256xf32, #tpu.memory_space<vmem>>, %arg4: memref<256x256xbf16, #tpu.memory_space<vmem>>, %arg5: memref<1x256xf32, #tpu.memory_space<vmem>>, %arg6: memref<256x128xbf16, #tpu.memory_space<vmem>>, %arg7: memref<1x128xf32, #tpu.memory_space<vmem>>, %arg8: memref<8x128xf32, #tpu.memory_space<vmem>>) attributes {dimension_semantics = [#tpu.dimension_semantics<arbitrary>], iteration_bounds = array<i64: 1>, scalar_prefetch = 0 : i64, scratch_operands = 0 : i64, tpu.core_type = #tpu.core_type<tc>, window_params = [{pipeline_mode = #tpu.pipeline_mode<synchronous>, transform_indices = @transform_0, window_bounds = array<i64: 8, 1024>}, {pipeline_mode = #tpu.pipeline_mode<synchronous>, transform_indices = @transform_1, window_bounds = array<i64: 1024, 256>}, {pipeline_mode = #tpu.pipeline_mode<synchronous>, transform_indices = @transform_2, window_bounds = array<i64: 1, 256>}, {pipeline_mode = #tpu.pipeline_mode<synchronous>, transform_indices = @transform_3, window_bounds = array<i64: 256, 256>}, {pipeline_mode = #tpu.pipeline_mode<synchronous>, transform_indices = @transform_4, window_bounds = array<i64: 1, 256>}, {pipeline_mode = #tpu.pipeline_mode<synchronous>, transform_indices = @transform_5, window_bounds = array<i64: 256, 128>}, {pipeline_mode = #tpu.pipeline_mode<synchronous>, transform_indices = @transform_6, window_bounds = array<i64: 1, 128>}, {pipeline_mode = #tpu.pipeline_mode<synchronous>, transform_indices = @transform_7, window_bounds = array<i64: 8, 128>}]} {
    %c0 = arith.constant 0 : index
    %c0_0 = arith.constant 0 : index
    %0 = vector.load %arg1[%c0, %c0_0] : memref<8x1024xbf16, #tpu.memory_space<vmem>>, vector<8x1024xbf16>
    %c0_1 = arith.constant 0 : index
    %c0_2 = arith.constant 0 : index
    %1 = vector.load %arg2[%c0_1, %c0_2] : memref<1024x256xbf16, #tpu.memory_space<vmem>>, vector<1024x256xbf16>
    %cst = arith.constant dense<0.000000e+00> : vector<8x256xf32>
    %2 = tpu.matmul %0, %1, %cst {dimension_numbers = #tpu.dot_dimension_numbers<[1], [0], [0], [1], [0, 0, 1, 1], [], []>} : vector<8x1024xbf16>, vector<1024x256xbf16>, vector<8x256xf32> -> vector<8x256xf32>
    %c0_3 = arith.constant 0 : index
    %c0_4 = arith.constant 0 : index
    %3 = vector.load %arg3[%c0_3, %c0_4] : memref<1x256xf32, #tpu.memory_space<vmem>>, vector<1x256xf32>
    %4 = vector.broadcast %3 : vector<1x256xf32> to vector<8x256xf32>
    %5 = arith.addf %2, %4 : vector<8x256xf32>
    %c0_5 = arith.constant 0 : index
    %c0_6 = arith.constant 0 : index
    %6 = vector.load %arg4[%c0_5, %c0_6] : memref<256x256xbf16, #tpu.memory_space<vmem>>, vector<256x256xbf16>
    %c0_7 = arith.constant 0 : index
    %c0_8 = arith.constant 0 : index
    %7 = vector.load %arg5[%c0_7, %c0_8] : memref<1x256xf32, #tpu.memory_space<vmem>>, vector<1x256xf32>
    %8 = arith.truncf %5 : vector<8x256xf32> to vector<8x256xbf16>
    %cst_9 = arith.constant dense<0.000000e+00> : vector<8x256xf32>
    %9 = tpu.matmul %8, %6, %cst_9 {dimension_numbers = #tpu.dot_dimension_numbers<[1], [0], [0], [1], [0, 0, 1, 1], [], []>} : vector<8x256xbf16>, vector<256x256xbf16>, vector<8x256xf32> -> vector<8x256xf32>
    %10 = vector.broadcast %7 : vector<1x256xf32> to vector<8x256xf32>
    %11 = arith.addf %9, %10 : vector<8x256xf32>
    %12 = arith.truncf %11 : vector<8x256xf32> to vector<8x256xbf16>
    %cst_10 = arith.constant dense<0.000000e+00> : vector<8x256xf32>
    %13 = tpu.matmul %12, %6, %cst_10 {dimension_numbers = #tpu.dot_dimension_numbers<[1], [0], [0], [1], [0, 0, 1, 1], [], []>} : vector<8x256xbf16>, vector<256x256xbf16>, vector<8x256xf32> -> vector<8x256xf32>
    %14 = vector.broadcast %7 : vector<1x256xf32> to vector<8x256xf32>
    %15 = arith.addf %13, %14 : vector<8x256xf32>
    %16 = arith.truncf %15 : vector<8x256xf32> to vector<8x256xbf16>
    %cst_11 = arith.constant dense<0.000000e+00> : vector<8x256xf32>
    %17 = tpu.matmul %16, %6, %cst_11 {dimension_numbers = #tpu.dot_dimension_numbers<[1], [0], [0], [1], [0, 0, 1, 1], [], []>} : vector<8x256xbf16>, vector<256x256xbf16>, vector<8x256xf32> -> vector<8x256xf32>
    %18 = vector.broadcast %7 : vector<1x256xf32> to vector<8x256xf32>
    %19 = arith.addf %17, %18 : vector<8x256xf32>
    %20 = arith.truncf %19 : vector<8x256xf32> to vector<8x256xbf16>
    %cst_12 = arith.constant dense<0.000000e+00> : vector<8x256xf32>
    %21 = tpu.matmul %20, %6, %cst_12 {dimension_numbers = #tpu.dot_dimension_numbers<[1], [0], [0], [1], [0, 0, 1, 1], [], []>} : vector<8x256xbf16>, vector<256x256xbf16>, vector<8x256xf32> -> vector<8x256xf32>
    %22 = vector.broadcast %7 : vector<1x256xf32> to vector<8x256xf32>
    %23 = arith.addf %21, %22 : vector<8x256xf32>
    %24 = arith.truncf %23 : vector<8x256xf32> to vector<8x256xbf16>
    %cst_13 = arith.constant dense<0.000000e+00> : vector<8x256xf32>
    %25 = tpu.matmul %24, %6, %cst_13 {dimension_numbers = #tpu.dot_dimension_numbers<[1], [0], [0], [1], [0, 0, 1, 1], [], []>} : vector<8x256xbf16>, vector<256x256xbf16>, vector<8x256xf32> -> vector<8x256xf32>
    %26 = vector.broadcast %7 : vector<1x256xf32> to vector<8x256xf32>
    %27 = arith.addf %25, %26 : vector<8x256xf32>
    %28 = arith.truncf %27 : vector<8x256xf32> to vector<8x256xbf16>
    %cst_14 = arith.constant dense<0.000000e+00> : vector<8x256xf32>
    %29 = tpu.matmul %28, %6, %cst_14 {dimension_numbers = #tpu.dot_dimension_numbers<[1], [0], [0], [1], [0, 0, 1, 1], [], []>} : vector<8x256xbf16>, vector<256x256xbf16>, vector<8x256xf32> -> vector<8x256xf32>
    %30 = vector.broadcast %7 : vector<1x256xf32> to vector<8x256xf32>
    %31 = arith.addf %29, %30 : vector<8x256xf32>
    %32 = arith.truncf %31 : vector<8x256xf32> to vector<8x256xbf16>
    %cst_15 = arith.constant dense<0.000000e+00> : vector<8x256xf32>
    %33 = tpu.matmul %32, %6, %cst_15 {dimension_numbers = #tpu.dot_dimension_numbers<[1], [0], [0], [1], [0, 0, 1, 1], [], []>} : vector<8x256xbf16>, vector<256x256xbf16>, vector<8x256xf32> -> vector<8x256xf32>
    %34 = vector.broadcast %7 : vector<1x256xf32> to vector<8x256xf32>
    %35 = arith.addf %33, %34 : vector<8x256xf32>
    %36 = arith.truncf %35 : vector<8x256xf32> to vector<8x256xbf16>
    %cst_16 = arith.constant dense<0.000000e+00> : vector<8x256xf32>
    %37 = tpu.matmul %36, %6, %cst_16 {dimension_numbers = #tpu.dot_dimension_numbers<[1], [0], [0], [1], [0, 0, 1, 1], [], []>} : vector<8x256xbf16>, vector<256x256xbf16>, vector<8x256xf32> -> vector<8x256xf32>
    %38 = vector.broadcast %7 : vector<1x256xf32> to vector<8x256xf32>
    %39 = arith.addf %37, %38 : vector<8x256xf32>
    %40 = arith.truncf %39 : vector<8x256xf32> to vector<8x256xbf16>
    %cst_17 = arith.constant dense<0.000000e+00> : vector<8x256xf32>
    %41 = tpu.matmul %40, %6, %cst_17 {dimension_numbers = #tpu.dot_dimension_numbers<[1], [0], [0], [1], [0, 0, 1, 1], [], []>} : vector<8x256xbf16>, vector<256x256xbf16>, vector<8x256xf32> -> vector<8x256xf32>
    %42 = vector.broadcast %7 : vector<1x256xf32> to vector<8x256xf32>
    %43 = arith.addf %41, %42 : vector<8x256xf32>
    %44 = arith.truncf %43 : vector<8x256xf32> to vector<8x256xbf16>
    %cst_18 = arith.constant dense<0.000000e+00> : vector<8x256xf32>
    %45 = tpu.matmul %44, %6, %cst_18 {dimension_numbers = #tpu.dot_dimension_numbers<[1], [0], [0], [1], [0, 0, 1, 1], [], []>} : vector<8x256xbf16>, vector<256x256xbf16>, vector<8x256xf32> -> vector<8x256xf32>
    %46 = vector.broadcast %7 : vector<1x256xf32> to vector<8x256xf32>
    %47 = arith.addf %45, %46 : vector<8x256xf32>
    %48 = arith.truncf %47 : vector<8x256xf32> to vector<8x256xbf16>
    %c0_19 = arith.constant 0 : index
    %c0_20 = arith.constant 0 : index
    %49 = vector.load %arg6[%c0_19, %c0_20] : memref<256x128xbf16, #tpu.memory_space<vmem>>, vector<256x128xbf16>
    %cst_21 = arith.constant dense<0.000000e+00> : vector<8x128xf32>
    %50 = tpu.matmul %48, %49, %cst_21 {dimension_numbers = #tpu.dot_dimension_numbers<[1], [0], [0], [1], [0, 0, 1, 1], [], []>} : vector<8x256xbf16>, vector<256x128xbf16>, vector<8x128xf32> -> vector<8x128xf32>
    %c0_22 = arith.constant 0 : index
    %c0_23 = arith.constant 0 : index
    %51 = vector.load %arg7[%c0_22, %c0_23] : memref<1x128xf32, #tpu.memory_space<vmem>>, vector<1x128xf32>
    %52 = vector.broadcast %51 : vector<1x128xf32> to vector<8x128xf32>
    %53 = arith.addf %50, %52 : vector<8x128xf32>
    %c0_24 = arith.constant 0 : index
    %c0_25 = arith.constant 0 : index
    %54 = vector.load %arg8[%c0_24, %c0_25] : memref<8x128xf32, #tpu.memory_space<vmem>>, vector<8x128xf32>
    tpu.vector_store %arg8[%c0_24, %c0_25], %53 {strides = array<i32>} : memref<8x128xf32, #tpu.memory_space<vmem>>, vector<8x128xf32>,
    return
  }
  func.func @transform_0(%arg0: i32) -> (i32, i32) {
    %c0_i32 = arith.constant 0 : i32
    %c0_i32_0 = arith.constant 0 : i32
    %c0_i32_1 = arith.constant 0 : i32
    return %c0_i32, %c0_i32_0 : i32, i32
  }
  func.func @transform_1(%arg0: i32) -> (i32, i32) {
    %c0_i32 = arith.constant 0 : i32
    %c0_i32_0 = arith.constant 0 : i32
    %c0_i32_1 = arith.constant 0 : i32
    return %c0_i32, %c0_i32_0 : i32, i32
  }
  func.func @transform_2(%arg0: i32) -> (i32, i32) {
    %c0_i32 = arith.constant 0 : i32
    %c0_i32_0 = arith.constant 0 : i32
    %c0_i32_1 = arith.constant 0 : i32
    return %c0_i32, %c0_i32_0 : i32, i32
  }
  func.func @transform_3(%arg0: i32) -> (i32, i32) {
    %c0_i32 = arith.constant 0 : i32
    %c0_i32_0 = arith.constant 0 : i32
    %c0_i32_1 = arith.constant 0 : i32
    return %c0_i32, %c0_i32_0 : i32, i32
  }
  func.func @transform_4(%arg0: i32) -> (i32, i32) {
    %c0_i32 = arith.constant 0 : i32
    %c0_i32_0 = arith.constant 0 : i32
    %c0_i32_1 = arith.constant 0 : i32
    return %c0_i32, %c0_i32_0 : i32, i32
  }
  func.func @transform_5(%arg0: i32) -> (i32, i32) {
    %c0_i32 = arith.constant 0 : i32
    %c0_i32_0 = arith.constant 0 : i32
    %c0_i32_1 = arith.constant 0 : i32
    return %c0_i32, %c0_i32_0 : i32, i32
  }
  func.func @transform_6(%arg0: i32) -> (i32, i32) {
    %c0_i32 = arith.constant 0 : i32
    %c0_i32_0 = arith.constant 0 : i32
    %c0_i32_1 = arith.constant 0 : i32
    return %c0_i32, %c0_i32_0 : i32, i32
  }
  func.func @transform_7(%arg0: i32) -> (i32, i32) {
    %c0_i32 = arith.constant 0 : i32
    %c0_i32_0 = arith.constant 0 : i32
    %c0_i32_1 = arith.constant 0 : i32
    return %c0_i32, %c0_i32_0 : i32, i32
  }
}

</mosaic_0001>

<bundles_post_ra>
// kernel: convnet_forward.5
= control target key start
LH: loop header
LB: loop body
LE: loop exit
PB: predicated region body
PF: predicated region fallthrough
CT: control target
= control target key end

     0   :  { %s3007_s12 = smov 0   ;;  %s3379_s0 = inlined_call_operand.vmem [shape: bf16[1696,256], index: 0, kind: input, shape index: {}]   ;;  %s3380_s1 = inlined_call_operand.vmem [shape: bf16[256,128], index: 1, kind: input, shape index: {}]   ;;  %s3381_s2 = inlined_call_operand.vmem [shape: f32[1,128], index: 2, kind: input, shape index: {}]   ;;  %s3382_s3 = inlined_call_operand.vmem [shape: bf16[1696,128], index: 3, kind: output, shape index: {}]  }
   0x1 LB: > { %s2098_s13 = sadd.s32 4294967295, %s2984_s12   ;;  %p2102_p0 = scmp.ge.s32.totalorder %s2984_s12, 1  ;;  %s2984_s12 = sphi %s3007_s12, %s13_s12  }
   0x2   : > { %p139_p1 = scmp.lt.s32.totalorder %s2984_s12, 3 }
   0x4   : > { %p140_p2 = pnand %p2102_p0, %p139_p1 }
   0x5   : > { %s164_s16 = smul.u32 (!%p140_p2), 106, %s2098_s13 }
   0x6   : > { %143 = sbr.rel (%p140_p2) target bundleno = 488 (0x1e8), region = 32 }
   0x7   : > { %p165_p3 = scmp.lt.s32.totalorder (!%p140_p2), %s164_s16, 211 }
   0xb   : > { %v2802_v0 = vld [vmem:[%s3380_s1 + $0x38] sm:$0xff]   ;;  %v2986_v1 = vmov 0   ;;  %v2803_v2 = vld [vmem:[%s3380_s1 + $0x30] sm:$0xff]   ;;  %v2804_v3 = vld [vmem:[%s3380_s1 + $0x28] sm:$0xff]   ;;  %s3384_s16 = smov (!%p165_p3, %s164_s16), 211 }
   0xc   : > { %949 = vmatprep.subr.bf16.mxu0 %v2986_v1  ;;  %2761 = vmatprep.subr.bf16.mxu1 %v2986_v1  ;;  %v2805_v4 = vld [vmem:[%s3380_s1 + $0x20] sm:$0xff]   ;;  %s2337_s23 = sshll.u32 %s3384_s16, 3  ;;  %v2806_v5 = vld [vmem:[%s3380_s1 + $0x18] sm:$0xff]   ;;  %v2807_v7 = vld [vmem:[%s3380_s1 + $0x10] sm:$0xff]   ;;  %s2105_s29 = sshll.u32 %s3384_s16, 2 }
   0xd   : > { %950 = vmatpush1.bf16.msra.mxu0 %v2802_v0  ;;  %2777 = vmatpush1.bf16.msra.mxu1 %v2802_v0  ;;  %s3044_s28 = scalar_lea.vmem %s3379_s0, %s2337_s23  ;;  %v2808_v9 = vld [vmem:[%s3380_s1 + $0x8] sm:$0xff]   ;;  %v2809_v10 = vld [vmem:[%s3380_s1] sm:$0xff]   ;;  %v2810_v11 = vld [vmem:[%s3380_s1 + $0x78] sm:$0xff]   ;;  %s3221_s5 = scalar_lea.vmem %s3382_s3, %s2105_s29 }
   0xe   : > { %951 = vmatprep.subr.bf16.mxu0 %v2986_v1  ;;  %2762 = vmatprep.subr.bf16.mxu1 %v2986_v1  ;;  %v2820_v6 = vld [vmem:[%s3044_s28 + $0x4] ss:$8 sps:$4 sm:$0xff]   ;;  %v2823_v8 = vld [vmem:[%s3044_s28 + $0x1b4] ss:$8 sps:$4 sm:$0xff]   ;;  %v2818_v19 = vld [vmem:[%s3044_s28] ss:$8 sps:$4 sm:$0xff]  }
   0xf   : > { %981 = vmatprep.mubr.bf16.mxu0 %v2820_v6  ;;  %1197 = vmatprep.mubr.bf16.mxu1 %v2823_v8  ;;  %v2811_v12 = vld [vmem:[%s3380_s1 + $0x70] sm:$0xff]   ;;  %v2812_v13 = vld [vmem:[%s3380_s1 + $0x68] sm:$0xff]   ;;  %v2813_v14 = vld [vmem:[%s3380_s1 + $0x60] sm:$0xff]  }
  0x10   : > { %v2814_v15 = vld [vmem:[%s3380_s1 + $0x58] sm:$0xff]   ;;  %v2815_v16 = vld [vmem:[%s3380_s1 + $0x50] sm:$0xff]   ;;  %v2816_v17 = vld [vmem:[%s3380_s1 + $0x48] sm:$0xff]  }
  0x11   : > { %952 = vmatpush1.bf16.msra.mxu0 %v2803_v2  ;;  %2778 = vmatpush1.bf16.msra.mxu1 %v2803_v2  ;;  %v2817_v18 = vld [vmem:[%s3380_s1 + $0x40] sm:$0xff]   ;;  %v2821_v20 = vld [vmem:[%s3044_s28 + $0x1b0] ss:$8 sps:$4 sm:$0xff]   ;;  %v2824_v21 = vld [vmem:[%s3044_s28 + $0x14] ss:$8 sps:$4 sm:$0xff]  }
  0x12   : > { %953 = vmatprep.subr.bf16.mxu0 %v2986_v1  ;;  %2763 = vmatprep.subr.bf16.mxu1 %v2986_v1  ;;  %v2827_v22 = vld [vmem:[%s3044_s28 + $0x1c4] ss:$8 sps:$4 sm:$0xff]   ;;  %v2826_v23 = vld [vmem:[%s3044_s28 + $0x10] ss:$8 sps:$4 sm:$0xff]   ;;  %v2829_v24 = vld [vmem:[%s3044_s28 + $0x1c0] ss:$8 sps:$4 sm:$0xff]  }
  0x13   : > { %v2830_v25 = vld [vmem:[%s3044_s28 + $0x24] ss:$8 sps:$4 sm:$0xff]   ;;  %v2833_v26 = vld [vmem:[%s3044_s28 + $0x1d4] ss:$8 sps:$4 sm:$0xff]   ;;  %v2832_v27 = vld [vmem:[%s3044_s28 + $0x20] ss:$8 sps:$4 sm:$0xff]  }
  0x14   : > { %v2835_v28 = vld [vmem:[%s3044_s28 + $0x1d0] ss:$8 sps:$4 sm:$0xff]   ;;  %v2836_v29 = vld [vmem:[%s3044_s28 + $0x34] ss:$8 sps:$4 sm:$0xff]   ;;  %v2839_v30 = vld [vmem:[%s3044_s28 + $0x1e4] ss:$8 sps:$4 sm:$0xff]  }
  0x15   : > { %954 = vmatpush1.bf16.msra.mxu0 %v2804_v3  ;;  %2779 = vmatpush1.bf16.msra.mxu1 %v2804_v3  ;;  %v2838_v31 = vld [vmem:[%s3044_s28 + $0x30] ss:$8 sps:$4 sm:$0xff]   ;;  %v2841_v32 = vld [vmem:[%s3044_s28 + $0x1e0] ss:$8 sps:$4 sm:$0xff]   ;;  %v2842_v33 = vld [vmem:[%s3044_s28 + $0x44] ss:$8 sps:$4 sm:$0xff]  }
  0x16   : > { %955 = vmatprep.subr.bf16.mxu0 %v2986_v1  ;;  %2764 = vmatprep.subr.bf16.mxu1 %v2986_v1  ;;  %v2845_v34 = vld [vmem:[%s3044_s28 + $0x1f4] ss:$8 sps:$4 sm:$0xff]   ;;  %v2844_v35 = vld [vmem:[%s3044_s28 + $0x40] ss:$8 sps:$4 sm:$0xff]   ;;  %v2847_v36 = vld [vmem:[%s3044_s28 + $0x1f0] ss:$8 sps:$4 sm:$0xff]  }
  0x17   : > { %v2848_v37 = vld [vmem:[%s3044_s28 + $0x54] ss:$8 sps:$4 sm:$0xff]   ;;  %v2851_v38 = vld [vmem:[%s3044_s28 + $0x204] ss:$8 sps:$4 sm:$0xff]   ;;  %v2850_v39 = vld [vmem:[%s3044_s28 + $0x50] ss:$8 sps:$4 sm:$0xff]  }
  0x18   : > { %v2853_v40 = vld [vmem:[%s3044_s28 + $0x200] ss:$8 sps:$4 sm:$0xff]   ;;  %v2854_v41 = vld [vmem:[%s3044_s28 + $0x64] ss:$8 sps:$4 sm:$0xff]   ;;  %v2857_v42 = vld [vmem:[%s3044_s28 + $0x214] ss:$8 sps:$4 sm:$0xff]  }
  0x19   : > { %956 = vmatpush1.bf16.msra.mxu0 %v2805_v4  ;;  %2780 = vmatpush1.bf16.msra.mxu1 %v2805_v4  ;;  %v2856_v43 = vld [vmem:[%s3044_s28 + $0x60] ss:$8 sps:$4 sm:$0xff]   ;;  %v2859_v44 = vld [vmem:[%s3044_s28 + $0x210] ss:$8 sps:$4 sm:$0xff]   ;;  %v2860_v45 = vld [vmem:[%s3044_s28 + $0x74] ss:$8 sps:$4 sm:$0xff]  }
  0x1a   : > { %957 = vmatprep.subr.bf16.mxu0 %v2986_v1  ;;  %2765 = vmatprep.subr.bf16.mxu1 %v2986_v1  ;;  %v2863_v46 = vld [vmem:[%s3044_s28 + $0x224] ss:$8 sps:$4 sm:$0xff]   ;;  %v2862_v47 = vld [vmem:[%s3044_s28 + $0x70] ss:$8 sps:$4 sm:$0xff]   ;;  %v2865_v48 = vld [vmem:[%s3044_s28 + $0x220] ss:$8 sps:$4 sm:$0xff]  }
  0x1b   : > { %v2866_v49 = vld [vmem:[%s3044_s28 + $0x84] ss:$8 sps:$4 sm:$0xff]   ;;  %v2869_v50 = vld [vmem:[%s3044_s28 + $0x234] ss:$8 sps:$4 sm:$0xff]   ;;  %v2868_v51 = vld [vmem:[%s3044_s28 + $0x80] ss:$8 sps:$4 sm:$0xff]  }
  0x1c   : > { %v2871_v52 = vld [vmem:[%s3044_s28 + $0x230] ss:$8 sps:$4 sm:$0xff]   ;;  %v2872_v53 = vld [vmem:[%s3044_s28 + $0x94] ss:$8 sps:$4 sm:$0xff]   ;;  %v2875_v54 = vld [vmem:[%s3044_s28 + $0x244] ss:$8 sps:$4 sm:$0xff]  }
  0x1d   : > { %958 = vmatpush1.bf16.msra.mxu0 %v2806_v5  ;;  %2781 = vmatpush1.bf16.msra.mxu1 %v2806_v5  ;;  %v2874_v55 = vld [vmem:[%s3044_s28 + $0x90] ss:$8 sps:$4 sm:$0xff]   ;;  %v2877_v56 = vld [vmem:[%s3044_s28 + $0x240] ss:$8 sps:$4 sm:$0xff]   ;;  %v2878_v57 = vld [vmem:[%s3044_s28 + $0xa4] ss:$8 sps:$4 sm:$0xff]  }
  0x1e   : > { %959 = vmatprep.subr.bf16.mxu0 %v2986_v1  ;;  %2766 = vmatprep.subr.bf16.mxu1 %v2986_v1  ;;  %v2881_v58 = vld [vmem:[%s3044_s28 + $0x254] ss:$8 sps:$4 sm:$0xff]   ;;  %v2880_v59 = vld [vmem:[%s3044_s28 + $0xa0] ss:$8 sps:$4 sm:$0xff]   ;;  %v2883_v60 = vld [vmem:[%s3044_s28 + $0x250] ss:$8 sps:$4 sm:$0xff]  }
  0x1f   : > { %v2884_v61 = vld [vmem:[%s3044_s28 + $0xb4] ss:$8 sps:$4 sm:$0xff]   ;;  %v2887_v62 = vld [vmem:[%s3044_s28 + $0x264] ss:$8 sps:$4 sm:$0xff]   ;;  %v2886_v63 = vld [vmem:[%s3044_s28 + $0xb0] ss:$8 sps:$4 sm:$0xff]  }
  0x20   : > { %v2889_v0 = vld [vmem:[%s3044_s28 + $0x260] ss:$8 sps:$4 sm:$0xff]   ;;  %v2893_v2 = vld [vmem:[%s3044_s28 + $0x274] ss:$8 sps:$4 sm:$0xff]   ;;  %v2895_v4 = vld [vmem:[%s3044_s28 + $0x270] ss:$8 sps:$4 sm:$0xff]  }
  0x21   : > { %960 = vmatpush1.bf16.msra.mxu0 %v2807_v7  ;;  %2782 = vmatpush1.bf16.msra.mxu1 %v2807_v7  ;;  %v2892_v3 = vld [vmem:[%s3044_s28 + $0xc0] ss:$8 sps:$4 sm:$0xff]   ;;  %v2896_v5 = vld [vmem:[%s3044_s28 + $0xd4] ss:$8 sps:$4 sm:$0xff]   ;;  %v2899_v6 = vld [vmem:[%s3044_s28 + $0x284] ss:$8 sps:$4 sm:$0xff]  }
  0x22   : > { %961 = vmatprep.subr.bf16.mxu0 %v2986_v1  ;;  %2767 = vmatprep.subr.bf16.mxu1 %v2986_v1  ;;  %v2898_v7 = vld [vmem:[%s3044_s28 + $0xd0] ss:$8 sps:$4 sm:$0xff]   ;;  %v2901_v8 = vld [vmem:[%s3044_s28 + $0x280] ss:$8 sps:$4 sm:$0xff]  }
  0x25   : > { %962 = vmatpush1.bf16.msra.mxu0 %v2808_v9  ;;  %2783 = vmatpush1.bf16.msra.mxu1 %v2808_v9  ;;  %v2902_v9 = vld [vmem:[%s3044_s28 + $0xe4] ss:$8 sps:$4 sm:$0xff]  }
  0x26   : > { %963 = vmatprep.subr.bf16.mxu0 %v2986_v1  ;;  %2768 = vmatprep.subr.bf16.mxu1 %v2986_v1 }
  0x29   : > { %964 = vmatpush1.bf16.msra.mxu0 %v2809_v10  ;;  %2784 = vmatpush1.bf16.msra.mxu1 %v2809_v10  ;;  %v2905_v10 = vld [vmem:[%s3044_s28 + $0x294] ss:$8 sps:$4 sm:$0xff]  }
  0x2a   : > { %965 = vmatprep.subr.bf16.mxu0 %v2986_v1  ;;  %2769 = vmatprep.subr.bf16.mxu1 %v2986_v1 }
  0x2d   : > { %966 = vmatpush2.bf16.msra.mxu0 %v2810_v11  ;;  %2785 = vmatpush2.bf16.msra.mxu1 %v2810_v11  ;;  %v2904_v11 = vld [vmem:[%s3044_s28 + $0xe0] ss:$8 sps:$4 sm:$0xff]  }
  0x2e   : > { %967 = vmatprep.subr.bf16.mxu0 %v2986_v1  ;;  %2770 = vmatprep.subr.bf16.mxu1 %v2986_v1 }
  0x31   : > { %968 = vmatpush2.bf16.msra.mxu0 %v2811_v12  ;;  %2786 = vmatpush2.bf16.msra.mxu1 %v2811_v12  ;;  %v2907_v12 = vld [vmem:[%s3044_s28 + $0x290] ss:$8 sps:$4 sm:$0xff]  }
  0x32   : > { %969 = vmatprep.subr.bf16.mxu0 %v2986_v1  ;;  %2771 = vmatprep.subr.bf16.mxu1 %v2986_v1 }
  0x35   : > { %970 = vmatpush2.bf16.msra.mxu0 %v2812_v13  ;;  %2787 = vmatpush2.bf16.msra.mxu1 %v2812_v13  ;;  %v2908_v13 = vld [vmem:[%s3044_s28 + $0xf4] ss:$8 sps:$4 sm:$0xff]  }
  0x36   : > { %971 = vmatprep.subr.bf16.mxu0 %v2986_v1  ;;  %2772 = vmatprep.subr.bf16.mxu1 %v2986_v1 }
  0x39   : > { %972 = vmatpush2.bf16.msra.mxu0 %v2813_v14  ;;  %2788 = vmatpush2.bf16.msra.mxu1 %v2813_v14  ;;  %v2911_v14 = vld [vmem:[%s3044_s28 + $0x2a4] ss:$8 sps:$4 sm:$0xff]  }
  0x3a   : > { %973 = vmatprep.subr.bf16.mxu0 %v2986_v1  ;;  %2773 = vmatprep.subr.bf16.mxu1 %v2986_v1 }
  0x3d   : > { %974 = vmatpush2.bf16.msra.mxu0 %v2814_v15  ;;  %2789 = vmatpush2.bf16.msra.mxu1 %v2814_v15  ;;  %v2910_v15 = vld [vmem:[%s3044_s28 + $0xf0] ss:$8 sps:$4 sm:$0xff]  }
  0x3e   : > { %975 = vmatprep.subr.bf16.mxu0 %v2986_v1  ;;  %2774 = vmatprep.subr.bf16.mxu1 %v2986_v1 }
  0x41   : > { %976 = vmatpush2.bf16.msra.mxu0 %v2815_v16  ;;  %2790 = vmatpush2.bf16.msra.mxu1 %v2815_v16  ;;  %v2913_v16 = vld [vmem:[%s3044_s28 + $0x2a0] ss:$8 sps:$4 sm:$0xff]  }
  0x42   : > { %977 = vmatprep.subr.bf16.mxu0 %v2986_v1  ;;  %2775 = vmatprep.subr.bf16.mxu1 %v2986_v1 }
  0x45   : > { %978 = vmatpush2.bf16.msra.mxu0 %v2816_v17  ;;  %2791 = vmatpush2.bf16.msra.mxu1 %v2816_v17  ;;  %v2914_v17 = vld [vmem:[%s3044_s28 + $0x104] ss:$8 sps:$4 sm:$0xff]  }
  0x46   : > { %979 = vmatprep.subr.bf16.mxu0 %v2986_v1  ;;  %2776 = vmatprep.subr.bf16.mxu1 %v2986_v1  ;;  %v2890_v1 = vld [vmem:[%s3044_s28 + $0xc4] ss:$8 sps:$4 sm:$0xff]  }
  0x49   : > { %980 = vmatpush2.bf16.msra.mxu0 %v2817_v18  ;;  %2792 = vmatpush2.bf16.msra.mxu1 %v2817_v18  ;;  %v2917_v18 = vld [vmem:[%s3044_s28 + $0x2b4] ss:$8 sps:$4 sm:$0xff]  }
  0x4c   : > { %982 = vmatmul.mubr.bf16.vlgmr.msra.gmra.mxu0 %v2818_v19  ;;  %1198 = vmatmul.mubr.bf16.vlgmr.msra.gmra.mxu1 %v2821_v20  ;;  %v2916_v19 = vld [vmem:[%s3044_s28 + $0x100] ss:$8 sps:$4 sm:$0xff]   ;;  %v2919_v20 = vld [vmem:[%s3044_s28 + $0x2b0] ss:$8 sps:$4 sm:$0xff]  }
  0x4d   : > { %989 = vmatprep.mubr.bf16.mxu0 %v2824_v21  ;;  %1205 = vmatprep.mubr.bf16.mxu1 %v2827_v22  ;;  %v2920_v21 = vld [vmem:[%s3044_s28 + $0x114] ss:$8 sps:$4 sm:$0xff]   ;;  %v2923_v22 = vld [vmem:[%s3044_s28 + $0x2c4] ss:$8 sps:$4 sm:$0xff]  }
  0x54   : > { %990 = vmatmul.mubr.bf16.gmra.mxu0 %v2826_v23  ;;  %1206 = vmatmul.mubr.bf16.gmra.mxu1 %v2829_v24  ;;  %v2922_v23 = vld [vmem:[%s3044_s28 + $0x110] ss:$8 sps:$4 sm:$0xff]   ;;  %v2925_v24 = vld [vmem:[%s3044_s28 + $0x2c0] ss:$8 sps:$4 sm:$0xff]  }
  0x55   : > { %997 = vmatprep.mubr.bf16.mxu0 %v2830_v25  ;;  %1213 = vmatprep.mubr.bf16.mxu1 %v2833_v26  ;;  %v2926_v25 = vld [vmem:[%s3044_s28 + $0x124] ss:$8 sps:$4 sm:$0xff]   ;;  %v2929_v26 = vld [vmem:[%s3044_s28 + $0x2d4] ss:$8 sps:$4 sm:$0xff]  }
  0x5c   : > { %998 = vmatmul.mubr.bf16.gmra.mxu0 %v2832_v27  ;;  %1214 = vmatmul.mubr.bf16.gmra.mxu1 %v2835_v28  ;;  %v2928_v27 = vld [vmem:[%s3044_s28 + $0x120] ss:$8 sps:$4 sm:$0xff]   ;;  %v2931_v28 = vld [vmem:[%s3044_s28 + $0x2d0] ss:$8 sps:$4 sm:$0xff]  }
  0x5d   : > { %1005 = vmatprep.mubr.bf16.mxu0 %v2836_v29  ;;  %1221 = vmatprep.mubr.bf16.mxu1 %v2839_v30  ;;  %v2932_v29 = vld [vmem:[%s3044_s28 + $0x134] ss:$8 sps:$4 sm:$0xff]   ;;  %v2935_v30 = vld [vmem:[%s3044_s28 + $0x2e4] ss:$8 sps:$4 sm:$0xff]  }
  0x64   : > { %1006 = vmatmul.mubr.bf16.gmra.mxu0 %v2838_v31  ;;  %1222 = vmatmul.mubr.bf16.gmra.mxu1 %v2841_v32  ;;  %v2934_v31 = vld [vmem:[%s3044_s28 + $0x130] ss:$8 sps:$4 sm:$0xff]   ;;  %v2937_v32 = vld [vmem:[%s3044_s28 + $0x2e0] ss:$8 sps:$4 sm:$0xff]  }
  0x65   : > { %1013 = vmatprep.mubr.bf16.mxu0 %v2842_v33  ;;  %1229 = vmatprep.mubr.bf16.mxu1 %v2845_v34  ;;  %v2938_v33 = vld [vmem:[%s3044_s28 + $0x144] ss:$8 sps:$4 sm:$0xff]   ;;  %v2941_v34 = vld [vmem:[%s3044_s28 + $0x2f4] ss:$8 sps:$4 sm:$0xff]  }
  0x6c   : > { %1014 = vmatmul.mubr.bf16.gmra.mxu0 %v2844_v35  ;;  %1230 = vmatmul.mubr.bf16.gmra.mxu1 %v2847_v36  ;;  %v2940_v35 = vld [vmem:[%s3044_s28 + $0x140] ss:$8 sps:$4 sm:$0xff]   ;;  %v2943_v36 = vld [vmem:[%s3044_s28 + $0x2f0] ss:$8 sps:$4 sm:$0xff]  }
  0x6d   : > { %1021 = vmatprep.mubr.bf16.mxu0 %v2848_v37  ;;  %1237 = vmatprep.mubr.bf16.mxu1 %v2851_v38  ;;  %v2944_v37 = vld [vmem:[%s3044_s28 + $0x154] ss:$8 sps:$4 sm:$0xff]   ;;  %v2947_v38 = vld [vmem:[%s3044_s28 + $0x304] ss:$8 sps:$4 sm:$0xff]  }
  0x74   : > { %1022 = vmatmul.mubr.bf16.gmra.mxu0 %v2850_v39  ;;  %1238 = vmatmul.mubr.bf16.gmra.mxu1 %v2853_v40  ;;  %v2946_v39 = vld [vmem:[%s3044_s28 + $0x150] ss:$8 sps:$4 sm:$0xff]   ;;  %v2949_v40 = vld [vmem:[%s3044_s28 + $0x300] ss:$8 sps:$4 sm:$0xff]  }
  0x75   : > { %1029 = vmatprep.mubr.bf16.mxu0 %v2854_v41  ;;  %1245 = vmatprep.mubr.bf16.mxu1 %v2857_v42  ;;  %v2950_v41 = vld [vmem:[%s3044_s28 + $0x164] ss:$8 sps:$4 sm:$0xff]   ;;  %v2953_v42 = vld [vmem:[%s3044_s28 + $0x314] ss:$8 sps:$4 sm:$0xff]  }
  0x7c   : > { %1030 = vmatmul.mubr.bf16.gmra.mxu0 %v2856_v43  ;;  %1246 = vmatmul.mubr.bf16.gmra.mxu1 %v2859_v44  ;;  %v2952_v43 = vld [vmem:[%s3044_s28 + $0x160] ss:$8 sps:$4 sm:$0xff]   ;;  %v2955_v44 = vld [vmem:[%s3044_s28 + $0x310] ss:$8 sps:$4 sm:$0xff]  }
  0x7d   : > { %1037 = vmatprep.mubr.bf16.mxu0 %v2860_v45  ;;  %1253 = vmatprep.mubr.bf16.mxu1 %v2863_v46  ;;  %v2956_v45 = vld [vmem:[%s3044_s28 + $0x174] ss:$8 sps:$4 sm:$0xff]   ;;  %v2959_v46 = vld [vmem:[%s3044_s28 + $0x324] ss:$8 sps:$4 sm:$0xff]  }
  0x84   : > { %1038 = vmatmul.mubr.bf16.gmra.mxu0 %v2862_v47  ;;  %1254 = vmatmul.mubr.bf16.gmra.mxu1 %v2865_v48  ;;  %v2958_v47 = vld [vmem:[%s3044_s28 + $0x170] ss:$8 sps:$4 sm:$0xff]   ;;  %v2961_v48 = vld [vmem:[%s3044_s28 + $0x320] ss:$8 sps:$4 sm:$0xff]  }
  0x85   : > { %1045 = vmatprep.mubr.bf16.mxu0 %v2866_v49  ;;  %1261 = vmatprep.mubr.bf16.mxu1 %v2869_v50  ;;  %v2962_v49 = vld [vmem:[%s3044_s28 + $0x184] ss:$8 sps:$4 sm:$0xff]   ;;  %v2965_v50 = vld [vmem:[%s3044_s28 + $0x334] ss:$8 sps:$4 sm:$0xff]  }
  0x8c   : > { %1046 = vmatmul.mubr.bf16.gmra.mxu0 %v2868_v51  ;;  %1262 = vmatmul.mubr.bf16.gmra.mxu1 %v2871_v52  ;;  %v2964_v51 = vld [vmem:[%s3044_s28 + $0x180] ss:$8 sps:$4 sm:$0xff]   ;;  %v2967_v52 = vld [vmem:[%s3044_s28 + $0x330] ss:$8 sps:$4 sm:$0xff]  }
  0x8d   : > { %1053 = vmatprep.mubr.bf16.mxu0 %v2872_v53  ;;  %1269 = vmatprep.mubr.bf16.mxu1 %v2875_v54  ;;  %v2968_v53 = vld [vmem:[%s3044_s28 + $0x194] ss:$8 sps:$4 sm:$0xff]   ;;  %v2971_v54 = vld [vmem:[%s3044_s28 + $0x344] ss:$8 sps:$4 sm:$0xff]  }
  0x94   : > { %1054 = vmatmul.mubr.bf16.gmra.mxu0 %v2874_v55  ;;  %1270 = vmatmul.mubr.bf16.gmra.mxu1 %v2877_v56  ;;  %v3208_v55 = vld [vmem:[%s3381_s2] ss:$0 sm:$0xff] }
  0x95   : > { %1061 = vmatprep.mubr.bf16.mxu0 %v2878_v57  ;;  %1277 = vmatprep.mubr.bf16.mxu1 %v2881_v58 }
  0x9c   : > { %1062 = vmatmul.mubr.bf16.gmra.mxu0 %v2880_v59  ;;  %1278 = vmatmul.mubr.bf16.gmra.mxu1 %v2883_v60 }
  0x9d   : > { %1069 = vmatprep.mubr.bf16.mxu0 %v2884_v61  ;;  %1285 = vmatprep.mubr.bf16.mxu1 %v2887_v62 }
  0xa4   : > { %1070 = vmatmul.mubr.bf16.gmra.mxu0 %v2886_v63  ;;  %1286 = vmatmul.mubr.bf16.gmra.mxu1 %v2889_v0  ;;  %v2970_v0 = vld [vmem:[%s3044_s28 + $0x190] ss:$8 sps:$4 sm:$0xff]  }
  0xa5   : > { %1077 = vmatprep.mubr.bf16.mxu0 %v2890_v1  ;;  %1293 = vmatprep.mubr.bf16.mxu1 %v2893_v2  ;;  %v2973_v1 = vld [vmem:[%s3044_s28 + $0x340] ss:$8 sps:$4 sm:$0xff]  }
  0xac   : > { %1078 = vmatmul.mubr.bf16.gmra.mxu0 %v2892_v3  ;;  %1294 = vmatmul.mubr.bf16.gmra.mxu1 %v2895_v4 }
  0xad   : > { %1085 = vmatprep.mubr.bf16.mxu0 %v2896_v5  ;;  %1301 = vmatprep.mubr.bf16.mxu1 %v2899_v6  ;;  %v2974_v5 = vld [vmem:[%s3044_s28 + $0x1a4] ss:$8 sps:$4 sm:$0xff]  }
  0xb4   : > { %1086 = vmatmul.mubr.bf16.gmra.mxu0 %v2898_v7  ;;  %1302 = vmatmul.mubr.bf16.gmra.mxu1 %v2901_v8 }
  0xb5   : > { %1093 = vmatprep.mubr.bf16.mxu0 %v2902_v9  ;;  %1309 = vmatprep.mubr.bf16.mxu1 %v2905_v10 }
  0xbc   : > { %1094 = vmatmul.mubr.bf16.gmra.mxu0 %v2904_v11  ;;  %1310 = vmatmul.mubr.bf16.gmra.mxu1 %v2907_v12 }
  0xbd   : > { %1101 = vmatprep.mubr.bf16.mxu0 %v2908_v13  ;;  %1317 = vmatprep.mubr.bf16.mxu1 %v2911_v14 }
  0xc4   : > { %1102 = vmatmul.mubr.bf16.gmra.mxu0 %v2910_v15  ;;  %1318 = vmatmul.mubr.bf16.gmra.mxu1 %v2913_v16 }
  0xc5   : > { %1109 = vmatprep.mubr.bf16.mxu0 %v2914_v17  ;;  %1325 = vmatprep.mubr.bf16.mxu1 %v2917_v18 }
  0xcc   : > { %1110 = vmatmul.mubr.bf16.gmra.mxu0 %v2916_v19  ;;  %1326 = vmatmul.mubr.bf16.gmra.mxu1 %v2919_v20 }
  0xcd   : > { %1117 = vmatprep.mubr.bf16.mxu0 %v2920_v21  ;;  %1333 = vmatprep.mubr.bf16.mxu1 %v2923_v22  ;;  %v2976_v21 = vld [vmem:[%s3044_s28 + $0x1a0] ss:$8 sps:$4 sm:$0xff]  }
  0xd4   : > { %1118 = vmatmul.mubr.bf16.gmra.mxu0 %v2922_v23  ;;  %1334 = vmatmul.mubr.bf16.gmra.mxu1 %v2925_v24 }
  0xd5   : > { %1125 = vmatprep.mubr.bf16.mxu0 %v2926_v25  ;;  %1341 = vmatprep.mubr.bf16.mxu1 %v2929_v26 }
  0xdc   : > { %1126 = vmatmul.mubr.bf16.gmra.mxu0 %v2928_v27  ;;  %1342 = vmatmul.mubr.bf16.gmra.mxu1 %v2931_v28 }
  0xdd   : > { %1133 = vmatprep.mubr.bf16.mxu0 %v2932_v29  ;;  %1349 = vmatprep.mubr.bf16.mxu1 %v2935_v30 }
  0xe4   : > { %1134 = vmatmul.mubr.bf16.gmra.mxu0 %v2934_v31  ;;  %1350 = vmatmul.mubr.bf16.gmra.mxu1 %v2937_v32 }
  0xe5   : > { %1141 = vmatprep.mubr.bf16.mxu0 %v2938_v33  ;;  %1357 = vmatprep.mubr.bf16.mxu1 %v2941_v34 }
  0xec   : > { %1142 = vmatmul.mubr.bf16.gmra.mxu0 %v2940_v35  ;;  %1358 = vmatmul.mubr.bf16.gmra.mxu1 %v2943_v36 }
  0xed   : > { %1149 = vmatprep.mubr.bf16.mxu0 %v2944_v37  ;;  %1365 = vmatprep.mubr.bf16.mxu1 %v2947_v38 }
  0xf4   : > { %1150 = vmatmul.mubr.bf16.gmra.mxu0 %v2946_v39  ;;  %1366 = vmatmul.mubr.bf16.gmra.mxu1 %v2949_v40 }
  0xf5   : > { %1157 = vmatprep.mubr.bf16.mxu0 %v2950_v41  ;;  %1373 = vmatprep.mubr.bf16.mxu1 %v2953_v42 }
  0xfc   : > { %1158 = vmatmul.mubr.bf16.gmra.mxu0 %v2952_v43  ;;  %1374 = vmatmul.mubr.bf16.gmra.mxu1 %v2955_v44 }
  0xfd   : > { %1165 = vmatprep.mubr.bf16.mxu0 %v2956_v45  ;;  %1381 = vmatprep.mubr.bf16.mxu1 %v2959_v46 }
 0x104   : > { %1166 = vmatmul.mubr.bf16.gmra.mxu0 %v2958_v47  ;;  %1382 = vmatmul.mubr.bf16.gmra.mxu1 %v2961_v48 }
 0x105   : > { %1173 = vmatprep.mubr.bf16.mxu0 %v2962_v49  ;;  %1389 = vmatprep.mubr.bf16.mxu1 %v2965_v50 }
 0x10c   : > { %v983_v56 = vpop.f32.mrf.mxu0  ;;  %1174 = vmatmul.mubr.bf16.gmra.mxu0 %v2964_v51  ;;  %v1199_v57 = vpop.f32.mrf.mxu1  ;;  %1390 = vmatmul.mubr.bf16.gmra.mxu1 %v2967_v52 }
 0x10d   : > { %v1200_v58 = vadd.f32 %v3208_v55, %v1199_v57  ;;  %1181 = vmatprep.mubr.bf16.mxu0 %v2968_v53  ;;  %1397 = vmatprep.mubr.bf16.mxu1 %v2971_v54  ;;  %v984_v61 = vadd.f32 %v3208_v55, %v983_v56 }
 0x10e   : > { %v985_v59 = vpop.f32.mrf.mxu0  ;;  %v1201_v60 = vpop.f32.mrf.mxu1 }
 0x10f   : > { %v1460_v2 = vmax.f32 %v1200_v58, 0.0  ;;  %v1406_v8 = vmax.f32 %v984_v61, 0.0 }
 0x110   : > { %v986_v62 = vpop.f32.mrf.mxu0  ;;  %v1202_v63 = vpop.f32.mrf.mxu1 }
 0x111   : > { %v987_v3 = vadd.f32 %v3208_v55, %v986_v62  ;;  %v1203_v4 = vadd.f32 %v3208_v55, %v1202_v63 }
 0x112   : > { %v988_v6 = vpop.f32.mrf.mxu0  ;;  %v1204_v7 = vpop.f32.mrf.mxu1 }
 0x113   : > { %v1407_v9 = vmax.f32 %v987_v3, 0.0  ;;  %v1461_v10 = vmax.f32 %v1203_v4, 0.0 }
 0x114   : > { %v991_v11 = vpop.f32.mrf.mxu0  ;;  %1182 = vmatmul.mubr.bf16.gmra.mxu0 %v2970_v0  ;;  %v1207_v12 = vpop.f32.mrf.mxu1  ;;  %1398 = vmatmul.mubr.bf16.gmra.mxu1 %v2973_v1 }
 0x115   : > { %v2447_v13 = vpack.c.bf16 %v1407_v9, %v1406_v8  ;;  %v2582_v14 = vpack.c.bf16 %v1461_v10, %v1460_v2  ;;  %v1208_v15 = vadd.f32 %v3208_v55, %v1207_v12  ;;  %1189 = vmatprep.mubr.bf16.mxu0 %v2974_v5  ;;  %v992_v18 = vadd.f32 %v3208_v55, %v991_v11 }
 0x116   : > { %v993_v16 = vpop.f32.mrf.mxu0  ;;  %v1209_v17 = vpop.f32.mrf.mxu1 }
 0x117   : > { %2448 = vst [vmem:[%s3221_s5] sm:$0xff] %v2447_v13   ;;  %2735 = vst [vmem:[%s3221_s5 + $0xd8] sm:$0xff] %v2582_v14   ;;  %v1462_v22 = vmax.f32 %v1208_v15, 0.0  ;;  %v1408_v27 = vmax.f32 %v992_v18, 0.0 }
 0x118   : > { %v994_v19 = vpop.f32.mrf.mxu0  ;;  %v1210_v20 = vpop.f32.mrf.mxu1 }
 0x119   : > { %v995_v23 = vadd.f32 %v3208_v55, %v994_v19  ;;  %v1211_v24 = vadd.f32 %v3208_v55, %v1210_v20 }
 0x11a   : > { %v996_v25 = vpop.f32.mrf.mxu0  ;;  %v1212_v26 = vpop.f32.mrf.mxu1 }
 0x11b   : > { %v1409_v28 = vmax.f32 %v995_v23, 0.0  ;;  %v1463_v29 = vmax.f32 %v1211_v24, 0.0 }
 0x11c   : > { %v999_v30 = vpop.f32.mrf.mxu0  ;;  %1190 = vmatmul.mubr.bf16.gmra.mxu0 %v2976_v21  ;;  %v1215_v31 = vpop.f32.mrf.mxu1 }
 0x11d   : > { %v2452_v32 = vpack.c.bf16 %v1409_v28, %v1408_v27  ;;  %v2587_v33 = vpack.c.bf16 %v1463_v29, %v1462_v22  ;;  %v1216_v34 = vadd.f32 %v3208_v55, %v1215_v31  ;;  %v1000_v37 = vadd.f32 %v3208_v55, %v999_v30 }
 0x11e   : > { %v1001_v35 = vpop.f32.mrf.mxu0  ;;  %v1217_v36 = vpop.f32.mrf.mxu1 }
 0x11f   : > { %2709 = vst [vmem:[%s3221_s5 + $0x8] sm:$0xff] %v2452_v32   ;;  %2736 = vst [vmem:[%s3221_s5 + $0xe0] sm:$0xff] %v2587_v33   ;;  %v1464_v40 = vmax.f32 %v1216_v34, 0.0  ;;  %v1410_v45 = vmax.f32 %v1000_v37, 0.0 }
 0x120   : > { %v1002_v38 = vpop.f32.mrf.mxu0  ;;  %v1218_v39 = vpop.f32.mrf.mxu1 }
 0x121   : > { %v1003_v41 = vadd.f32 %v3208_v55, %v1002_v38  ;;  %v1219_v42 = vadd.f32 %v3208_v55, %v1218_v39 }
 0x122   : > { %v1004_v43 = vpop.f32.mrf.mxu0  ;;  %v1220_v44 = vpop.f32.mrf.mxu1 }
 0x123   : > { %v1411_v46 = vmax.f32 %v1003_v41, 0.0  ;;  %v1465_v47 = vmax.f32 %v1219_v42, 0.0 }
 0x124   : > { %v1007_v48 = vpop.f32.mrf.mxu0  ;;  %v1223_v49 = vpop.f32.mrf.mxu1 }
 0x125   : > { %v2457_v50 = vpack.c.bf16 %v1411_v46, %v1410_v45  ;;  %v2592_v51 = vpack.c.bf16 %v1465_v47, %v1464_v40  ;;  %v1224_v52 = vadd.f32 %v3208_v55, %v1223_v49  ;;  %v1008_v56 = vadd.f32 %v3208_v55, %v1007_v48 }
 0x126   : > { %v1009_v53 = vpop.f32.mrf.mxu0  ;;  %v1225_v54 = vpop.f32.mrf.mxu1 }
 0x127   : > { %2710 = vst [vmem:[%s3221_s5 + $0x10] sm:$0xff] %v2457_v50   ;;  %2737 = vst [vmem:[%s3221_s5 + $0xe8] sm:$0xff] %v2592_v51   ;;  %v1466_v59 = vmax.f32 %v1224_v52, 0.0  ;;  %v1412_v0 = vmax.f32 %v1008_v56, 0.0 }
 0x128   : > { %v1010_v57 = vpop.f32.mrf.mxu0  ;;  %v1226_v58 = vpop.f32.mrf.mxu1 }
 0x129   : > { %v1011_v60 = vadd.f32 %v3208_v55, %v1010_v57  ;;  %v1227_v61 = vadd.f32 %v3208_v55, %v1226_v58 }
 0x12a   : > { %v1012_v62 = vpop.f32.mrf.mxu0  ;;  %v1228_v63 = vpop.f32.mrf.mxu1 }
 0x12b   : > { %v1413_v1 = vmax.f32 %v1011_v60, 0.0  ;;  %v1467_v2 = vmax.f32 %v1227_v61, 0.0 }
 0x12c   : > { %v1015_v3 = vpop.f32.mrf.mxu0  ;;  %v1231_v4 = vpop.f32.mrf.mxu1 }
 0x12d   : > { %v2462_v5 = vpack.c.bf16 %v1413_v1, %v1412_v0  ;;  %v2597_v6 = vpack.c.bf16 %v1467_v2, %v1466_v59  ;;  %v1232_v7 = vadd.f32 %v3208_v55, %v1231_v4  ;;  %v1016_v10 = vadd.f32 %v3208_v55, %v1015_v3 }
 0x12e   : > { %v1017_v8 = vpop.f32.mrf.mxu0  ;;  %v1233_v9 = vpop.f32.mrf.mxu1 }
 0x12f   : > { %2711 = vst [vmem:[%s3221_s5 + $0x18] sm:$0xff] %v2462_v5   ;;  %2738 = vst [vmem:[%s3221_s5 + $0xf0] sm:$0xff] %v2597_v6   ;;  %v1468_v13 = vmax.f32 %v1232_v7, 0.0  ;;  %v1414_v18 = vmax.f32 %v1016_v10, 0.0 }
 0x130   : > { %v1018_v11 = vpop.f32.mrf.mxu0  ;;  %v1234_v12 = vpop.f32.mrf.mxu1 }
 0x131   : > { %v1019_v14 = vadd.f32 %v3208_v55, %v1018_v11  ;;  %v1235_v15 = vadd.f32 %v3208_v55, %v1234_v12 }
 0x132   : > { %v1020_v16 = vpop.f32.mrf.mxu0  ;;  %v1236_v17 = vpop.f32.mrf.mxu1 }
 0x133   : > { %v1415_v19 = vmax.f32 %v1019_v14, 0.0  ;;  %v1469_v20 = vmax.f32 %v1235_v15, 0.0 }
 0x134   : > { %v1023_v21 = vpop.f32.mrf.mxu0  ;;  %v1239_v22 = vpop.f32.mrf.mxu1 }
 0x135   : > { %v2467_v23 = vpack.c.bf16 %v1415_v19, %v1414_v18  ;;  %v2602_v24 = vpack.c.bf16 %v1469_v20, %v1468_v13  ;;  %v1240_v25 = vadd.f32 %v3208_v55, %v1239_v22  ;;  %v1024_v28 = vadd.f32 %v3208_v55, %v1023_v21 }
 0x136   : > { %v1025_v26 = vpop.f32.mrf.mxu0  ;;  %v1241_v27 = vpop.f32.mrf.mxu1 }
 0x137   : > { %2712 = vst [vmem:[%s3221_s5 + $0x20] sm:$0xff] %v2467_v23   ;;  %2739 = vst [vmem:[%s3221_s5 + $0xf8] sm:$0xff] %v2602_v24   ;;  %v1470_v31 = vmax.f32 %v1240_v25, 0.0  ;;  %v1416_v36 = vmax.f32 %v1024_v28, 0.0 }
 0x138   : > { %v1026_v29 = vpop.f32.mrf.mxu0  ;;  %v1242_v30 = vpop.f32.mrf.mxu1 }
 0x139   : > { %v1027_v32 = vadd.f32 %v3208_v55, %v1026_v29  ;;  %v1243_v33 = vadd.f32 %v3208_v55, %v1242_v30 }
 0x13a   : > { %v1028_v34 = vpop.f32.mrf.mxu0  ;;  %v1244_v35 = vpop.f32.mrf.mxu1 }
 0x13b   : > { %v1417_v37 = vmax.f32 %v1027_v32, 0.0  ;;  %v1471_v38 = vmax.f32 %v1243_v33, 0.0 }
 0x13c   : > { %v1031_v39 = vpop.f32.mrf.mxu0  ;;  %v1247_v40 = vpop.f32.mrf.mxu1 }
 0x13d   : > { %v2472_v41 = vpack.c.bf16 %v1417_v37, %v1416_v36  ;;  %v2607_v42 = vpack.c.bf16 %v1471_v38, %v1470_v31  ;;  %v1248_v43 = vadd.f32 %v3208_v55, %v1247_v40  ;;  %v1032_v46 = vadd.f32 %v3208_v55, %v1031_v39 }
 0x13e   : > { %v1033_v44 = vpop.f32.mrf.mxu0  ;;  %v1249_v45 = vpop.f32.mrf.mxu1 }
 0x13f   : > { %2713 = vst [vmem:[%s3221_s5 + $0x28] sm:$0xff] %v2472_v41   ;;  %2740 = vst [vmem:[%s3221_s5 + $0x100] sm:$0xff] %v2607_v42   ;;  %v1472_v49 = vmax.f32 %v1248_v43, 0.0  ;;  %v1418_v54 = vmax.f32 %v1032_v46, 0.0 }
 0x140   : > { %v1034_v47 = vpop.f32.mrf.mxu0  ;;  %v1250_v48 = vpop.f32.mrf.mxu1 }
 0x141   : > { %v1035_v50 = vadd.f32 %v3208_v55, %v1034_v47  ;;  %v1251_v51 = vadd.f32 %v3208_v55, %v1250_v48 }
 0x142   : > { %v1036_v52 = vpop.f32.mrf.mxu0  ;;  %v1252_v53 = vpop.f32.mrf.mxu1 }
 0x143   : > { %v1419_v56 = vmax.f32 %v1035_v50, 0.0  ;;  %v1473_v57 = vmax.f32 %v1251_v51, 0.0 }
 0x144   : > { %v1039_v58 = vpop.f32.mrf.mxu0  ;;  %v1255_v59 = vpop.f32.mrf.mxu1 }
 0x145   : > { %v2477_v60 = vpack.c.bf16 %v1419_v56, %v1418_v54  ;;  %v2612_v61 = vpack.c.bf16 %v1473_v57, %v1472_v49  ;;  %v1256_v62 = vadd.f32 %v3208_v55, %v1255_v59  ;;  %v1040_v1 = vadd.f32 %v3208_v55, %v1039_v58 }
 0x146   : > { %v1041_v63 = vpop.f32.mrf.mxu0  ;;  %v1257_v0 = vpop.f32.mrf.mxu1 }
 0x147   : > { %2714 = vst [vmem:[%s3221_s5 + $0x30] sm:$0xff] %v2477_v60   ;;  %2741 = vst [vmem:[%s3221_s5 + $0x108] sm:$0xff] %v2612_v61   ;;  %v1474_v4 = vmax.f32 %v1256_v62, 0.0  ;;  %v1420_v9 = vmax.f32 %v1040_v1, 0.0 }
 0x148   : > { %v1042_v2 = vpop.f32.mrf.mxu0  ;;  %v1258_v3 = vpop.f32.mrf.mxu1 }
 0x149   : > { %v1043_v5 = vadd.f32 %v3208_v55, %v1042_v2  ;;  %v1259_v6 = vadd.f32 %v3208_v55, %v1258_v3 }
 0x14a   : > { %v1044_v7 = vpop.f32.mrf.mxu0  ;;  %v1260_v8 = vpop.f32.mrf.mxu1 }
 0x14b   : > { %v1421_v10 = vmax.f32 %v1043_v5, 0.0  ;;  %v1475_v11 = vmax.f32 %v1259_v6, 0.0 }
 0x14c   : > { %v1047_v12 = vpop.f32.mrf.mxu0  ;;  %v1263_v13 = vpop.f32.mrf.mxu1 }
 0x14d   : > { %v2482_v14 = vpack.c.bf16 %v1421_v10, %v1420_v9  ;;  %v2617_v15 = vpack.c.bf16 %v1475_v11, %v1474_v4  ;;  %v1264_v16 = vadd.f32 %v3208_v55, %v1263_v13  ;;  %v1048_v19 = vadd.f32 %v3208_v55, %v1047_v12 }
 0x14e   : > { %v1049_v17 = vpop.f32.mrf.mxu0  ;;  %v1265_v18 = vpop.f32.mrf.mxu1 }
 0x14f   : > { %2715 = vst [vmem:[%s3221_s5 + $0x38] sm:$0xff] %v2482_v14   ;;  %2742 = vst [vmem:[%s3221_s5 + $0x110] sm:$0xff] %v2617_v15   ;;  %v1476_v22 = vmax.f32 %v1264_v16, 0.0  ;;  %v1422_v27 = vmax.f32 %v1048_v19, 0.0 }
 0x150   : > { %v1050_v20 = vpop.f32.mrf.mxu0  ;;  %v1266_v21 = vpop.f32.mrf.mxu1 }
 0x151   : > { %v1051_v23 = vadd.f32 %v3208_v55, %v1050_v20  ;;  %v1267_v24 = vadd.f32 %v3208_v55, %v1266_v21 }
 0x152   : > { %v1052_v25 = vpop.f32.mrf.mxu0  ;;  %v1268_v26 = vpop.f32.mrf.mxu1 }
 0x153   : > { %v1423_v28 = vmax.f32 %v1051_v23, 0.0  ;;  %v1477_v29 = vmax.f32 %v1267_v24, 0.0 }
 0x154   : > { %v1055_v30 = vpop.f32.mrf.mxu0  ;;  %v1271_v31 = vpop.f32.mrf.mxu1 }
 0x155   : > { %v2487_v32 = vpack.c.bf16 %v1423_v28, %v1422_v27  ;;  %v2622_v33 = vpack.c.bf16 %v1477_v29, %v1476_v22  ;;  %v1272_v34 = vadd.f32 %v3208_v55, %v1271_v31  ;;  %v1056_v37 = vadd.f32 %v3208_v55, %v1055_v30 }
 0x156   : > { %v1057_v35 = vpop.f32.mrf.mxu0  ;;  %v1273_v36 = vpop.f32.mrf.mxu1 }
 0x157   : > { %2716 = vst [vmem:[%s3221_s5 + $0x40] sm:$0xff] %v2487_v32   ;;  %2743 = vst [vmem:[%s3221_s5 + $0x118] sm:$0xff] %v2622_v33   ;;  %v1478_v40 = vmax.f32 %v1272_v34, 0.0  ;;  %v1424_v45 = vmax.f32 %v1056_v37, 0.0 }
 0x158   : > { %v1058_v38 = vpop.f32.mrf.mxu0  ;;  %v1274_v39 = vpop.f32.mrf.mxu1 }
 0x159   : > { %v1059_v41 = vadd.f32 %v3208_v55, %v1058_v38  ;;  %v1275_v42 = vadd.f32 %v3208_v55, %v1274_v39 }
 0x15a   : > { %v1060_v43 = vpop.f32.mrf.mxu0  ;;  %v1276_v44 = vpop.f32.mrf.mxu1 }
 0x15b   : > { %v1425_v46 = vmax.f32 %v1059_v41, 0.0  ;;  %v1479_v47 = vmax.f32 %v1275_v42, 0.0 }
 0x15c   : > { %v1063_v48 = vpop.f32.mrf.mxu0  ;;  %v1279_v49 = vpop.f32.mrf.mxu1 }
 0x15d   : > { %v2492_v50 = vpack.c.bf16 %v1425_v46, %v1424_v45  ;;  %v2627_v51 = vpack.c.bf16 %v1479_v47, %v1478_v40  ;;  %v1280_v52 = vadd.f32 %v3208_v55, %v1279_v49  ;;  %v1064_v56 = vadd.f32 %v3208_v55, %v1063_v48 }
 0x15e   : > { %v1065_v53 = vpop.f32.mrf.mxu0  ;;  %v1281_v54 = vpop.f32.mrf.mxu1 }
 0x15f   : > { %2717 = vst [vmem:[%s3221_s5 + $0x48] sm:$0xff] %v2492_v50   ;;  %2744 = vst [vmem:[%s3221_s5 + $0x120] sm:$0xff] %v2627_v51   ;;  %v1480_v59 = vmax.f32 %v1280_v52, 0.0  ;;  %v1426_v0 = vmax.f32 %v1064_v56, 0.0 }
 0x160   : > { %v1066_v57 = vpop.f32.mrf.mxu0  ;;  %v1282_v58 = vpop.f32.mrf.mxu1 }
 0x161   : > { %v1067_v60 = vadd.f32 %v3208_v55, %v1066_v57  ;;  %v1283_v61 = vadd.f32 %v3208_v55, %v1282_v58 }
 0x162   : > { %v1068_v62 = vpop.f32.mrf.mxu0  ;;  %v1284_v63 = vpop.f32.mrf.mxu1 }
 0x163   : > { %v1427_v1 = vmax.f32 %v1067_v60, 0.0  ;;  %v1481_v2 = vmax.f32 %v1283_v61, 0.0 }
 0x164   : > { %v1071_v3 = vpop.f32.mrf.mxu0  ;;  %v1287_v4 = vpop.f32.mrf.mxu1 }
 0x165   : > { %v2497_v5 = vpack.c.bf16 %v1427_v1, %v1426_v0  ;;  %v2632_v6 = vpack.c.bf16 %v1481_v2, %v1480_v59  ;;  %v1288_v7 = vadd.f32 %v3208_v55, %v1287_v4  ;;  %v1072_v10 = vadd.f32 %v3208_v55, %v1071_v3 }
 0x166   : > { %v1073_v8 = vpop.f32.mrf.mxu0  ;;  %v1289_v9 = vpop.f32.mrf.mxu1 }
 0x167   : > { %2718 = vst [vmem:[%s3221_s5 + $0x50] sm:$0xff] %v2497_v5   ;;  %2745 = vst [vmem:[%s3221_s5 + $0x128] sm:$0xff] %v2632_v6   ;;  %v1482_v13 = vmax.f32 %v1288_v7, 0.0  ;;  %v1428_v18 = vmax.f32 %v1072_v10, 0.0 }
 0x168   : > { %v1074_v11 = vpop.f32.mrf.mxu0  ;;  %v1290_v12 = vpop.f32.mrf.mxu1 }
 0x169   : > { %v1075_v14 = vadd.f32 %v3208_v55, %v1074_v11  ;;  %v1291_v15 = vadd.f32 %v3208_v55, %v1290_v12 }
 0x16a   : > { %v1076_v16 = vpop.f32.mrf.mxu0  ;;  %v1292_v17 = vpop.f32.mrf.mxu1 }
 0x16b   : > { %v1429_v19 = vmax.f32 %v1075_v14, 0.0  ;;  %v1483_v20 = vmax.f32 %v1291_v15, 0.0 }
 0x16c   : > { %v1079_v21 = vpop.f32.mrf.mxu0  ;;  %v1295_v22 = vpop.f32.mrf.mxu1 }
 0x16d   : > { %v2502_v23 = vpack.c.bf16 %v1429_v19, %v1428_v18  ;;  %v2637_v24 = vpack.c.bf16 %v1483_v20, %v1482_v13  ;;  %v1296_v25 = vadd.f32 %v3208_v55, %v1295_v22  ;;  %v1080_v28 = vadd.f32 %v3208_v55, %v1079_v21 }
 0x16e   : > { %v1081_v26 = vpop.f32.mrf.mxu0  ;;  %v1297_v27 = vpop.f32.mrf.mxu1 }
 0x16f   : > { %2719 = vst [vmem:[%s3221_s5 + $0x58] sm:$0xff] %v2502_v23   ;;  %2746 = vst [vmem:[%s3221_s5 + $0x130] sm:$0xff] %v2637_v24   ;;  %v1484_v31 = vmax.f32 %v1296_v25, 0.0  ;;  %v1430_v36 = vmax.f32 %v1080_v28, 0.0 }
 0x170   : > { %v1082_v29 = vpop.f32.mrf.mxu0  ;;  %v1298_v30 = vpop.f32.mrf.mxu1 }
 0x171   : > { %v1083_v32 = vadd.f32 %v3208_v55, %v1082_v29  ;;  %v1299_v33 = vadd.f32 %v3208_v55, %v1298_v30 }
 0x172   : > { %v1084_v34 = vpop.f32.mrf.mxu0  ;;  %v1300_v35 = vpop.f32.mrf.mxu1 }
 0x173   : > { %v1431_v37 = vmax.f32 %v1083_v32, 0.0  ;;  %v1485_v38 = vmax.f32 %v1299_v33, 0.0 }
 0x174   : > { %v1087_v39 = vpop.f32.mrf.mxu0  ;;  %v1303_v40 = vpop.f32.mrf.mxu1 }
 0x175   : > { %v2507_v41 = vpack.c.bf16 %v1431_v37, %v1430_v36  ;;  %v2642_v42 = vpack.c.bf16 %v1485_v38, %v1484_v31  ;;  %v1304_v43 = vadd.f32 %v3208_v55, %v1303_v40  ;;  %v1088_v46 = vadd.f32 %v3208_v55, %v1087_v39 }
 0x176   : > { %v1089_v44 = vpop.f32.mrf.mxu0  ;;  %v1305_v45 = vpop.f32.mrf.mxu1 }
 0x177   : > { %2720 = vst [vmem:[%s3221_s5 + $0x60] sm:$0xff] %v2507_v41   ;;  %2747 = vst [vmem:[%s3221_s5 + $0x138] sm:$0xff] %v2642_v42   ;;  %v1486_v49 = vmax.f32 %v1304_v43, 0.0  ;;  %v1432_v54 = vmax.f32 %v1088_v46, 0.0 }
 0x178   : > { %v1090_v47 = vpop.f32.mrf.mxu0  ;;  %v1306_v48 = vpop.f32.mrf.mxu1 }
 0x179   : > { %v1091_v50 = vadd.f32 %v3208_v55, %v1090_v47  ;;  %v1307_v51 = vadd.f32 %v3208_v55, %v1306_v48 }
 0x17a   : > { %v1092_v52 = vpop.f32.mrf.mxu0  ;;  %v1308_v53 = vpop.f32.mrf.mxu1 }
 0x17b   : > { %v1433_v56 = vmax.f32 %v1091_v50, 0.0  ;;  %v1487_v57 = vmax.f32 %v1307_v51, 0.0 }
 0x17c   : > { %v1095_v58 = vpop.f32.mrf.mxu0  ;;  %v1311_v59 = vpop.f32.mrf.mxu1 }
 0x17d   : > { %v2512_v60 = vpack.c.bf16 %v1433_v56, %v1432_v54  ;;  %v2647_v61 = vpack.c.bf16 %v1487_v57, %v1486_v49  ;;  %v1312_v62 = vadd.f32 %v3208_v55, %v1311_v59  ;;  %v1096_v1 = vadd.f32 %v3208_v55, %v1095_v58 }
 0x17e   : > { %v1097_v63 = vpop.f32.mrf.mxu0  ;;  %v1313_v0 = vpop.f32.mrf.mxu1 }
 0x17f   : > { %2721 = vst [vmem:[%s3221_s5 + $0x68] sm:$0xff] %v2512_v60   ;;  %2748 = vst [vmem:[%s3221_s5 + $0x140] sm:$0xff] %v2647_v61   ;;  %v1488_v4 = vmax.f32 %v1312_v62, 0.0  ;;  %v1434_v9 = vmax.f32 %v1096_v1, 0.0 }
 0x180   : > { %v1098_v2 = vpop.f32.mrf.mxu0  ;;  %v1314_v3 = vpop.f32.mrf.mxu1 }
 0x181   : > { %v1099_v5 = vadd.f32 %v3208_v55, %v1098_v2  ;;  %v1315_v6 = vadd.f32 %v3208_v55, %v1314_v3 }
 0x182   : > { %v1100_v7 = vpop.f32.mrf.mxu0  ;;  %v1316_v8 = vpop.f32.mrf.mxu1 }
 0x183   : > { %v1435_v10 = vmax.f32 %v1099_v5, 0.0  ;;  %v1489_v11 = vmax.f32 %v1315_v6, 0.0 }
 0x184   : > { %v1103_v12 = vpop.f32.mrf.mxu0  ;;  %v1319_v13 = vpop.f32.mrf.mxu1 }
 0x185   : > { %v2517_v14 = vpack.c.bf16 %v1435_v10, %v1434_v9  ;;  %v2652_v15 = vpack.c.bf16 %v1489_v11, %v1488_v4  ;;  %v1320_v16 = vadd.f32 %v3208_v55, %v1319_v13  ;;  %v1104_v19 = vadd.f32 %v3208_v55, %v1103_v12 }
 0x186   : > { %v1105_v17 = vpop.f32.mrf.mxu0  ;;  %v1321_v18 = vpop.f32.mrf.mxu1 }
 0x187   : > { %2722 = vst [vmem:[%s3221_s5 + $0x70] sm:$0xff] %v2517_v14   ;;  %2749 = vst [vmem:[%s3221_s5 + $0x148] sm:$0xff] %v2652_v15   ;;  %v1490_v22 = vmax.f32 %v1320_v16, 0.0  ;;  %v1436_v27 = vmax.f32 %v1104_v19, 0.0 }
 0x188   : > { %v1106_v20 = vpop.f32.mrf.mxu0  ;;  %v1322_v21 = vpop.f32.mrf.mxu1 }
 0x189   : > { %v1107_v23 = vadd.f32 %v3208_v55, %v1106_v20  ;;  %v1323_v24 = vadd.f32 %v3208_v55, %v1322_v21 }
 0x18a   : > { %v1108_v25 = vpop.f32.mrf.mxu0  ;;  %v1324_v26 = vpop.f32.mrf.mxu1 }
 0x18b   : > { %v1437_v28 = vmax.f32 %v1107_v23, 0.0  ;;  %v1491_v29 = vmax.f32 %v1323_v24, 0.0 }
 0x18c   : > { %v1111_v30 = vpop.f32.mrf.mxu0  ;;  %v1327_v31 = vpop.f32.mrf.mxu1 }
 0x18d   : > { %v2522_v32 = vpack.c.bf16 %v1437_v28, %v1436_v27  ;;  %v2657_v33 = vpack.c.bf16 %v1491_v29, %v1490_v22  ;;  %v1328_v34 = vadd.f32 %v3208_v55, %v1327_v31  ;;  %v1112_v37 = vadd.f32 %v3208_v55, %v1111_v30 }
 0x18e   : > { %v1113_v35 = vpop.f32.mrf.mxu0  ;;  %v1329_v36 = vpop.f32.mrf.mxu1 }
 0x18f   : > { %2723 = vst [vmem:[%s3221_s5 + $0x78] sm:$0xff] %v2522_v32   ;;  %2750 = vst [vmem:[%s3221_s5 + $0x150] sm:$0xff] %v2657_v33   ;;  %v1492_v40 = vmax.f32 %v1328_v34, 0.0  ;;  %v1438_v45 = vmax.f32 %v1112_v37, 0.0 }
 0x190   : > { %v1114_v38 = vpop.f32.mrf.mxu0  ;;  %v1330_v39 = vpop.f32.mrf.mxu1 }
 0x191   : > { %v1115_v41 = vadd.f32 %v3208_v55, %v1114_v38  ;;  %v1331_v42 = vadd.f32 %v3208_v55, %v1330_v39 }
 0x192   : > { %v1116_v43 = vpop.f32.mrf.mxu0  ;;  %v1332_v44 = vpop.f32.mrf.mxu1 }
 0x193   : > { %v1439_v46 = vmax.f32 %v1115_v41, 0.0  ;;  %v1493_v47 = vmax.f32 %v1331_v42, 0.0 }
 0x194   : > { %v1119_v48 = vpop.f32.mrf.mxu0  ;;  %v1335_v49 = vpop.f32.mrf.mxu1 }
 0x195   : > { %v2527_v50 = vpack.c.bf16 %v1439_v46, %v1438_v45  ;;  %v2662_v51 = vpack.c.bf16 %v1493_v47, %v1492_v40  ;;  %v1336_v52 = vadd.f32 %v3208_v55, %v1335_v49  ;;  %v1120_v56 = vadd.f32 %v3208_v55, %v1119_v48 }
 0x196   : > { %v1121_v53 = vpop.f32.mrf.mxu0  ;;  %v1337_v54 = vpop.f32.mrf.mxu1 }
 0x197   : > { %2724 = vst [vmem:[%s3221_s5 + $0x80] sm:$0xff] %v2527_v50   ;;  %2751 = vst [vmem:[%s3221_s5 + $0x158] sm:$0xff] %v2662_v51   ;;  %v1494_v59 = vmax.f32 %v1336_v52, 0.0  ;;  %v1440_v0 = vmax.f32 %v1120_v56, 0.0 }
 0x198   : > { %v1122_v57 = vpop.f32.mrf.mxu0  ;;  %v1338_v58 = vpop.f32.mrf.mxu1 }
 0x199   : > { %v1123_v60 = vadd.f32 %v3208_v55, %v1122_v57  ;;  %v1339_v61 = vadd.f32 %v3208_v55, %v1338_v58 }
 0x19a   : > { %v1124_v62 = vpop.f32.mrf.mxu0  ;;  %v1340_v63 = vpop.f32.mrf.mxu1 }
 0x19b   : > { %v1441_v1 = vmax.f32 %v1123_v60, 0.0  ;;  %v1495_v2 = vmax.f32 %v1339_v61, 0.0 }
 0x19c   : > { %v1127_v3 = vpop.f32.mrf.mxu0  ;;  %v1343_v4 = vpop.f32.mrf.mxu1 }
 0x19d   : > { %v2532_v5 = vpack.c.bf16 %v1441_v1, %v1440_v0  ;;  %v2667_v6 = vpack.c.bf16 %v1495_v2, %v1494_v59  ;;  %v1344_v7 = vadd.f32 %v3208_v55, %v1343_v4  ;;  %v1128_v10 = vadd.f32 %v3208_v55, %v1127_v3 }
 0x19e   : > { %v1129_v8 = vpop.f32.mrf.mxu0  ;;  %v1345_v9 = vpop.f32.mrf.mxu1 }
 0x19f   : > { %2725 = vst [vmem:[%s3221_s5 + $0x88] sm:$0xff] %v2532_v5   ;;  %2752 = vst [vmem:[%s3221_s5 + $0x160] sm:$0xff] %v2667_v6   ;;  %v1496_v13 = vmax.f32 %v1344_v7, 0.0  ;;  %v1442_v18 = vmax.f32 %v1128_v10, 0.0 }
 0x1a0   : > { %v1130_v11 = vpop.f32.mrf.mxu0  ;;  %v1346_v12 = vpop.f32.mrf.mxu1 }
 0x1a1   : > { %v1131_v14 = vadd.f32 %v3208_v55, %v1130_v11  ;;  %v1347_v15 = vadd.f32 %v3208_v55, %v1346_v12 }
 0x1a2   : > { %v1132_v16 = vpop.f32.mrf.mxu0  ;;  %v1348_v17 = vpop.f32.mrf.mxu1 }
 0x1a3   : > { %v1443_v19 = vmax.f32 %v1131_v14, 0.0  ;;  %v1497_v20 = vmax.f32 %v1347_v15, 0.0 }
 0x1a4   : > { %v1135_v21 = vpop.f32.mrf.mxu0  ;;  %v1351_v22 = vpop.f32.mrf.mxu1 }
 0x1a5   : > { %v2537_v23 = vpack.c.bf16 %v1443_v19, %v1442_v18  ;;  %v2672_v24 = vpack.c.bf16 %v1497_v20, %v1496_v13  ;;  %v1352_v25 = vadd.f32 %v3208_v55, %v1351_v22  ;;  %v1136_v28 = vadd.f32 %v3208_v55, %v1135_v21 }
 0x1a6   : > { %v1137_v26 = vpop.f32.mrf.mxu0  ;;  %v1353_v27 = vpop.f32.mrf.mxu1 }
 0x1a7   : > { %2726 = vst [vmem:[%s3221_s5 + $0x90] sm:$0xff] %v2537_v23   ;;  %2753 = vst [vmem:[%s3221_s5 + $0x168] sm:$0xff] %v2672_v24   ;;  %v1498_v31 = vmax.f32 %v1352_v25, 0.0  ;;  %v1444_v36 = vmax.f32 %v1136_v28, 0.0 }
 0x1a8   : > { %v1138_v29 = vpop.f32.mrf.mxu0  ;;  %v1354_v30 = vpop.f32.mrf.mxu1 }
 0x1a9   : > { %v1139_v32 = vadd.f32 %v3208_v55, %v1138_v29  ;;  %v1355_v33 = vadd.f32 %v3208_v55, %v1354_v30 }
 0x1aa   : > { %v1140_v34 = vpop.f32.mrf.mxu0  ;;  %v1356_v35 = vpop.f32.mrf.mxu1 }
 0x1ab   : > { %v1445_v37 = vmax.f32 %v1139_v32, 0.0  ;;  %v1499_v38 = vmax.f32 %v1355_v33, 0.0 }
 0x1ac   : > { %v1143_v39 = vpop.f32.mrf.mxu0  ;;  %v1359_v40 = vpop.f32.mrf.mxu1 }
 0x1ad   : > { %v2542_v41 = vpack.c.bf16 %v1445_v37, %v1444_v36  ;;  %v2677_v42 = vpack.c.bf16 %v1499_v38, %v1498_v31  ;;  %v1360_v43 = vadd.f32 %v3208_v55, %v1359_v40  ;;  %v1144_v46 = vadd.f32 %v3208_v55, %v1143_v39 }
 0x1ae   : > { %v1145_v44 = vpop.f32.mrf.mxu0  ;;  %v1361_v45 = vpop.f32.mrf.mxu1 }
 0x1af   : > { %2727 = vst [vmem:[%s3221_s5 + $0x98] sm:$0xff] %v2542_v41   ;;  %2754 = vst [vmem:[%s3221_s5 + $0x170] sm:$0xff] %v2677_v42   ;;  %v1500_v49 = vmax.f32 %v1360_v43, 0.0  ;;  %v1446_v54 = vmax.f32 %v1144_v46, 0.0 }
 0x1b0   : > { %v1146_v47 = vpop.f32.mrf.mxu0  ;;  %v1362_v48 = vpop.f32.mrf.mxu1 }
 0x1b1   : > { %v1147_v50 = vadd.f32 %v3208_v55, %v1146_v47  ;;  %v1363_v51 = vadd.f32 %v3208_v55, %v1362_v48 }
 0x1b2   : > { %v1148_v52 = vpop.f32.mrf.mxu0  ;;  %v1364_v53 = vpop.f32.mrf.mxu1 }
 0x1b3   : > { %v1447_v56 = vmax.f32 %v1147_v50, 0.0  ;;  %v1501_v57 = vmax.f32 %v1363_v51, 0.0 }
 0x1b4   : > { %v1151_v58 = vpop.f32.mrf.mxu0  ;;  %v1367_v59 = vpop.f32.mrf.mxu1 }
 0x1b5   : > { %v2547_v60 = vpack.c.bf16 %v1447_v56, %v1446_v54  ;;  %v2682_v61 = vpack.c.bf16 %v1501_v57, %v1500_v49  ;;  %v1368_v62 = vadd.f32 %v3208_v55, %v1367_v59  ;;  %v1152_v1 = vadd.f32 %v3208_v55, %v1151_v58 }
 0x1b6   : > { %v1153_v63 = vpop.f32.mrf.mxu0  ;;  %v1369_v0 = vpop.f32.mrf.mxu1 }
 0x1b7   : > { %2728 = vst [vmem:[%s3221_s5 + $0xa0] sm:$0xff] %v2547_v60   ;;  %2755 = vst [vmem:[%s3221_s5 + $0x178] sm:$0xff] %v2682_v61   ;;  %v1502_v4 = vmax.f32 %v1368_v62, 0.0  ;;  %v1448_v9 = vmax.f32 %v1152_v1, 0.0 }
 0x1b8   : > { %v1154_v2 = vpop.f32.mrf.mxu0  ;;  %v1370_v3 = vpop.f32.mrf.mxu1 }
 0x1b9   : > { %v1155_v5 = vadd.f32 %v3208_v55, %v1154_v2  ;;  %v1371_v6 = vadd.f32 %v3208_v55, %v1370_v3 }
 0x1ba   : > { %v1156_v7 = vpop.f32.mrf.mxu0  ;;  %v1372_v8 = vpop.f32.mrf.mxu1 }
 0x1bb   : > { %v1449_v10 = vmax.f32 %v1155_v5, 0.0  ;;  %v1503_v11 = vmax.f32 %v1371_v6, 0.0  ;;  %v2977_v7 = vld [vmem:[%s3381_s2] ss:$0 sm:$0xff] }
 0x1bc   : > { %v1159_v12 = vpop.f32.mrf.mxu0  ;;  %v1375_v13 = vpop.f32.mrf.mxu1 }
 0x1bd   : > { %v2552_v14 = vpack.c.bf16 %v1449_v10, %v1448_v9  ;;  %v2687_v15 = vpack.c.bf16 %v1503_v11, %v1502_v4  ;;  %v1376_v16 = vadd.f32 %v3208_v55, %v1375_v13  ;;  %v1160_v19 = vadd.f32 %v3208_v55, %v1159_v12 }
 0x1be   : > { %v1161_v17 = vpop.f32.mrf.mxu0  ;;  %v1377_v18 = vpop.f32.mrf.mxu1 }
 0x1bf   : > { %2729 = vst [vmem:[%s3221_s5 + $0xa8] sm:$0xff] %v2552_v14   ;;  %2756 = vst [vmem:[%s3221_s5 + $0x180] sm:$0xff] %v2687_v15   ;;  %v1504_v22 = vmax.f32 %v1376_v16, 0.0  ;;  %v1450_v27 = vmax.f32 %v1160_v19, 0.0 }
 0x1c0   : > { %v1162_v20 = vpop.f32.mrf.mxu0  ;;  %v1378_v21 = vpop.f32.mrf.mxu1 }
 0x1c1   : > { %v1163_v23 = vadd.f32 %v3208_v55, %v1162_v20  ;;  %v1379_v24 = vadd.f32 %v3208_v55, %v1378_v21 }
 0x1c2   : > { %v1164_v25 = vpop.f32.mrf.mxu0  ;;  %v1380_v26 = vpop.f32.mrf.mxu1 }
 0x1c3   : > { %v1451_v28 = vmax.f32 %v1163_v23, 0.0  ;;  %v1505_v29 = vmax.f32 %v1379_v24, 0.0 }
 0x1c4   : > { %v1167_v30 = vpop.f32.mrf.mxu0  ;;  %v1383_v31 = vpop.f32.mrf.mxu1 }
 0x1c5   : > { %v2557_v32 = vpack.c.bf16 %v1451_v28, %v1450_v27  ;;  %v2692_v33 = vpack.c.bf16 %v1505_v29, %v1504_v22  ;;  %v1384_v34 = vadd.f32 %v3208_v55, %v1383_v31  ;;  %v1168_v37 = vadd.f32 %v3208_v55, %v1167_v30 }
 0x1c6   : > { %v1169_v35 = vpop.f32.mrf.mxu0  ;;  %v1385_v36 = vpop.f32.mrf.mxu1 }
 0x1c7   : > { %2730 = vst [vmem:[%s3221_s5 + $0xb0] sm:$0xff] %v2557_v32   ;;  %2757 = vst [vmem:[%s3221_s5 + $0x188] sm:$0xff] %v2692_v33   ;;  %v1506_v40 = vmax.f32 %v1384_v34, 0.0  ;;  %v1452_v45 = vmax.f32 %v1168_v37, 0.0 }
 0x1c8   : > { %v1170_v38 = vpop.f32.mrf.mxu0  ;;  %v1386_v39 = vpop.f32.mrf.mxu1 }
 0x1c9   : > { %v1171_v41 = vadd.f32 %v3208_v55, %v1170_v38  ;;  %v1387_v42 = vadd.f32 %v3208_v55, %v1386_v39 }
 0x1ca   : > { %v1172_v43 = vpop.f32.mrf.mxu0  ;;  %v1388_v44 = vpop.f32.mrf.mxu1 }
 0x1cb   : > { %v1453_v46 = vmax.f32 %v1171_v41, 0.0  ;;  %v1507_v47 = vmax.f32 %v1387_v42, 0.0 }
 0x1cc   : > { %v1175_v48 = vpop.f32.mrf.mxu0  ;;  %v1391_v49 = vpop.f32.mrf.mxu1 }
 0x1cd   : > { %v2562_v50 = vpack.c.bf16 %v1453_v46, %v1452_v45  ;;  %v2697_v51 = vpack.c.bf16 %v1507_v47, %v1506_v40  ;;  %v1392_v52 = vadd.f32 %v3208_v55, %v1391_v49  ;;  %v1176_v56 = vadd.f32 %v3208_v55, %v1175_v48 }
 0x1ce   : > { %v1177_v53 = vpop.f32.mrf.mxu0  ;;  %v1393_v54 = vpop.f32.mrf.mxu1 }
 0x1cf   : > { %2731 = vst [vmem:[%s3221_s5 + $0xb8] sm:$0xff] %v2562_v50   ;;  %2758 = vst [vmem:[%s3221_s5 + $0x190] sm:$0xff] %v2697_v51   ;;  %v1508_v59 = vmax.f32 %v1392_v52, 0.0  ;;  %v1454_v0 = vmax.f32 %v1176_v56, 0.0 }
 0x1d0   : > { %v1178_v57 = vpop.f32.mrf.mxu0  ;;  %v1394_v58 = vpop.f32.mrf.mxu1 }
 0x1d1   : > { %v1179_v60 = vadd.f32 %v3208_v55, %v1178_v57  ;;  %v1395_v61 = vadd.f32 %v3208_v55, %v1394_v58 }
 0x1d2   : > { %v1180_v62 = vpop.f32.mrf.mxu0  ;;  %v1396_v63 = vpop.f32.mrf.mxu1 }
 0x1d3   : > { %v1455_v1 = vmax.f32 %v1179_v60, 0.0  ;;  %v1509_v2 = vmax.f32 %v1395_v61, 0.0 }
 0x1d4   : > { %v1183_v3 = vpop.f32.mrf.mxu0  ;;  %v1399_v4 = vpop.f32.mrf.mxu1 }
 0x1d5   : > { %v2567_v5 = vpack.c.bf16 %v1455_v1, %v1454_v0  ;;  %v2702_v6 = vpack.c.bf16 %v1509_v2, %v1508_v59  ;;  %v1400_v8 = vadd.f32 %v2977_v7, %v1399_v4  ;;  %v1184_v55 = vadd.f32 %v2977_v7, %v1183_v3 }
 0x1d6   : > { %v1185_v9 = vpop.f32.mrf.mxu0  ;;  %v1401_v10 = vpop.f32.mrf.mxu1 }
 0x1d7   : > { %2732 = vst [vmem:[%s3221_s5 + $0xc0] sm:$0xff] %v2567_v5   ;;  %2759 = vst [vmem:[%s3221_s5 + $0x198] sm:$0xff] %v2702_v6   ;;  %v1510_v13 = vmax.f32 %v1400_v8, 0.0  ;;  %v1456_v18 = vmax.f32 %v1184_v55, 0.0 }
 0x1d8   : > { %v1186_v11 = vpop.f32.mrf.mxu0  ;;  %v1402_v12 = vpop.f32.mrf.mxu1 }
 0x1d9   : > { %v1187_v14 = vadd.f32 %v2977_v7, %v1186_v11  ;;  %v1403_v15 = vadd.f32 %v2977_v7, %v1402_v12 }
 0x1da   : > { %v1188_v16 = vpop.f32.mrf.mxu0  ;;  %v1404_v17 = vpop.f32.mrf.mxu1 }
 0x1db   : > { %v1457_v19 = vmax.f32 %v1187_v14, 0.0  ;;  %v1511_v20 = vmax.f32 %v1403_v15, 0.0 }
 0x1dc   : > { %v1191_v21 = vpop.f32.mrf.mxu0 }
 0x1dd   : > { %v2572_v22 = vpack.c.bf16 %v1457_v19, %v1456_v18  ;;  %v2707_v23 = vpack.c.bf16 %v1511_v20, %v1510_v13  ;;  %v1192_v25 = vadd.f32 %v2977_v7, %v1191_v21 }
 0x1de   : > { %v1193_v24 = vpop.f32.mrf.mxu0 }
 0x1df   : > { %2733 = vst [vmem:[%s3221_s5 + $0xc8] sm:$0xff] %v2572_v22   ;;  %2760 = vst [vmem:[%s3221_s5 + $0x1a0] sm:$0xff] %v2707_v23   ;;  %v1458_v29 = vmax.f32 %v1192_v25, 0.0 }
 0x1e0   : > { %v1194_v26 = vpop.f32.mrf.mxu0 }
 0x1e1   : > { %v1195_v27 = vadd.f32 %v2977_v7, %v1194_v26 }
 0x1e2   : > { %v1196_v28 = vpop.f32.mrf.mxu0 }
 0x1e3   : > { %v1459_v30 = vmax.f32 %v1195_v27, 0.0 }
 0x1e5   : > { %v2577_v31 = vpack.c.bf16 %v1459_v30, %v1458_v29 }
 0x1e7   : > { %2734 = vst [vmem:[%s3221_s5 + $0xd0] sm:$0xff] %v2577_v31  }
 0x1e8 PF: > { %s13_s12 = sadd.s32 1, %s2984_s12  }
 0x1e9   : > { %p10_p4 = scmp.ge.s32.totalorder %s13_s12, 4  }
 0x1eb   :  { %12 = sbr.rel (!%p10_p4) target bundleno = 1 (0x1), region = 62 }

// kernel: convnet_forward.6
= control target key start
LH: loop header
LB: loop body
LE: loop exit
PB: predicated region body
PF: predicated region fallthrough
CT: control target
= control target key end

     0   :  { %v3336_v0 = vmov 0   ;;  %s4301_s1 = inlined_call_operand.vmem [shape: bf16[896,128], index: 1, kind: input, shape index: {}]   ;;  %s4302_s0 = inlined_call_operand.vmem [shape: bf16[344,896], index: 0, kind: input, shape index: {}]   ;;  %s4303_s2 = inlined_call_operand.vmem [shape: f32[1,128], index: 2, kind: input, shape index: {}]   ;;  %s4304_s3 = inlined_call_operand.vmem [shape: bf16[344,128], index: 3, kind: output, shape index: {}]  }
   0x1   :  { %1423 = vmatprep.subr.bf16.mxu0 %v3336_v0  ;;  %1631 = vmatprep.subr.bf16.mxu1 %v3336_v0  ;;  %v3063_v1 = vld [vmem:[%s4301_s1 + $0x38] sm:$0xff]   ;;  %v3065_v3 = vld [vmem:[%s4301_s1 + $0x30] sm:$0xff]   ;;  %v3067_v5 = vld [vmem:[%s4301_s1 + $0x28] sm:$0xff]  }
   0x2   :  { %v3064_v2 = vld [vmem:[%s4301_s1 + $0xb8] sm:$0xff]   ;;  %1424 = vmatpush1.bf16.msra.mxu0 %v3063_v1  ;;  %v3066_v4 = vld [vmem:[%s4301_s1 + $0xb0] sm:$0xff]   ;;  %v3068_v6 = vld [vmem:[%s4301_s1 + $0xa8] sm:$0xff]  }
   0x3   :  { %1632 = vmatpush1.bf16.msra.mxu1 %v3064_v2  ;;  %1425 = vmatprep.subr.bf16.mxu0 %v3336_v0  ;;  %v3069_v7 = vld [vmem:[%s4301_s1 + $0x20] sm:$0xff]   ;;  %v3071_v9 = vld [vmem:[%s4301_s1 + $0x18] sm:$0xff]   ;;  %v3073_v11 = vld [vmem:[%s4301_s1 + $0x10] sm:$0xff]  }
   0x4   :  { %1633 = vmatprep.subr.bf16.mxu1 %v3336_v0  ;;  %v3070_v8 = vld [vmem:[%s4301_s1 + $0xa0] sm:$0xff]   ;;  %v3072_v10 = vld [vmem:[%s4301_s1 + $0x98] sm:$0xff]   ;;  %v3074_v12 = vld [vmem:[%s4301_s1 + $0x90] sm:$0xff]  }
   0x5   :  { %v3075_v13 = vld [vmem:[%s4301_s1 + $0x8] sm:$0xff]   ;;  %v3077_v15 = vld [vmem:[%s4301_s1] sm:$0xff]   ;;  %v3079_v17 = vld [vmem:[%s4301_s1 + $0x78] sm:$0xff]  }
   0x6   :  { %1426 = vmatpush1.bf16.msra.mxu0 %v3065_v3  ;;  %v3076_v14 = vld [vmem:[%s4301_s1 + $0x88] sm:$0xff]   ;;  %v3078_v16 = vld [vmem:[%s4301_s1 + $0x80] sm:$0xff]   ;;  %v3080_v18 = vld [vmem:[%s4301_s1 + $0xf8] sm:$0xff]  }
   0x7   :  { %1634 = vmatpush1.bf16.msra.mxu1 %v3066_v4  ;;  %1427 = vmatprep.subr.bf16.mxu0 %v3336_v0  ;;  %v3097_v19 = vld [vmem:[%s4302_s0 + $0x4] ss:$28 sps:$4 sm:$0xff]   ;;  %v3081_v20 = vld [vmem:[%s4301_s1 + $0x70] sm:$0xff]   ;;  %v3100_v21 = vld [vmem:[%s4302_s0 + $0xc] ss:$28 sps:$4 sm:$0xff]  }
   0x8   :  { %1635 = vmatprep.subr.bf16.mxu1 %v3336_v0  ;;  %v3082_v22 = vld [vmem:[%s4301_s1 + $0xf0] sm:$0xff]   ;;  %1455 = vmatprep.mubr.bf16.mxu0 %v3097_v19  ;;  %v3083_v23 = vld [vmem:[%s4301_s1 + $0x68] sm:$0xff]   ;;  %v3085_v25 = vld [vmem:[%s4301_s1 + $0x60] sm:$0xff]  }
   0x9   :  { %1663 = vmatprep.mubr.bf16.mxu1 %v3100_v21  ;;  %v3084_v24 = vld [vmem:[%s4301_s1 + $0xe8] sm:$0xff]   ;;  %v3086_v26 = vld [vmem:[%s4301_s1 + $0xe0] sm:$0xff]   ;;  %v3087_v27 = vld [vmem:[%s4301_s1 + $0x58] sm:$0xff]  }
   0xa   :  { %1428 = vmatpush1.bf16.msra.mxu0 %v3067_v5  ;;  %v3088_v28 = vld [vmem:[%s4301_s1 + $0xd8] sm:$0xff]   ;;  %v3089_v29 = vld [vmem:[%s4301_s1 + $0x50] sm:$0xff]   ;;  %v3091_v31 = vld [vmem:[%s4301_s1 + $0x48] sm:$0xff]  }
   0xb   :  { %1636 = vmatpush1.bf16.msra.mxu1 %v3068_v6  ;;  %1429 = vmatprep.subr.bf16.mxu0 %v3336_v0  ;;  %v3090_v30 = vld [vmem:[%s4301_s1 + $0xd0] sm:$0xff]   ;;  %v3092_v32 = vld [vmem:[%s4301_s1 + $0xc8] sm:$0xff]   ;;  %v3093_v33 = vld [vmem:[%s4301_s1 + $0x40] sm:$0xff]  }
   0xc   :  { %1637 = vmatprep.subr.bf16.mxu1 %v3336_v0  ;;  %v3094_v34 = vld [vmem:[%s4301_s1 + $0xc0] sm:$0xff]   ;;  %v3101_v37 = vld [vmem:[%s4301_s1 + $0x138] sm:$0xff]   ;;  %v3108_v40 = vld [vmem:[%s4301_s1 + $0x130] sm:$0xff]  }
   0xd   :  { %v3095_v35 = vld [vmem:[%s4302_s0] ss:$28 sps:$4 sm:$0xff]   ;;  %v3098_v36 = vld [vmem:[%s4302_s0 + $0x8] ss:$28 sps:$4 sm:$0xff]   ;;  %v3106_v41 = vld [vmem:[%s4302_s0 + $0x38] ss:$28 sps:$4 sm:$0xff]  }
   0xe   :  { %1430 = vmatpush1.bf16.msra.mxu0 %v3069_v7  ;;  %v3102_v38 = vld [vmem:[%s4302_s0 + $0x3c] ss:$28 sps:$4 sm:$0xff]   ;;  %v3104_v39 = vld [vmem:[%s4302_s0 + $0x44] ss:$28 sps:$4 sm:$0xff]   ;;  %v3109_v43 = vld [vmem:[%s4302_s0 + $0x74] ss:$28 sps:$4 sm:$0xff]  }
   0xf   :  { %1638 = vmatpush1.bf16.msra.mxu1 %v3070_v8  ;;  %1431 = vmatprep.subr.bf16.mxu0 %v3336_v0  ;;  %v3107_v42 = vld [vmem:[%s4302_s0 + $0x40] ss:$28 sps:$4 sm:$0xff]   ;;  %v3119_v45 = vld [vmem:[%s4301_s1 + $0x128] sm:$0xff]   ;;  %v3114_v48 = vld [vmem:[%s4302_s0 + $0x78] ss:$28 sps:$4 sm:$0xff]  }
  0x10   :  { %1639 = vmatprep.subr.bf16.mxu1 %v3336_v0  ;;  %v3111_v44 = vld [vmem:[%s4302_s0 + $0x7c] ss:$28 sps:$4 sm:$0xff]   ;;  %v3128_v46 = vld [vmem:[%s4301_s1 + $0x120] sm:$0xff]   ;;  %v3113_v47 = vld [vmem:[%s4302_s0 + $0x70] ss:$28 sps:$4 sm:$0xff]  }
  0x11   :  { %v3115_v49 = vld [vmem:[%s4302_s0 + $0xac] ss:$28 sps:$4 sm:$0xff]   ;;  %v3117_v50 = vld [vmem:[%s4302_s0 + $0xb4] ss:$28 sps:$4 sm:$0xff]   ;;  %v3135_v51 = vld [vmem:[%s4301_s1 + $0x118] sm:$0xff]  }
  0x12   :  { %1432 = vmatpush1.bf16.msra.mxu0 %v3071_v9  ;;  %v3148_v52 = vld [vmem:[%s4301_s1 + $0x110] sm:$0xff]   ;;  %v3120_v53 = vld [vmem:[%s4302_s0 + $0xa8] ss:$28 sps:$4 sm:$0xff]   ;;  %v3126_v59 = vld [vmem:[%s4302_s0 + $0xe0] ss:$28 sps:$4 sm:$0xff]  }
  0x13   :  { %1640 = vmatpush1.bf16.msra.mxu1 %v3072_v10  ;;  %1433 = vmatprep.subr.bf16.mxu0 %v3336_v0  ;;  %v3121_v54 = vld [vmem:[%s4302_s0 + $0xb0] ss:$28 sps:$4 sm:$0xff]   ;;  %v3122_v55 = vld [vmem:[%s4302_s0 + $0xe4] ss:$28 sps:$4 sm:$0xff]   ;;  %v3129_v61 = vld [vmem:[%s4302_s0 + $0x11c] ss:$28 sps:$4 sm:$0xff]  }
  0x14   :  { %1641 = vmatprep.subr.bf16.mxu1 %v3336_v0  ;;  %v3124_v56 = vld [vmem:[%s4302_s0 + $0xec] ss:$28 sps:$4 sm:$0xff]   ;;  %v3162_v58 = vld [vmem:[%s4301_s1 + $0x100] sm:$0xff]   ;;  %v3175_v63 = vld [vmem:[%s4301_s1 + $0x178] sm:$0xff]  }
  0x15   :  { %v3155_v57 = vld [vmem:[%s4301_s1 + $0x108] sm:$0xff]   ;;  %v3131_v62 = vld [vmem:[%s4302_s0 + $0x124] ss:$28 sps:$4 sm:$0xff]   ;;  %v3182_v1 = vld [vmem:[%s4301_s1 + $0x170] sm:$0xff]  }
  0x16   :  { %1434 = vmatpush1.bf16.msra.mxu0 %v3073_v11  ;;  %v3127_v60 = vld [vmem:[%s4302_s0 + $0xe8] ss:$28 sps:$4 sm:$0xff]   ;;  %v3133_v2 = vld [vmem:[%s4302_s0 + $0x118] ss:$28 sps:$4 sm:$0xff]   ;;  %v3134_v3 = vld [vmem:[%s4302_s0 + $0x120] ss:$28 sps:$4 sm:$0xff]  }
  0x17   :  { %1642 = vmatpush1.bf16.msra.mxu1 %v3074_v12  ;;  %1435 = vmatprep.subr.bf16.mxu0 %v3336_v0  ;;  %v3136_v4 = vld [vmem:[%s4302_s0 + $0x154] ss:$28 sps:$4 sm:$0xff]   ;;  %v3138_v5 = vld [vmem:[%s4302_s0 + $0x15c] ss:$28 sps:$4 sm:$0xff]   ;;  %v3193_v6 = vld [vmem:[%s4301_s1 + $0x168] sm:$0xff]  }
  0x18   :  { %1643 = vmatprep.subr.bf16.mxu1 %v3336_v0  ;;  %v3140_v7 = vld [vmem:[%s4302_s0 + $0x150] ss:$28 sps:$4 sm:$0xff]   ;;  %v3202_v8 = vld [vmem:[%s4301_s1 + $0x160] sm:$0xff]   ;;  %v3141_v9 = vld [vmem:[%s4302_s0 + $0x158] ss:$28 sps:$4 sm:$0xff]  }
  0x19   :  { %v3142_v10 = vld [vmem:[%s4302_s0 + $0x18c] ss:$28 sps:$4 sm:$0xff]   ;;  %v3144_v11 = vld [vmem:[%s4302_s0 + $0x194] ss:$28 sps:$4 sm:$0xff]   ;;  %v3209_v12 = vld [vmem:[%s4301_s1 + $0x158] sm:$0xff]  }
  0x1a   :  { %1436 = vmatpush1.bf16.msra.mxu0 %v3075_v13  ;;  %v3146_v13 = vld [vmem:[%s4302_s0 + $0x188] ss:$28 sps:$4 sm:$0xff]  }
  0x1b   :  { %1644 = vmatpush1.bf16.msra.mxu1 %v3076_v14  ;;  %1437 = vmatprep.subr.bf16.mxu0 %v3336_v0  ;;  %v3222_v14 = vld [vmem:[%s4301_s1 + $0x150] sm:$0xff]   ;;  %v3236_v19 = vld [vmem:[%s4301_s1 + $0x140] sm:$0xff]  }
  0x1c   :  { %1645 = vmatprep.subr.bf16.mxu1 %v3336_v0  ;;  %v3154_v21 = vld [vmem:[%s4302_s0 + $0x1c8] ss:$28 sps:$4 sm:$0xff]  }
  0x1e   :  { %1438 = vmatpush1.bf16.msra.mxu0 %v3077_v15  ;;  %v3147_v15 = vld [vmem:[%s4302_s0 + $0x190] ss:$28 sps:$4 sm:$0xff]  }
  0x1f   :  { %1646 = vmatpush1.bf16.msra.mxu1 %v3078_v16  ;;  %1439 = vmatprep.subr.bf16.mxu0 %v3336_v0  ;;  %v3149_v16 = vld [vmem:[%s4302_s0 + $0x1c4] ss:$28 sps:$4 sm:$0xff]  }
  0x20   :  { %1647 = vmatprep.subr.bf16.mxu1 %v3336_v0 }
  0x22   :  { %1440 = vmatpush2.bf16.msra.mxu0 %v3079_v17  ;;  %v3151_v17 = vld [vmem:[%s4302_s0 + $0x1cc] ss:$28 sps:$4 sm:$0xff]  }
  0x23   :  { %1648 = vmatpush2.bf16.msra.mxu1 %v3080_v18  ;;  %1441 = vmatprep.subr.bf16.mxu0 %v3336_v0  ;;  %v3229_v18 = vld [vmem:[%s4301_s1 + $0x148] sm:$0xff]  }
  0x24   :  { %1649 = vmatprep.subr.bf16.mxu1 %v3336_v0 }
  0x26   :  { %1442 = vmatpush2.bf16.msra.mxu0 %v3081_v20  ;;  %v3153_v20 = vld [vmem:[%s4302_s0 + $0x1c0] ss:$28 sps:$4 sm:$0xff]  }
  0x27   :  { %1650 = vmatpush2.bf16.msra.mxu1 %v3082_v22  ;;  %1443 = vmatprep.subr.bf16.mxu0 %v3336_v0  ;;  %v3156_v22 = vld [vmem:[%s4302_s0 + $0x1fc] ss:$28 sps:$4 sm:$0xff]  }
  0x28   :  { %1651 = vmatprep.subr.bf16.mxu1 %v3336_v0 }
  0x2a   :  { %1444 = vmatpush2.bf16.msra.mxu0 %v3083_v23  ;;  %v3678_v23 = vld [vmem:[%s4301_s1 + $0x1b8] sm:$0xff]  }
  0x2b   :  { %1652 = vmatpush2.bf16.msra.mxu1 %v3084_v24  ;;  %1445 = vmatprep.subr.bf16.mxu0 %v3336_v0  ;;  %v3158_v24 = vld [vmem:[%s4302_s0 + $0x204] ss:$28 sps:$4 sm:$0xff]  }
  0x2c   :  { %1653 = vmatprep.subr.bf16.mxu1 %v3336_v0 }
  0x2e   :  { %1446 = vmatpush2.bf16.msra.mxu0 %v3085_v25  ;;  %v3160_v25 = vld [vmem:[%s4302_s0 + $0x1f8] ss:$28 sps:$4 sm:$0xff]  }
  0x2f   :  { %1654 = vmatpush2.bf16.msra.mxu1 %v3086_v26  ;;  %1447 = vmatprep.subr.bf16.mxu0 %v3336_v0  ;;  %v3161_v26 = vld [vmem:[%s4302_s0 + $0x200] ss:$28 sps:$4 sm:$0xff]  }
  0x30   :  { %1655 = vmatprep.subr.bf16.mxu1 %v3336_v0 }
  0x32   :  { %1448 = vmatpush2.bf16.msra.mxu0 %v3087_v27  ;;  %v3165_v27 = vld [vmem:[%s4302_s0 + $0x23c] ss:$28 sps:$4 sm:$0xff]  }
  0x33   :  { %1656 = vmatpush2.bf16.msra.mxu1 %v3088_v28  ;;  %1449 = vmatprep.subr.bf16.mxu0 %v3336_v0  ;;  %v3167_v28 = vld [vmem:[%s4302_s0 + $0x230] ss:$28 sps:$4 sm:$0xff]  }
  0x34   :  { %1657 = vmatprep.subr.bf16.mxu1 %v3336_v0 }
  0x36   :  { %1450 = vmatpush2.bf16.msra.mxu0 %v3089_v29  ;;  %v3168_v29 = vld [vmem:[%s4302_s0 + $0x238] ss:$28 sps:$4 sm:$0xff]  }
  0x37   :  { %1658 = vmatpush2.bf16.msra.mxu1 %v3090_v30  ;;  %1451 = vmatprep.subr.bf16.mxu0 %v3336_v0  ;;  %v3169_v30 = vld [vmem:[%s4302_s0 + $0x26c] ss:$28 sps:$4 sm:$0xff]  }
  0x38   :  { %1659 = vmatprep.subr.bf16.mxu1 %v3336_v0 }
  0x3a   :  { %1452 = vmatpush2.bf16.msra.mxu0 %v3091_v31  ;;  %v3171_v31 = vld [vmem:[%s4302_s0 + $0x274] ss:$28 sps:$4 sm:$0xff]  }
  0x3b   :  { %1660 = vmatpush2.bf16.msra.mxu1 %v3092_v32  ;;  %1453 = vmatprep.subr.bf16.mxu0 %v3336_v0  ;;  %v3173_v32 = vld [vmem:[%s4302_s0 + $0x268] ss:$28 sps:$4 sm:$0xff]  }
  0x3c   :  { %1661 = vmatprep.subr.bf16.mxu1 %v3336_v0 }
  0x3e   :  { %1454 = vmatpush2.bf16.msra.mxu0 %v3093_v33  ;;  %v3174_v33 = vld [vmem:[%s4302_s0 + $0x270] ss:$28 sps:$4 sm:$0xff]  }
  0x3f   :  { %1662 = vmatpush2.bf16.msra.mxu1 %v3094_v34  ;;  %1839 = vmatprep.subr.bf16.mxu0 %v3336_v0  ;;  %v3176_v34 = vld [vmem:[%s4302_s0 + $0x2a4] ss:$28 sps:$4 sm:$0xff]  }
  0x40   :  { %3030 = vmatprep.subr.bf16.mxu1 %v3336_v0 }
  0x41   :  { %1456 = vmatmul.mubr.bf16.vlgmr.msra.gmra.mxu0 %v3095_v35  ;;  %v3178_v35 = vld [vmem:[%s4302_s0 + $0x2ac] ss:$28 sps:$4 sm:$0xff]  }
  0x42   :  { %1664 = vmatmul.mubr.bf16.vlgmr.msra.gmra.mxu1 %v3098_v36  ;;  %1840 = vmatpush1.bf16.msra.mxu0 %v3101_v37  ;;  %v3180_v36 = vld [vmem:[%s4302_s0 + $0x2a0] ss:$28 sps:$4 sm:$0xff]  }
  0x43   :  { %1463 = vmatprep.mubr.bf16.mxu0 %v3102_v38  ;;  %1671 = vmatprep.mubr.bf16.mxu1 %v3104_v39  ;;  %v3183_v38 = vld [vmem:[%s4302_s0 + $0x2dc] ss:$28 sps:$4 sm:$0xff]   ;;  %v3185_v39 = vld [vmem:[%s4302_s0 + $0x2e4] ss:$28 sps:$4 sm:$0xff]  }
  0x44   :  { %3046 = vmatpush1.bf16.msra.mxu1 %v3101_v37  ;;  %1841 = vmatprep.subr.bf16.mxu0 %v3336_v0  ;;  %v3181_v37 = vld [vmem:[%s4302_s0 + $0x2a8] ss:$28 sps:$4 sm:$0xff]  }
  0x45   :  { %3031 = vmatprep.subr.bf16.mxu1 %v3336_v0 }
  0x46   :  { %1842 = vmatpush1.bf16.msra.mxu0 %v3108_v40 }
  0x47   :  { %1843 = vmatprep.subr.bf16.mxu0 %v3336_v0 }
  0x48   :  { %3047 = vmatpush1.bf16.msra.mxu1 %v3108_v40  ;;  %v3187_v40 = vld [vmem:[%s4302_s0 + $0x2d8] ss:$28 sps:$4 sm:$0xff]  }
  0x49   :  { %1464 = vmatmul.mubr.bf16.gmra.mxu0 %v3106_v41  ;;  %3032 = vmatprep.subr.bf16.mxu1 %v3336_v0  ;;  %v3188_v41 = vld [vmem:[%s4302_s0 + $0x2e0] ss:$28 sps:$4 sm:$0xff]  }
  0x4a   :  { %1672 = vmatmul.mubr.bf16.gmra.mxu1 %v3107_v42  ;;  %1471 = vmatprep.mubr.bf16.mxu0 %v3109_v43  ;;  %v3189_v42 = vld [vmem:[%s4302_s0 + $0x314] ss:$28 sps:$4 sm:$0xff]   ;;  %v3191_v43 = vld [vmem:[%s4302_s0 + $0x31c] ss:$28 sps:$4 sm:$0xff]  }
  0x4b   :  { %1679 = vmatprep.mubr.bf16.mxu1 %v3111_v44  ;;  %1844 = vmatpush1.bf16.msra.mxu0 %v3119_v45  ;;  %v3194_v44 = vld [vmem:[%s4302_s0 + $0x310] ss:$28 sps:$4 sm:$0xff]  }
  0x4c   :  { %3048 = vmatpush1.bf16.msra.mxu1 %v3119_v45  ;;  %1845 = vmatprep.subr.bf16.mxu0 %v3336_v0  ;;  %v3195_v45 = vld [vmem:[%s4302_s0 + $0x318] ss:$28 sps:$4 sm:$0xff]  }
  0x4d   :  { %3033 = vmatprep.subr.bf16.mxu1 %v3336_v0 }
  0x4f   :  { %1846 = vmatpush1.bf16.msra.mxu0 %v3128_v46 }
  0x50   :  { %3049 = vmatpush1.bf16.msra.mxu1 %v3128_v46  ;;  %1847 = vmatprep.subr.bf16.mxu0 %v3336_v0  ;;  %v3196_v46 = vld [vmem:[%s4302_s0 + $0x34c] ss:$28 sps:$4 sm:$0xff]  }
  0x51   :  { %1472 = vmatmul.mubr.bf16.gmra.mxu0 %v3113_v47  ;;  %3034 = vmatprep.subr.bf16.mxu1 %v3336_v0  ;;  %v3198_v47 = vld [vmem:[%s4302_s0 + $0x354] ss:$28 sps:$4 sm:$0xff]  }
  0x52   :  { %1680 = vmatmul.mubr.bf16.gmra.mxu1 %v3114_v48  ;;  %1479 = vmatprep.mubr.bf16.mxu0 %v3115_v49  ;;  %v3200_v48 = vld [vmem:[%s4302_s0 + $0x348] ss:$28 sps:$4 sm:$0xff]   ;;  %v3201_v49 = vld [vmem:[%s4302_s0 + $0x350] ss:$28 sps:$4 sm:$0xff]  }
  0x53   :  { %1687 = vmatprep.mubr.bf16.mxu1 %v3117_v50  ;;  %1848 = vmatpush1.bf16.msra.mxu0 %v3135_v51  ;;  %v3203_v50 = vld [vmem:[%s4302_s0 + $0x384] ss:$28 sps:$4 sm:$0xff]  }
  0x54   :  { %3050 = vmatpush1.bf16.msra.mxu1 %v3135_v51  ;;  %1849 = vmatprep.subr.bf16.mxu0 %v3336_v0  ;;  %v3205_v51 = vld [vmem:[%s4302_s0 + $0x38c] ss:$28 sps:$4 sm:$0xff]  }
  0x55   :  { %3035 = vmatprep.subr.bf16.mxu1 %v3336_v0 }
  0x57   :  { %1850 = vmatpush1.bf16.msra.mxu0 %v3148_v52 }
  0x58   :  { %3051 = vmatpush1.bf16.msra.mxu1 %v3148_v52  ;;  %1851 = vmatprep.subr.bf16.mxu0 %v3336_v0  ;;  %v3207_v52 = vld [vmem:[%s4302_s0 + $0x380] ss:$28 sps:$4 sm:$0xff]  }
  0x59   :  { %1480 = vmatmul.mubr.bf16.gmra.mxu0 %v3120_v53  ;;  %3036 = vmatprep.subr.bf16.mxu1 %v3336_v0  ;;  %v3208_v53 = vld [vmem:[%s4302_s0 + $0x388] ss:$28 sps:$4 sm:$0xff]  }
  0x5a   :  { %1688 = vmatmul.mubr.bf16.gmra.mxu1 %v3121_v54  ;;  %1487 = vmatprep.mubr.bf16.mxu0 %v3122_v55  ;;  %v3210_v54 = vld [vmem:[%s4302_s0 + $0x3bc] ss:$28 sps:$4 sm:$0xff]   ;;  %v3212_v55 = vld [vmem:[%s4302_s0 + $0x3c4] ss:$28 sps:$4 sm:$0xff]  }
  0x5b   :  { %1695 = vmatprep.mubr.bf16.mxu1 %v3124_v56  ;;  %1852 = vmatpush1.bf16.msra.mxu0 %v3155_v57  ;;  %v3214_v56 = vld [vmem:[%s4302_s0 + $0x3b8] ss:$28 sps:$4 sm:$0xff]  }
  0x5c   :  { %3052 = vmatpush1.bf16.msra.mxu1 %v3155_v57  ;;  %1853 = vmatprep.subr.bf16.mxu0 %v3336_v0  ;;  %v3215_v57 = vld [vmem:[%s4302_s0 + $0x3c0] ss:$28 sps:$4 sm:$0xff]  }
  0x5d   :  { %3037 = vmatprep.subr.bf16.mxu1 %v3336_v0 }
  0x5f   :  { %1854 = vmatpush1.bf16.msra.mxu0 %v3162_v58 }
  0x60   :  { %3053 = vmatpush1.bf16.msra.mxu1 %v3162_v58  ;;  %1855 = vmatprep.subr.bf16.mxu0 %v3336_v0  ;;  %v3216_v58 = vld [vmem:[%s4302_s0 + $0x3f4] ss:$28 sps:$4 sm:$0xff]  }
  0x61   :  { %1488 = vmatmul.mubr.bf16.gmra.mxu0 %v3126_v59  ;;  %3038 = vmatprep.subr.bf16.mxu1 %v3336_v0  ;;  %v3218_v59 = vld [vmem:[%s4302_s0 + $0x3fc] ss:$28 sps:$4 sm:$0xff]  }
  0x62   :  { %1696 = vmatmul.mubr.bf16.gmra.mxu1 %v3127_v60  ;;  %1495 = vmatprep.mubr.bf16.mxu0 %v3129_v61  ;;  %v3220_v60 = vld [vmem:[%s4302_s0 + $0x3f0] ss:$28 sps:$4 sm:$0xff]   ;;  %v3221_v61 = vld [vmem:[%s4302_s0 + $0x3f8] ss:$28 sps:$4 sm:$0xff]  }
  0x63   :  { %1703 = vmatprep.mubr.bf16.mxu1 %v3131_v62  ;;  %1856 = vmatpush2.bf16.msra.mxu0 %v3175_v63  ;;  %v3223_v62 = vld [vmem:[%s4302_s0 + $0x42c] ss:$28 sps:$4 sm:$0xff]  }
  0x64   :  { %3054 = vmatpush2.bf16.msra.mxu1 %v3175_v63  ;;  %1857 = vmatprep.subr.bf16.mxu0 %v3336_v0  ;;  %v3225_v63 = vld [vmem:[%s4302_s0 + $0x434] ss:$28 sps:$4 sm:$0xff]  }
  0x65   :  { %3039 = vmatprep.subr.bf16.mxu1 %v3336_v0 }
  0x67   :  { %1858 = vmatpush2.bf16.msra.mxu0 %v3182_v1 }
  0x68   :  { %3055 = vmatpush2.bf16.msra.mxu1 %v3182_v1  ;;  %1859 = vmatprep.subr.bf16.mxu0 %v3336_v0  ;;  %v3227_v1 = vld [vmem:[%s4302_s0 + $0x428] ss:$28 sps:$4 sm:$0xff]  }
  0x69   :  { %1496 = vmatmul.mubr.bf16.gmra.mxu0 %v3133_v2  ;;  %3040 = vmatprep.subr.bf16.mxu1 %v3336_v0  ;;  %v3228_v2 = vld [vmem:[%s4302_s0 + $0x430] ss:$28 sps:$4 sm:$0xff]  }
  0x6a   :  { %1704 = vmatmul.mubr.bf16.gmra.mxu1 %v3134_v3  ;;  %1503 = vmatprep.mubr.bf16.mxu0 %v3136_v4  ;;  %v3230_v3 = vld [vmem:[%s4302_s0 + $0x464] ss:$28 sps:$4 sm:$0xff]   ;;  %v3232_v4 = vld [vmem:[%s4302_s0 + $0x46c] ss:$28 sps:$4 sm:$0xff]  }
  0x6b   :  { %1711 = vmatprep.mubr.bf16.mxu1 %v3138_v5  ;;  %1860 = vmatpush2.bf16.msra.mxu0 %v3193_v6  ;;  %v183_v5 = vld [vmem:[%s4302_s0 + $0x498] sm:$0xff] }
  0x6c   :  { %3056 = vmatpush2.bf16.msra.mxu1 %v3193_v6  ;;  %1861 = vmatprep.subr.bf16.mxu0 %v3336_v0  ;;  %v184_v6 = vld [vmem:[%s4302_s0 + $0x4a0] sm:$0xff] }
  0x6d   :  { %3041 = vmatprep.subr.bf16.mxu1 %v3336_v0 }
  0x6f   :  { %1862 = vmatpush2.bf16.msra.mxu0 %v3202_v8 }
  0x70   :  { %3057 = vmatpush2.bf16.msra.mxu1 %v3202_v8  ;;  %1863 = vmatprep.subr.bf16.mxu0 %v3336_v0  ;;  %v3235_v8 = vld [vmem:[%s4302_s0 + $0x468] ss:$28 sps:$4 sm:$0xff]  }
  0x71   :  { %1504 = vmatmul.mubr.bf16.gmra.mxu0 %v3140_v7  ;;  %3042 = vmatprep.subr.bf16.mxu1 %v3336_v0  ;;  %v3234_v7 = vld [vmem:[%s4302_s0 + $0x460] ss:$28 sps:$4 sm:$0xff]  }
  0x72   :  { %1712 = vmatmul.mubr.bf16.gmra.mxu1 %v3141_v9  ;;  %1511 = vmatprep.mubr.bf16.mxu0 %v3142_v10  ;;  %v2667_v9 = vcombine.high %v183_v5, %v183_v5  ;;  %v2669_v10 = vcombine.high %v184_v6, %v184_v6 }
  0x73   :  { %1719 = vmatprep.mubr.bf16.mxu1 %v3144_v11  ;;  %1864 = vmatpush2.bf16.msra.mxu0 %v3209_v12  ;;  %v2666_v11 = vcombine.low %v183_v5, %v183_v5 }
  0x74   :  { %3058 = vmatpush2.bf16.msra.mxu1 %v3209_v12  ;;  %1865 = vmatprep.subr.bf16.mxu0 %v3336_v0  ;;  %v2668_v12 = vcombine.low %v184_v6, %v184_v6 }
  0x75   :  { %3043 = vmatprep.subr.bf16.mxu1 %v3336_v0 }
  0x77   :  { %1866 = vmatpush2.bf16.msra.mxu0 %v3222_v14 }
  0x78   :  { %3059 = vmatpush2.bf16.msra.mxu1 %v3222_v14  ;;  %1867 = vmatprep.subr.bf16.mxu0 %v3336_v0  ;;  %v3246_v14 = vld [vmem:[%s4302_s0 + $0x3cc] ss:$28 sps:$4 sm:$0xff]  }
  0x79   :  { %1512 = vmatmul.mubr.bf16.gmra.mxu0 %v3146_v13  ;;  %3044 = vmatprep.subr.bf16.mxu1 %v3336_v0  ;;  %v3243_v13 = vld [vmem:[%s4302_s0 + $0x14] ss:$28 sps:$4 sm:$0xff]  }
  0x7a   :  { %1720 = vmatmul.mubr.bf16.gmra.mxu1 %v3147_v15  ;;  %1519 = vmatprep.mubr.bf16.mxu0 %v3149_v16  ;;  %v3241_v15 = vld [vmem:[%s4302_s0 + $0x10] ss:$28 sps:$4 sm:$0xff]   ;;  %v3244_v16 = vld [vmem:[%s4302_s0 + $0x3c8] ss:$28 sps:$4 sm:$0xff]  }
  0x7b   :  { %1727 = vmatprep.mubr.bf16.mxu1 %v3151_v17  ;;  %1868 = vmatpush2.bf16.msra.mxu0 %v3229_v18  ;;  %v3247_v17 = vld [vmem:[%s4302_s0 + $0x4c] ss:$28 sps:$4 sm:$0xff]  }
  0x7c   :  { %3060 = vmatpush2.bf16.msra.mxu1 %v3229_v18  ;;  %1869 = vmatprep.subr.bf16.mxu0 %v3336_v0  ;;  %v3249_v18 = vld [vmem:[%s4302_s0 + $0x404] ss:$28 sps:$4 sm:$0xff]  }
  0x7d   :  { %3045 = vmatprep.subr.bf16.mxu1 %v3336_v0  ;;  %v3163_v0 = vld [vmem:[%s4302_s0 + $0x234] ss:$28 sps:$4 sm:$0xff]  }
  0x7f   :  { %1870 = vmatpush2.bf16.msra.mxu0 %v3236_v19 }
  0x80   :  { %3061 = vmatpush2.bf16.msra.mxu1 %v3236_v19  ;;  %v3254_v19 = vld [vmem:[%s4301_s1 + $0x1b0] sm:$0xff]  }
  0x81   :  { %1520 = vmatmul.mubr.bf16.gmra.mxu0 %v3153_v20  ;;  %2970 = vmatprep.subr.bf16.mxu1 %v3678_v23  ;;  %v3261_v20 = vld [vmem:[%s4301_s1 + $0x1a8] sm:$0xff]  }
  0x82   :  { %1728 = vmatmul.mubr.bf16.gmra.mxu1 %v3154_v21  ;;  %1527 = vmatprep.mubr.bf16.mxu0 %v3156_v22  ;;  %v3251_v21 = vld [vmem:[%s4302_s0 + $0x48] ss:$28 sps:$4 sm:$0xff]   ;;  %v3252_v22 = vld [vmem:[%s4302_s0 + $0x400] ss:$28 sps:$4 sm:$0xff]  }
  0x83   :  { %1735 = vmatprep.mubr.bf16.mxu1 %v3158_v24  ;;  %v3255_v24 = vld [vmem:[%s4302_s0 + $0x84] ss:$28 sps:$4 sm:$0xff]  }
  0x89   :  { %1528 = vmatmul.mubr.bf16.gmra.mxu0 %v3160_v25  ;;  %v3262_v25 = vld [vmem:[%s4301_s1 + $0x1a0] sm:$0xff]  }
  0x8a   :  { %1736 = vmatmul.mubr.bf16.gmra.mxu1 %v3161_v26  ;;  %1535 = vmatprep.mubr.bf16.mxu0 %v3163_v0  ;;  %v3269_v26 = vld [vmem:[%s4301_s1 + $0x198] sm:$0xff]  }
  0x8b   :  { %1743 = vmatprep.mubr.bf16.mxu1 %v3165_v27  ;;  %v3259_v0 = vld [vmem:[%s4302_s0 + $0x80] ss:$28 sps:$4 sm:$0xff]   ;;  %v3260_v27 = vld [vmem:[%s4302_s0 + $0x438] ss:$28 sps:$4 sm:$0xff]  }
  0x91   :  { %1536 = vmatmul.mubr.bf16.gmra.mxu0 %v3167_v28  ;;  %v3263_v28 = vld [vmem:[%s4302_s0 + $0xbc] ss:$28 sps:$4 sm:$0xff]  }
  0x92   :  { %1744 = vmatmul.mubr.bf16.gmra.mxu1 %v3168_v29  ;;  %1543 = vmatprep.mubr.bf16.mxu0 %v3169_v30  ;;  %v3884_v29 = vld [vmem:[%s4303_s2] ss:$0 sm:$0xff]  ;;  %v3265_v30 = vld [vmem:[%s4302_s0 + $0x474] ss:$28 sps:$4 sm:$0xff]  }
  0x93   :  { %1751 = vmatprep.mubr.bf16.mxu1 %v3171_v31  ;;  %v3270_v31 = vld [vmem:[%s4301_s1 + $0x190] sm:$0xff]  }
  0x99   :  { %1544 = vmatmul.mubr.bf16.gmra.mxu0 %v3173_v32 }
  0x9a   :  { %1752 = vmatmul.mubr.bf16.gmra.mxu1 %v3174_v33  ;;  %1551 = vmatprep.mubr.bf16.mxu0 %v3176_v34 }
  0x9b   :  { %1759 = vmatprep.mubr.bf16.mxu1 %v3178_v35 }
  0xa1   :  { %1552 = vmatmul.mubr.bf16.gmra.mxu0 %v3180_v36 }
  0xa2   :  { %1760 = vmatmul.mubr.bf16.gmra.mxu1 %v3181_v37  ;;  %1559 = vmatprep.mubr.bf16.mxu0 %v3183_v38  ;;  %v185_v38 = vld [vmem:[%s4302_s0 + $0x4a8] sm:$0xff] }
  0xa3   :  { %1767 = vmatprep.mubr.bf16.mxu1 %v3185_v39  ;;  %v3276_v39 = vld [vmem:[%s4301_s1 + $0x188] sm:$0xff]  }
  0xa9   :  { %1560 = vmatmul.mubr.bf16.gmra.mxu0 %v3187_v40 }
  0xaa   :  { %1768 = vmatmul.mubr.bf16.gmra.mxu1 %v3188_v41  ;;  %1567 = vmatprep.mubr.bf16.mxu0 %v3189_v42  ;;  %v3267_v41 = vld [vmem:[%s4302_s0 + $0xb8] ss:$28 sps:$4 sm:$0xff]  }
  0xab   :  { %1775 = vmatprep.mubr.bf16.mxu1 %v3191_v43 }
  0xb1   :  { %1568 = vmatmul.mubr.bf16.gmra.mxu0 %v3194_v44  ;;  %v3268_v44 = vld [vmem:[%s4302_s0 + $0x470] ss:$28 sps:$4 sm:$0xff]  }
  0xb2   :  { %1776 = vmatmul.mubr.bf16.gmra.mxu1 %v3195_v45  ;;  %1575 = vmatprep.mubr.bf16.mxu0 %v3196_v46  ;;  %v3271_v45 = vld [vmem:[%s4302_s0 + $0xf4] ss:$28 sps:$4 sm:$0xff]  }
  0xb3   :  { %1783 = vmatprep.mubr.bf16.mxu1 %v3198_v47  ;;  %v2671_v47 = vcombine.high %v185_v38, %v185_v38 }
  0xb9   :  { %1576 = vmatmul.mubr.bf16.gmra.mxu0 %v3200_v48 }
  0xba   :  { %1784 = vmatmul.mubr.bf16.gmra.mxu1 %v3201_v49  ;;  %1583 = vmatprep.mubr.bf16.mxu0 %v3203_v50  ;;  %v3277_v50 = vld [vmem:[%s4301_s1 + $0x180] sm:$0xff]  }
  0xbb   :  { %1791 = vmatprep.mubr.bf16.mxu1 %v3205_v51 }
  0xc1   :  { %1584 = vmatmul.mubr.bf16.gmra.mxu0 %v3207_v52 }
  0xc2   :  { %1792 = vmatmul.mubr.bf16.gmra.mxu1 %v3208_v53  ;;  %1591 = vmatprep.mubr.bf16.mxu0 %v3210_v54 }
  0xc3   :  { %1799 = vmatprep.mubr.bf16.mxu1 %v3212_v55 }
  0xc9   :  { %1592 = vmatmul.mubr.bf16.gmra.mxu0 %v3214_v56 }
  0xca   :  { %1800 = vmatmul.mubr.bf16.gmra.mxu1 %v3215_v57  ;;  %1599 = vmatprep.mubr.bf16.mxu0 %v3216_v58  ;;  %v3274_v58 = vld [vmem:[%s4302_s0 + $0xf0] ss:$28 sps:$4 sm:$0xff]  }
  0xcb   :  { %1807 = vmatprep.mubr.bf16.mxu1 %v3218_v59 }
  0xd1   :  { %1600 = vmatmul.mubr.bf16.gmra.mxu0 %v3220_v60 }
  0xd2   :  { %1808 = vmatmul.mubr.bf16.gmra.mxu1 %v3221_v61  ;;  %1607 = vmatprep.mubr.bf16.mxu0 %v3223_v62  ;;  %v2670_v61 = vcombine.low %v185_v38, %v185_v38  ;;  %v3278_v62 = vld [vmem:[%s4302_s0 + $0x12c] ss:$28 sps:$4 sm:$0xff]  }
  0xd3   :  { %1815 = vmatprep.mubr.bf16.mxu1 %v3225_v63 }
  0xd9   :  { %1608 = vmatmul.mubr.bf16.gmra.mxu0 %v3227_v1  ;;  %v3280_v1 = vld [vmem:[%s4302_s0 + $0x18] ss:$28 sps:$4 sm:$0xff]  }
  0xda   :  { %1816 = vmatmul.mubr.bf16.gmra.mxu1 %v3228_v2  ;;  %1615 = vmatprep.mubr.bf16.mxu0 %v3230_v3 }
  0xdb   :  { %1823 = vmatprep.mubr.bf16.mxu1 %v3232_v4 }
  0xe1   :  { %1616 = vmatmul.mubr.bf16.gmra.mxu0 %v3234_v7 }
  0xe2   :  { %1824 = vmatmul.mubr.bf16.gmra.mxu1 %v3235_v8  ;;  %1623 = vmatprep.mubr.bf16.mxu0 %v2667_v9 }
  0xe3   :  { %1831 = vmatprep.mubr.bf16.mxu1 %v2669_v10 }
  0xe9   :  { %1624 = vmatmul.mubr.bf16.gmra.mxu0 %v2666_v11  ;;  %v3281_v11 = vld [vmem:[%s4302_s0 + $0x128] ss:$28 sps:$4 sm:$0xff]  }
  0xea   :  { %1832 = vmatmul.mubr.bf16.gmra.mxu1 %v2668_v12  ;;  %1871 = vmatprep.mubr.bf16.mxu0 %v3243_v13 }
  0xeb   :  { %2007 = vmatprep.mubr.bf16.mxu1 %v3246_v14  ;;  %v3282_v14 = vld [vmem:[%s4302_s0 + $0x50] ss:$28 sps:$4 sm:$0xff]  }
  0xf1   :  { %1872 = vmatmul.mubr.bf16.vlgmr.msra.gmra.mxu0 %v3241_v15  ;;  %v3285_v15 = vld [vmem:[%s4302_s0 + $0x164] ss:$28 sps:$4 sm:$0xff]  }
  0xf2   :  { %2008 = vmatmul.mubr.bf16.vlgmr.msra.gmra.mxu1 %v3244_v16  ;;  %1879 = vmatprep.mubr.bf16.mxu0 %v3247_v17  ;;  %v3286_v17 = vld [vmem:[%s4302_s0 + $0x88] ss:$28 sps:$4 sm:$0xff]  }
  0xf3   :  { %2015 = vmatprep.mubr.bf16.mxu1 %v3249_v18  ;;  %2971 = vmatpush3.bf16.msra.mxu1 %v3678_v23  ;;  %v3257_v23 = vld [vmem:[%s4302_s0 + $0x43c] ss:$28 sps:$4 sm:$0xff]  }
  0xf4   :  { %2972 = vmatprep.subr.bf16.mxu1 %v3254_v19 }
  0xf7   :  { %2973 = vmatpush3.bf16.msra.mxu1 %v3254_v19 }
  0xf8   :  { %2974 = vmatprep.subr.bf16.mxu1 %v3261_v20 }
  0xf9   :  { %1880 = vmatmul.mubr.bf16.gmra.mxu0 %v3251_v21 }
  0xfa   :  { %2016 = vmatmul.mubr.bf16.gmra.mxu1 %v3252_v22  ;;  %1887 = vmatprep.mubr.bf16.mxu0 %v3255_v24 }
  0xfb   :  { %2023 = vmatprep.mubr.bf16.mxu1 %v3257_v23  ;;  %2975 = vmatpush3.bf16.msra.mxu1 %v3261_v20 }
  0xfc   :  { %2976 = vmatprep.subr.bf16.mxu1 %v3262_v25 }
  0xff   :  { %2977 = vmatpush3.bf16.msra.mxu1 %v3262_v25 }
 0x100   :  { %2978 = vmatprep.subr.bf16.mxu1 %v3269_v26 }
 0x101   :  { %v1457_v32 = vpop.f32.mrf.mxu0  ;;  %1888 = vmatmul.mubr.bf16.gmra.mxu0 %v3259_v0  ;;  %v3283_v0 = vld [vmem:[%s4302_s0 + $0x160] ss:$28 sps:$4 sm:$0xff]  }
 0x102   :  { %v1458_v33 = vadd.f32 %v3884_v29, %v1457_v32  ;;  %v1665_v34 = vpop.f32.mrf.mxu1  ;;  %2024 = vmatmul.mubr.bf16.gmra.mxu1 %v3260_v27  ;;  %1895 = vmatprep.mubr.bf16.mxu0 %v3263_v28 }
 0x103   :  { %v1459_v35 = vpop.f32.mrf.mxu0  ;;  %2031 = vmatprep.mubr.bf16.mxu1 %v3265_v30  ;;  %2979 = vmatpush3.bf16.msra.mxu1 %v3269_v26  ;;  %v3287_v30 = vld [vmem:[%s4302_s0 + $0xc0] ss:$28 sps:$4 sm:$0xff]  }
 0x104   :  { %v3893_v36 = vadd.f32 %v1665_v34, %v1458_v33  ;;  %v1667_v37 = vpop.f32.mrf.mxu1  ;;  %2980 = vmatprep.subr.bf16.mxu1 %v3270_v31  ;;  %v3291_v33 = vld [vmem:[%s4302_s0 + $0xf8] ss:$28 sps:$4 sm:$0xff]  }
 0x105   :  { %v1460_v40 = vpop.f32.mrf.mxu0 }
 0x106   :  { %v1461_v42 = vadd.f32 %v3884_v29, %v1460_v40  ;;  %v1668_v43 = vpop.f32.mrf.mxu1 }
 0x107   :  { %v1462_v46 = vpop.f32.mrf.mxu0  ;;  %2981 = vmatpush3.bf16.msra.mxu1 %v3270_v31  ;;  %v3290_v31 = vld [vmem:[%s4302_s0 + $0x19c] ss:$28 sps:$4 sm:$0xff]  }
 0x108   :  { %v3911_v48 = vadd.f32 %v1668_v43, %v1461_v42  ;;  %v1670_v49 = vpop.f32.mrf.mxu1  ;;  %2982 = vmatprep.subr.bf16.mxu1 %v3276_v39 }
 0x109   :  { %v1465_v51 = vpop.f32.mrf.mxu0  ;;  %1896 = vmatmul.mubr.bf16.gmra.mxu0 %v3267_v41  ;;  %v3295_v49 = vld [vmem:[%s4302_s0 + $0x1d4] ss:$28 sps:$4 sm:$0xff]  }
 0x10a   :  { %v1466_v52 = vadd.f32 %v3884_v29, %v1465_v51  ;;  %v1673_v53 = vpop.f32.mrf.mxu1  ;;  %2032 = vmatmul.mubr.bf16.gmra.mxu1 %v3268_v44  ;;  %1903 = vmatprep.mubr.bf16.mxu0 %v3271_v45  ;;  %v3288_v44 = vld [vmem:[%s4302_s0 + $0x198] ss:$28 sps:$4 sm:$0xff]   ;;  %v3296_v51 = vld [vmem:[%s4302_s0 + $0x168] ss:$28 sps:$4 sm:$0xff]  }
 0x10b   :  { %v1467_v54 = vpop.f32.mrf.mxu0  ;;  %2039 = vmatprep.mubr.bf16.mxu1 %v2671_v47  ;;  %2983 = vmatpush3.bf16.msra.mxu1 %v3276_v39  ;;  %v3292_v47 = vld [vmem:[%s4302_s0 + $0x130] ss:$28 sps:$4 sm:$0xff]  }
 0x10c   :  { %v3917_v55 = vadd.f32 %v1673_v53, %v1466_v52  ;;  %v1675_v56 = vpop.f32.mrf.mxu1  ;;  %2984 = vmatprep.subr.bf16.mxu1 %v3277_v50 }
 0x10d   :  { %v1468_v57 = vpop.f32.mrf.mxu0 }
 0x10e   :  { %v1469_v59 = vadd.f32 %v3884_v29, %v1468_v57  ;;  %v1676_v60 = vpop.f32.mrf.mxu1 }
 0x10f   :  { %v1470_v63 = vpop.f32.mrf.mxu0  ;;  %2985 = vmatpush3.bf16.msra.mxu1 %v3277_v50 }
 0x110   :  { %v3929_v2 = vadd.f32 %v1676_v60, %v1469_v59  ;;  %v1678_v3 = vpop.f32.mrf.mxu1 }
 0x111   :  { %v1473_v4 = vpop.f32.mrf.mxu0  ;;  %1904 = vmatmul.mubr.bf16.gmra.mxu0 %v3274_v58  ;;  %v3297_v3 = vld [vmem:[%s4302_s0 + $0x1a0] ss:$28 sps:$4 sm:$0xff]  }
 0x112   :  { %v1474_v5 = vadd.f32 %v3884_v29, %v1473_v4  ;;  %v1681_v6 = vpop.f32.mrf.mxu1  ;;  %2040 = vmatmul.mubr.bf16.gmra.mxu1 %v2670_v61  ;;  %1911 = vmatprep.mubr.bf16.mxu0 %v3278_v62  ;;  %v3293_v62 = vld [vmem:[%s4302_s0 + $0x1d0] ss:$28 sps:$4 sm:$0xff]  }
 0x113   :  { %v1475_v7 = vpop.f32.mrf.mxu0  ;;  %2986 = vmatprep.mubr.bf16.mxu1 %v3280_v1  ;;  %v3300_v4 = vld [vmem:[%s4302_s0 + $0x20c] ss:$28 sps:$4 sm:$0xff]  }
 0x114   :  { %v3932_v8 = vadd.f32 %v1681_v6, %v1474_v5  ;;  %v1683_v9 = vpop.f32.mrf.mxu1  ;;  %v3301_v6 = vld [vmem:[%s4302_s0 + $0x1d8] ss:$28 sps:$4 sm:$0xff]  }
 0x115   :  { %v1476_v10 = vpop.f32.mrf.mxu0 }
 0x116   :  { %v1477_v12 = vadd.f32 %v3884_v29, %v1476_v10  ;;  %v1684_v13 = vpop.f32.mrf.mxu1 }
 0x117   :  { %v1478_v16 = vpop.f32.mrf.mxu0 }
 0x118   :  { %v3947_v18 = vadd.f32 %v1684_v13, %v1477_v12  ;;  %v1686_v19 = vpop.f32.mrf.mxu1 }
 0x119   :  { %v1481_v20 = vpop.f32.mrf.mxu0  ;;  %1912 = vmatmul.mubr.bf16.gmra.mxu0 %v3281_v11 }
 0x11a   :  { %v1482_v21 = vadd.f32 %v3884_v29, %v1481_v20  ;;  %v1689_v22 = vpop.f32.mrf.mxu1  ;;  %2987 = vmatmul.mubr.bf16.vlgmr.msra.gmra.mxu1 %v3282_v14  ;;  %1919 = vmatprep.mubr.bf16.mxu0 %v3285_v15 }
 0x11b   :  { %v1483_v24 = vpop.f32.mrf.mxu0  ;;  %2990 = vmatprep.mubr.bf16.mxu1 %v3286_v17  ;;  %v3298_v17 = vld [vmem:[%s4302_s0 + $0x208] ss:$28 sps:$4 sm:$0xff]  }
 0x11c   :  { %v3950_v23 = vadd.f32 %v1689_v22, %v1482_v21  ;;  %v1691_v25 = vpop.f32.mrf.mxu1  ;;  %v3302_v21 = vld [vmem:[%s4302_s0 + $0x210] ss:$28 sps:$4 sm:$0xff]   ;;  %v3305_v22 = vld [vmem:[%s4302_s0 + $0x244] ss:$28 sps:$4 sm:$0xff]  }
 0x11d   :  { %v1484_v26 = vpop.f32.mrf.mxu0  ;;  %v3306_v25 = vld [vmem:[%s4302_s0 + $0x248] ss:$28 sps:$4 sm:$0xff]  }
 0x11e   :  { %v1485_v27 = vadd.f32 %v3884_v29, %v1484_v26  ;;  %v1692_v28 = vpop.f32.mrf.mxu1 }
 0x11f   :  { %v1486_v32 = vpop.f32.mrf.mxu0 }
 0x120   :  { %v3965_v34 = vadd.f32 %v1692_v28, %v1485_v27  ;;  %v1694_v35 = vpop.f32.mrf.mxu1 }
 0x121   :  { %v1489_v37 = vpop.f32.mrf.mxu0  ;;  %1920 = vmatmul.mubr.bf16.gmra.mxu0 %v3283_v0 }
 0x122   :  { %v1490_v38 = vadd.f32 %v3884_v29, %v1489_v37  ;;  %v1697_v39 = vpop.f32.mrf.mxu1  ;;  %2991 = vmatmul.mubr.bf16.gmra.mxu1 %v3287_v30  ;;  %1927 = vmatprep.mubr.bf16.mxu0 %v3290_v31  ;;  %v3303_v37 = vld [vmem:[%s4302_s0 + $0x240] ss:$28 sps:$4 sm:$0xff]  }
 0x123   :  { %v1491_v40 = vpop.f32.mrf.mxu0  ;;  %2994 = vmatprep.mubr.bf16.mxu1 %v3291_v33 }
 0x124   :  { %v3968_v41 = vadd.f32 %v1697_v39, %v1490_v38  ;;  %v1699_v42 = vpop.f32.mrf.mxu1  ;;  %v3307_v40 = vld [vmem:[%s4302_s0 + $0x280] ss:$28 sps:$4 sm:$0xff]  }
 0x125   :  { %v1492_v43 = vpop.f32.mrf.mxu0  ;;  %v3310_v42 = vld [vmem:[%s4302_s0 + $0x27c] ss:$28 sps:$4 sm:$0xff]  }
 0x126   :  { %v1493_v45 = vadd.f32 %v3884_v29, %v1492_v43  ;;  %v1700_v46 = vpop.f32.mrf.mxu1 }
 0x127   :  { %v1494_v50 = vpop.f32.mrf.mxu0 }
 0x128   :  { %v3983_v52 = vadd.f32 %v1700_v46, %v1493_v45  ;;  %v1702_v53 = vpop.f32.mrf.mxu1 }
 0x129   :  { %v1497_v54 = vpop.f32.mrf.mxu0  ;;  %1928 = vmatmul.mubr.bf16.gmra.mxu0 %v3288_v44  ;;  %v3311_v44 = vld [vmem:[%s4302_s0 + $0x2b8] ss:$28 sps:$4 sm:$0xff]  }
 0x12a   :  { %v1498_v56 = vadd.f32 %v3884_v29, %v1497_v54  ;;  %v1705_v57 = vpop.f32.mrf.mxu1  ;;  %2995 = vmatmul.mubr.bf16.gmra.mxu1 %v3292_v47  ;;  %1935 = vmatprep.mubr.bf16.mxu0 %v3295_v49 }
 0x12b   :  { %v1499_v58 = vpop.f32.mrf.mxu0  ;;  %2998 = vmatprep.mubr.bf16.mxu1 %v3296_v51 }
 0x12c   :  { %v3986_v59 = vadd.f32 %v1705_v57, %v1498_v56  ;;  %v1707_v60 = vpop.f32.mrf.mxu1  ;;  %v3308_v57 = vld [vmem:[%s4302_s0 + $0x278] ss:$28 sps:$4 sm:$0xff]  }
 0x12d   :  { %v1500_v61 = vpop.f32.mrf.mxu0 }
 0x12e   :  { %v1501_v63 = vadd.f32 %v3884_v29, %v1500_v61  ;;  %v1708_v1 = vpop.f32.mrf.mxu1  ;;  %v3312_v61 = vld [vmem:[%s4302_s0 + $0x2f0] ss:$28 sps:$4 sm:$0xff]  }
 0x12f   :  { %v1502_v5 = vpop.f32.mrf.mxu0 }
 0x130   :  { %v4001_v7 = vadd.f32 %v1708_v1, %v1501_v63  ;;  %v1710_v9 = vpop.f32.mrf.mxu1  ;;  %v3316_v1 = vld [vmem:[%s4302_s0 + $0x328] ss:$28 sps:$4 sm:$0xff]  }
 0x131   :  { %v1505_v10 = vpop.f32.mrf.mxu0  ;;  %1936 = vmatmul.mubr.bf16.gmra.mxu0 %v3293_v62  ;;  %v3315_v62 = vld [vmem:[%s4302_s0 + $0x2b4] ss:$28 sps:$4 sm:$0xff]  }
 0x132   :  { %v1506_v11 = vadd.f32 %v3884_v29, %v1505_v10  ;;  %v1713_v12 = vpop.f32.mrf.mxu1  ;;  %2999 = vmatmul.mubr.bf16.gmra.mxu1 %v3297_v3  ;;  %1943 = vmatprep.mubr.bf16.mxu0 %v3300_v4 }
 0x133   :  { %v1507_v13 = vpop.f32.mrf.mxu0  ;;  %3002 = vmatprep.mubr.bf16.mxu1 %v3301_v6 }
 0x134   :  { %v4004_v14 = vadd.f32 %v1713_v12, %v1506_v11  ;;  %v1715_v15 = vpop.f32.mrf.mxu1 }
 0x135   :  { %v1508_v16 = vpop.f32.mrf.mxu0  ;;  %v3313_v15 = vld [vmem:[%s4302_s0 + $0x2b0] ss:$28 sps:$4 sm:$0xff]  }
 0x136   :  { %v1509_v19 = vadd.f32 %v3884_v29, %v1508_v16  ;;  %v1716_v20 = vpop.f32.mrf.mxu1 }
 0x137   :  { %v1510_v24 = vpop.f32.mrf.mxu0 }
 0x138   :  { %v4019_v26 = vadd.f32 %v1716_v20, %v1509_v19  ;;  %v1718_v0 = vpop.f32.mrf.mxu1  ;;  %v3317_v19 = vld [vmem:[%s4302_s0 + $0x360] ss:$28 sps:$4 sm:$0xff]   ;;  %v3320_v20 = vld [vmem:[%s4302_s0 + $0x2ec] ss:$28 sps:$4 sm:$0xff]  }
 0x139   :  { %v1513_v27 = vpop.f32.mrf.mxu0  ;;  %1944 = vmatmul.mubr.bf16.gmra.mxu0 %v3298_v17 }
 0x13a   :  { %v1514_v28 = vadd.f32 %v3884_v29, %v1513_v27  ;;  %v1721_v30 = vpop.f32.mrf.mxu1  ;;  %3003 = vmatmul.mubr.bf16.gmra.mxu1 %v3302_v21  ;;  %1951 = vmatprep.mubr.bf16.mxu0 %v3305_v22  ;;  %v3321_v22 = vld [vmem:[%s4302_s0 + $0x398] ss:$28 sps:$4 sm:$0xff]  }
 0x13b   :  { %v1515_v31 = vpop.f32.mrf.mxu0  ;;  %3006 = vmatprep.mubr.bf16.mxu1 %v3306_v25 }
 0x13c   :  { %v4022_v32 = vadd.f32 %v1721_v30, %v1514_v28  ;;  %v1723_v33 = vpop.f32.mrf.mxu1 }
 0x13d   :  { %v1516_v35 = vpop.f32.mrf.mxu0 }
 0x13e   :  { %v1517_v38 = vadd.f32 %v3884_v29, %v1516_v35  ;;  %v1724_v39 = vpop.f32.mrf.mxu1 }
 0x13f   :  { %v1518_v43 = vpop.f32.mrf.mxu0 }
 0x140   :  { %v4037_v45 = vadd.f32 %v1724_v39, %v1517_v38  ;;  %v1726_v46 = vpop.f32.mrf.mxu1 }
 0x141   :  { %v1521_v47 = vpop.f32.mrf.mxu0  ;;  %1952 = vmatmul.mubr.bf16.gmra.mxu0 %v3303_v37  ;;  %v3318_v37 = vld [vmem:[%s4302_s0 + $0x2e8] ss:$28 sps:$4 sm:$0xff]  }
 0x142   :  { %v1522_v49 = vadd.f32 %v3884_v29, %v1521_v47  ;;  %v1729_v50 = vpop.f32.mrf.mxu1  ;;  %3007 = vmatmul.mubr.bf16.gmra.mxu1 %v3307_v40  ;;  %1959 = vmatprep.mubr.bf16.mxu0 %v3310_v42  ;;  %v3322_v40 = vld [vmem:[%s4302_s0 + $0x3d0] ss:$28 sps:$4 sm:$0xff]   ;;  %v3325_v42 = vld [vmem:[%s4302_s0 + $0x324] ss:$28 sps:$4 sm:$0xff]  }
 0x143   :  { %v1523_v51 = vpop.f32.mrf.mxu0  ;;  %3010 = vmatprep.mubr.bf16.mxu1 %v3311_v44  ;;  %v3326_v44 = vld [vmem:[%s4302_s0 + $0x408] ss:$28 sps:$4 sm:$0xff]  }
 0x144   :  { %v4040_v53 = vadd.f32 %v1729_v50, %v1522_v49  ;;  %v1731_v54 = vpop.f32.mrf.mxu1 }
 0x145   :  { %v1524_v56 = vpop.f32.mrf.mxu0 }
 0x146   :  { %v1525_v58 = vadd.f32 %v3884_v29, %v1524_v56  ;;  %v1732_v60 = vpop.f32.mrf.mxu1 }
 0x147   :  { %v1526_v63 = vpop.f32.mrf.mxu0 }
 0x148   :  { %v4055_v3 = vadd.f32 %v1732_v60, %v1525_v58  ;;  %v1734_v4 = vpop.f32.mrf.mxu1  ;;  %v3323_v60 = vld [vmem:[%s4302_s0 + $0x320] ss:$28 sps:$4 sm:$0xff]  }
 0x149   :  { %v1529_v5 = vpop.f32.mrf.mxu0  ;;  %1960 = vmatmul.mubr.bf16.gmra.mxu0 %v3308_v57  ;;  %v3327_v63 = vld [vmem:[%s4302_s0 + $0x440] ss:$28 sps:$4 sm:$0xff]  }
 0x14a   :  { %v1530_v6 = vadd.f32 %v3884_v29, %v1529_v5  ;;  %v1737_v9 = vpop.f32.mrf.mxu1  ;;  %3011 = vmatmul.mubr.bf16.gmra.mxu1 %v3312_v61  ;;  %1967 = vmatprep.mubr.bf16.mxu0 %v3315_v62  ;;  %v3331_v5 = vld [vmem:[%s4302_s0 + $0x478] ss:$28 sps:$4 sm:$0xff]  }
 0x14b   :  { %v1531_v10 = vpop.f32.mrf.mxu0  ;;  %3014 = vmatprep.mubr.bf16.mxu1 %v3316_v1  ;;  %v3330_v1 = vld [vmem:[%s4302_s0 + $0x35c] ss:$28 sps:$4 sm:$0xff]  }
 0x14c   :  { %v4058_v11 = vadd.f32 %v1737_v9, %v1530_v6  ;;  %v1739_v12 = vpop.f32.mrf.mxu1 }
 0x14d   :  { %v1532_v13 = vpop.f32.mrf.mxu0 }
 0x14e   :  { %v1533_v16 = vadd.f32 %v3884_v29, %v1532_v13  ;;  %v1740_v17 = vpop.f32.mrf.mxu1 }
 0x14f   :  { %v1534_v21 = vpop.f32.mrf.mxu0 }
 0x150   :  { %v4073_v24 = vadd.f32 %v1740_v17, %v1533_v16  ;;  %v1742_v25 = vpop.f32.mrf.mxu1 }
 0x151   :  { %v1537_v0 = vpop.f32.mrf.mxu0  ;;  %1968 = vmatmul.mubr.bf16.gmra.mxu0 %v3313_v15  ;;  %v3332_v25 = vld [vmem:[%s4302_s0 + $0x4b0] ss:$0 sps:$4 sm:$0xff]  }
 0x152   :  { %v1538_v27 = vadd.f32 %v3884_v29, %v1537_v0  ;;  %v1745_v28 = vpop.f32.mrf.mxu1  ;;  %3015 = vmatmul.mubr.bf16.gmra.mxu1 %v3317_v19  ;;  %1975 = vmatprep.mubr.bf16.mxu0 %v3320_v20  ;;  %v3328_v20 = vld [vmem:[%s4302_s0 + $0x358] ss:$28 sps:$4 sm:$0xff]  }
 0x153   :  { %v1539_v30 = vpop.f32.mrf.mxu0  ;;  %3018 = vmatprep.mubr.bf16.mxu1 %v3321_v22  ;;  %v3335_v0 = vld [vmem:[%s4302_s0 + $0x394] ss:$28 sps:$4 sm:$0xff]  }
 0x154   :  { %v4076_v31 = vadd.f32 %v1745_v28, %v1538_v27  ;;  %v1747_v33 = vpop.f32.mrf.mxu1 }
 0x155   :  { %v1540_v35 = vpop.f32.mrf.mxu0 }
 0x156   :  { %v1541_v38 = vadd.f32 %v3884_v29, %v1540_v35  ;;  %v1748_v39 = vpop.f32.mrf.mxu1 }
 0x157   :  { %v1542_v43 = vpop.f32.mrf.mxu0 }
 0x158   :  { %v4091_v46 = vadd.f32 %v1748_v39, %v1541_v38  ;;  %v1750_v47 = vpop.f32.mrf.mxu1  ;;  %v3333_v43 = vld [vmem:[%s4302_s0 + $0x390] ss:$28 sps:$4 sm:$0xff]  }
 0x159   :  { %v1545_v49 = vpop.f32.mrf.mxu0  ;;  %1976 = vmatmul.mubr.bf16.gmra.mxu0 %v3318_v37 }
 0x15a   :  { %v1546_v50 = vadd.f32 %v3884_v29, %v1545_v49  ;;  %v1753_v51 = vpop.f32.mrf.mxu1  ;;  %3019 = vmatmul.mubr.bf16.gmra.mxu1 %v3322_v40  ;;  %1983 = vmatprep.mubr.bf16.mxu0 %v3325_v42 }
 0x15b   :  { %v1547_v54 = vpop.f32.mrf.mxu0  ;;  %3022 = vmatprep.mubr.bf16.mxu1 %v3326_v44 }
 0x15c   :  { %v4094_v56 = vadd.f32 %v1753_v51, %v1546_v50  ;;  %v1755_v57 = vpop.f32.mrf.mxu1 }
 0x15d   :  { %v1548_v58 = vpop.f32.mrf.mxu0 }
 0x15e   :  { %v1549_v61 = vadd.f32 %v3884_v29, %v1548_v58  ;;  %v1756_v62 = vpop.f32.mrf.mxu1 }
 0x15f   :  { %v1550_v4 = vpop.f32.mrf.mxu0 }
 0x160   :  { %v4109_v6 = vadd.f32 %v1756_v62, %v1549_v61  ;;  %v1758_v9 = vpop.f32.mrf.mxu1 }
 0x161   :  { %v1553_v10 = vpop.f32.mrf.mxu0  ;;  %1984 = vmatmul.mubr.bf16.gmra.mxu0 %v3323_v60 }
 0x162   :  { %v1554_v12 = vadd.f32 %v3884_v29, %v1553_v10  ;;  %v1761_v13 = vpop.f32.mrf.mxu1  ;;  %3023 = vmatmul.mubr.bf16.gmra.mxu1 %v3327_v63  ;;  %1991 = vmatprep.mubr.bf16.mxu0 %v3330_v1 }
 0x163   :  { %v1555_v15 = vpop.f32.mrf.mxu0  ;;  %3026 = vmatprep.mubr.bf16.mxu1 %v3331_v5 }
 0x164   :  { %v4112_v16 = vadd.f32 %v1761_v13, %v1554_v12  ;;  %v1763_v17 = vpop.f32.mrf.mxu1 }
 0x165   :  { %v1556_v19 = vpop.f32.mrf.mxu0 }
 0x166   :  { %v1557_v21 = vadd.f32 %v3884_v29, %v1556_v19  ;;  %v1764_v22 = vpop.f32.mrf.mxu1 }
 0x167   :  { %v1558_v27 = vpop.f32.mrf.mxu0 }
 0x168   :  { %v4124_v28 = vadd.f32 %v1764_v22, %v1557_v21  ;;  %v1766_v30 = vpop.f32.mrf.mxu1 }
 0x169   :  { %v1561_v33 = vpop.f32.mrf.mxu0  ;;  %1992 = vmatmul.mubr.bf16.gmra.mxu0 %v3328_v20 }
 0x16a   :  { %v1562_v35 = vadd.f32 %v3884_v29, %v1561_v33  ;;  %v1769_v37 = vpop.f32.mrf.mxu1  ;;  %3027 = vmatmul.mubr.bf16.gmra.mxu1 %v3332_v25  ;;  %1999 = vmatprep.mubr.bf16.mxu0 %v3335_v0 }
 0x16b   :  { %v1563_v38 = vpop.f32.mrf.mxu0 }
 0x16c   :  { %v4127_v39 = vadd.f32 %v1769_v37, %v1562_v35  ;;  %v1771_v40 = vpop.f32.mrf.mxu1 }
 0x16d   :  { %v1564_v42 = vpop.f32.mrf.mxu0 }
 0x16e   :  { %v1565_v44 = vadd.f32 %v3884_v29, %v1564_v42  ;;  %v1772_v47 = vpop.f32.mrf.mxu1 }
 0x16f   :  { %v1566_v49 = vpop.f32.mrf.mxu0 }
 0x170   :  { %v4133_v50 = vadd.f32 %v1772_v47, %v1565_v44  ;;  %v1774_v51 = vpop.f32.mrf.mxu1 }
 0x171   :  { %v1569_v54 = vpop.f32.mrf.mxu0  ;;  %2000 = vmatmul.mubr.bf16.gmra.mxu0 %v3333_v43 }
 0x172   :  { %v1570_v57 = vadd.f32 %v3884_v29, %v1569_v54  ;;  %v1777_v58 = vpop.f32.mrf.mxu1 }
 0x173   :  { %v1571_v60 = vpop.f32.mrf.mxu0 }
 0x174   :  { %v4136_v61 = vadd.f32 %v1777_v58, %v1570_v57  ;;  %v1779_v62 = vpop.f32.mrf.mxu1 }
 0x175   :  { %v1572_v63 = vpop.f32.mrf.mxu0 }
 0x176   :  { %v1573_v1 = vadd.f32 %v3884_v29, %v1572_v63  ;;  %v1780_v4 = vpop.f32.mrf.mxu1 }
 0x177   :  { %v1574_v5 = vpop.f32.mrf.mxu0 }
 0x178   :  { %v4139_v9 = vadd.f32 %v1780_v4, %v1573_v1  ;;  %v1782_v10 = vpop.f32.mrf.mxu1 }
 0x179   :  { %v1577_v12 = vpop.f32.mrf.mxu0 }
 0x17a   :  { %v1578_v13 = vadd.f32 %v3884_v29, %v1577_v12  ;;  %v1785_v15 = vpop.f32.mrf.mxu1 }
 0x17b   :  { %v1579_v17 = vpop.f32.mrf.mxu0 }
 0x17c   :  { %v4142_v19 = vadd.f32 %v1785_v15, %v1578_v13  ;;  %v1787_v20 = vpop.f32.mrf.mxu1 }
 0x17d   :  { %v1580_v21 = vpop.f32.mrf.mxu0 }
 0x17e   :  { %4305 = vst [vmem:[#allocation2_spill] sm:$0xff] %v4142_v19  ;;  %v1581_v22 = vadd.f32 %v3884_v29, %v1580_v21  ;;  %v1788_v25 = vpop.f32.mrf.mxu1 }
 0x17f   :  { %v1582_v0 = vpop.f32.mrf.mxu0 }
 0x180   :  { %v4145_v27 = vadd.f32 %v1788_v25, %v1581_v22  ;;  %v1790_v30 = vpop.f32.mrf.mxu1 }
 0x181   :  { %v1585_v33 = vpop.f32.mrf.mxu0 }
 0x182   :  { %4306 = vst [vmem:[#allocation3_spill] sm:$0xff] %v4145_v27  ;;  %v1586_v35 = vadd.f32 %v3884_v29, %v1585_v33  ;;  %v1793_v37 = vpop.f32.mrf.mxu1 }
 0x183   :  { %v1587_v38 = vpop.f32.mrf.mxu0 }
 0x184   :  { %v4148_v40 = vadd.f32 %v1793_v37, %v1586_v35  ;;  %v1795_v42 = vpop.f32.mrf.mxu1 }
 0x185   :  { %v1588_v43 = vpop.f32.mrf.mxu0 }
 0x186   :  { %4307 = vst [vmem:[#allocation4_spill] sm:$0xff] %v4148_v40  ;;  %v1589_v44 = vadd.f32 %v3884_v29, %v1588_v43  ;;  %v1796_v47 = vpop.f32.mrf.mxu1 }
 0x187   :  { %v1590_v49 = vpop.f32.mrf.mxu0 }
 0x188   :  { %v4151_v51 = vadd.f32 %v1796_v47, %v1589_v44  ;;  %v1798_v54 = vpop.f32.mrf.mxu1 }
 0x189   :  { %v1593_v57 = vpop.f32.mrf.mxu0 }
 0x18a   :  { %4308 = vst [vmem:[#allocation5_spill] sm:$0xff] %v4151_v51  ;;  %v1594_v58 = vadd.f32 %v3884_v29, %v1593_v57  ;;  %v1801_v60 = vpop.f32.mrf.mxu1 }
 0x18b   :  { %v1595_v62 = vpop.f32.mrf.mxu0 }
 0x18c   :  { %v1802_v63 = vadd.f32 %v1801_v60, %v1594_v58  ;;  %v1803_v1 = vpop.f32.mrf.mxu1 }
 0x18d   :  { %v1596_v4 = vpop.f32.mrf.mxu0 }
 0x18e   :  { %v1597_v5 = vadd.f32 %v3884_v29, %v1596_v4  ;;  %v1804_v10 = vpop.f32.mrf.mxu1 }
 0x18f   :  { %v1598_v12 = vpop.f32.mrf.mxu0 }
 0x190   :  { %v1805_v13 = vadd.f32 %v1804_v10, %v1597_v5  ;;  %v1806_v15 = vpop.f32.mrf.mxu1 }
 0x191   :  { %v1601_v17 = vpop.f32.mrf.mxu0 }
 0x192   :  { %v1602_v20 = vadd.f32 %v3884_v29, %v1601_v17  ;;  %v1809_v21 = vpop.f32.mrf.mxu1 }
 0x193   :  { %v1603_v22 = vpop.f32.mrf.mxu0 }
 0x194   :  { %v1810_v25 = vadd.f32 %v1809_v21, %v1602_v20  ;;  %v1811_v0 = vpop.f32.mrf.mxu1 }
 0x195   :  { %v1604_v30 = vpop.f32.mrf.mxu0 }
 0x196   :  { %v1605_v33 = vadd.f32 %v3884_v29, %v1604_v30  ;;  %v1812_v35 = vpop.f32.mrf.mxu1 }
 0x197   :  { %v1606_v37 = vpop.f32.mrf.mxu0 }
 0x198   :  { %v1813_v38 = vadd.f32 %v1812_v35, %v1605_v33  ;;  %v1814_v42 = vpop.f32.mrf.mxu1 }
 0x199   :  { %v1609_v43 = vpop.f32.mrf.mxu0 }
 0x19a   :  { %v1610_v44 = vadd.f32 %v3884_v29, %v1609_v43  ;;  %v1817_v47 = vpop.f32.mrf.mxu1 }
 0x19b   :  { %v1611_v49 = vpop.f32.mrf.mxu0 }
 0x19c   :  { %v1818_v54 = vadd.f32 %v1817_v47, %v1610_v44  ;;  %v1819_v57 = vpop.f32.mrf.mxu1 }
 0x19d   :  { %v1612_v58 = vpop.f32.mrf.mxu0 }
 0x19e   :  { %v1613_v60 = vadd.f32 %v3884_v29, %v1612_v58  ;;  %v1820_v62 = vpop.f32.mrf.mxu1 }
 0x19f   :  { %v1614_v1 = vpop.f32.mrf.mxu0 }
 0x1a0   :  { %v1821_v4 = vadd.f32 %v1820_v62, %v1613_v60  ;;  %v1822_v5 = vpop.f32.mrf.mxu1 }
 0x1a1   :  { %v1617_v10 = vpop.f32.mrf.mxu0 }
 0x1a2   :  { %v1618_v12 = vadd.f32 %v3884_v29, %v1617_v10  ;;  %v1825_v15 = vpop.f32.mrf.mxu1 }
 0x1a3   :  { %v1619_v17 = vpop.f32.mrf.mxu0 }
 0x1a4   :  { %v1826_v20 = vadd.f32 %v1825_v15, %v1618_v12  ;;  %v1827_v21 = vpop.f32.mrf.mxu1 }
 0x1a5   :  { %v1620_v22 = vpop.f32.mrf.mxu0 }
 0x1a6   :  { %v1621_v0 = vadd.f32 %v3884_v29, %v1620_v22  ;;  %v1828_v30 = vpop.f32.mrf.mxu1 }
 0x1a7   :  { %v1622_v33 = vpop.f32.mrf.mxu0 }
 0x1a8   :  { %v1829_v35 = vadd.f32 %v1828_v30, %v1621_v0  ;;  %v1830_v37 = vpop.f32.mrf.mxu1 }
 0x1a9   :  { %v1625_v42 = vpop.f32.mrf.mxu0 }
 0x1aa   :  { %v1626_v43 = vadd.f32 %v3884_v29, %v1625_v42  ;;  %v1833_v44 = vpop.f32.mrf.mxu1 }
 0x1ab   :  { %v1627_v47 = vpop.f32.mrf.mxu0 }
 0x1ac   :  { %v1834_v49 = vadd.f32 %v1833_v44, %v1626_v43  ;;  %v1835_v57 = vpop.f32.mrf.mxu1 }
 0x1ad   :  { %v1628_v58 = vpop.f32.mrf.mxu0 }
 0x1ae   :  { %v1836_v60 = vpop.f32.mrf.mxu1 }
 0x1af   :  { %v1629_v62 = vpop.f32.mrf.mxu0 }
 0x1b0   :  { %v1837_v1 = vpop.f32.mrf.mxu1 }
 0x1b1   :  { %v1873_v5 = vpop.f32.mrf.mxu0 }
 0x1b2   :  { %v2009_v10 = vpop.f32.mrf.mxu1 }
 0x1b3   :  { %v4162_v12 = vadd.f32 %v2009_v10, %v1802_v63  ;;  %v1875_v15 = vpop.f32.mrf.mxu0 }
 0x1b4   :  { %v2011_v17 = vpop.f32.mrf.mxu1 }
 0x1b5   :  { %v1876_v21 = vpop.f32.mrf.mxu0 }
 0x1b6   :  { %v2012_v22 = vpop.f32.mrf.mxu1 }
 0x1b7   :  { %v4164_v0 = vadd.f32 %v2012_v22, %v1805_v13  ;;  %v1878_v30 = vpop.f32.mrf.mxu0 }
 0x1b8   :  { %v2014_v29 = vpop.f32.mrf.mxu1 }
 0x1b9   :  { %v1881_v33 = vpop.f32.mrf.mxu0 }
 0x1ba   :  { %v2017_v37 = vpop.f32.mrf.mxu1 }
 0x1bb   :  { %v4166_v42 = vadd.f32 %v2017_v37, %v1810_v25  ;;  %v1883_v43 = vpop.f32.mrf.mxu0 }
 0x1bc   :  { %v2019_v44 = vpop.f32.mrf.mxu1 }
 0x1bd   :  { %v1884_v47 = vpop.f32.mrf.mxu0 }
 0x1be   :  { %v2020_v57 = vpop.f32.mrf.mxu1 }
 0x1bf   :  { %v4168_v58 = vadd.f32 %v2020_v57, %v1813_v38  ;;  %v1886_v63 = vpop.f32.mrf.mxu0 }
 0x1c0   :  { %v2022_v60 = vpop.f32.mrf.mxu1 }
 0x1c1   :  { %4309 = vst [vmem:[#allocation6_spill] sm:$0xff] %v4168_v58  ;;  %v1889_v62 = vpop.f32.mrf.mxu0 }
 0x1c2   :  { %v2025_v1 = vpop.f32.mrf.mxu1 }
 0x1c3   :  { %v4170_v10 = vadd.f32 %v2025_v1, %v1818_v54  ;;  %v1891_v13 = vpop.f32.mrf.mxu0 }
 0x1c4   :  { %v2027_v15 = vpop.f32.mrf.mxu1 }
 0x1c5   :  { %v1892_v17 = vpop.f32.mrf.mxu0 }
 0x1c6   :  { %v2028_v22 = vpop.f32.mrf.mxu1 }
 0x1c7   :  { %v4172_v30 = vadd.f32 %v2028_v22, %v1821_v4  ;;  %v1894_v25 = vpop.f32.mrf.mxu0 }
 0x1c8   :  { %v2030_v29 = vpop.f32.mrf.mxu1 }
 0x1c9   :  { %v1897_v37 = vpop.f32.mrf.mxu0 }
 0x1ca   :  { %v2033_v43 = vpop.f32.mrf.mxu1 }
 0x1cb   :  { %v4174_v44 = vadd.f32 %v2033_v43, %v1826_v20  ;;  %v1899_v38 = vpop.f32.mrf.mxu0 }
 0x1cc   :  { %v2035_v57 = vpop.f32.mrf.mxu1  ;;  %v1882_v38 = vadd.f32 %v1881_v33, %v3917_v55  ;;  %v1898_v33 = vadd.f32 %v1897_v37, %v3950_v23 }
 0x1cd   :  { %4310 = vst [vmem:[#allocation7_spill] sm:$0xff] %v4174_v44  ;;  %v1900_v63 = vpop.f32.mrf.mxu0 }
 0x1ce   :  { %v2036_v60 = vpop.f32.mrf.mxu1 }
 0x1cf   :  { %v4176_v51 = vadd.f32 %v2036_v60, %v1829_v35  ;;  %v1902_v54 = vpop.f32.mrf.mxu0  ;;  %v1874_v35 = vadd.f32 %v1873_v5, %v3893_v36  ;;  %v1885_v60 = vadd.f32 %v1884_v47, %v3929_v2 }
 0x1d0   :  { %v2038_v1 = vpop.f32.mrf.mxu1 }
 0x1d1   :  { %4311 = vst [vmem:[#allocation8_spill] sm:$0xff] %v4176_v51  ;;  %v1905_v13 = vpop.f32.mrf.mxu0 }
 0x1d2   :  { %v2041_v15 = vpop.f32.mrf.mxu1 }
 0x1d3   :  { %v4178_v40 = vadd.f32 %v2041_v15, %v1834_v49  ;;  %v1907_v4 = vpop.f32.mrf.mxu0  ;;  %v1877_v15 = vadd.f32 %v1876_v21, %v3911_v48  ;;  %v1901_v48 = vadd.f32 %v1900_v63, %v3965_v34 }
 0x1d4   :  { %v2043_v22 = vpop.f32.mrf.mxu1 }
 0x1d5   :  { %4312 = vst [vmem:[#allocation9_spill] sm:$0xff] %v4178_v40  ;;  %v1908_v25 = vpop.f32.mrf.mxu0 }
 0x1d6   :  { %v2044_v29 = vpop.f32.mrf.mxu1 }
 0x1d7   :  { %v1910_v27 = vpop.f32.mrf.mxu0 }
 0x1d8   :  { %v2045_v19 = vpop.f32.mrf.mxu1 }
 0x1d9   :  { %v1913_v20 = vpop.f32.mrf.mxu0 }
 0x1da   :  { %v2988_v43 = vpop.f32.mrf.mxu1 }
 0x1db   :  { %v1915_v57 = vpop.f32.mrf.mxu0  ;;  %v2090_v54 = vadd.f32 %v2988_v43, %v1882_v38  ;;  %v1890_v43 = vadd.f32 %v1889_v62, %v3932_v8 }
 0x1dc   :  { %v2081_v44 = vpop.f32.mrf.mxu1 }
 0x1dd   :  { %v1916_v1 = vpop.f32.mrf.mxu0  ;;  %v2082_v4 = vadd.f32 %v2081_v44, %v1874_v35  ;;  %v2257_v19 = vmax.f32 %v2090_v54, 0.0 }
 0x1de   :  { %v2989_v49 = vpop.f32.mrf.mxu1 }
 0x1df   :  { %v2093_v22 = vadd.f32 %v2989_v49, %v1885_v60  ;;  %v1918_v29 = vpop.f32.mrf.mxu0  ;;  %v2255_v57 = vmax.f32 %v2082_v4, 0.0  ;;  %v1893_v60 = vadd.f32 %v1892_v17, %v3947_v18  ;;  %v1914_v49 = vadd.f32 %v1913_v20, %v3986_v59 }
 0x1e0   :  { %v2084_v27 = vpop.f32.mrf.mxu1  ;;  %v1906_v17 = vadd.f32 %v1905_v13, %v3968_v41 }
 0x1e1   :  { %v2258_v51 = vmax.f32 %v2093_v22, 0.0  ;;  %v2085_v40 = vadd.f32 %v2084_v27, %v1877_v15  ;;  %v1921_v58 = vpop.f32.mrf.mxu0  ;;  %v1917_v27 = vadd.f32 %v1916_v1, %v4001_v7 }
 0x1e2   :  { %v2992_v55 = vpop.f32.mrf.mxu1 }
 0x1e3   :  { %v2823_v36 = vpack.c.bf16 %v2258_v51, %v2257_v19  ;;  %v2256_v5 = vmax.f32 %v2085_v40, 0.0  ;;  %v1923_v2 = vpop.f32.mrf.mxu0  ;;  %v2106_v44 = vadd.f32 %v2992_v55, %v1898_v33 }
 0x1e4   :  { %v2097_v47 = vpop.f32.mrf.mxu1 }
 0x1e5   :  { %2920 = vst [vmem:[%s4304_s3 + $0x8] sm:$0xff] %v2823_v36   ;;  %v2818_v21 = vpack.c.bf16 %v2256_v5, %v2255_v57  ;;  %v1924_v38 = vpop.f32.mrf.mxu0  ;;  %v2098_v23 = vadd.f32 %v2097_v47, %v1890_v43  ;;  %v2261_v62 = vmax.f32 %v2106_v44, 0.0  ;;  %v1909_v36 = vadd.f32 %v1908_v25, %v3983_v52 }
 0x1e6   :  { %v2993_v35 = vpop.f32.mrf.mxu1  ;;  %v1922_v25 = vadd.f32 %v1921_v58, %v4004_v14 }
 0x1e7   :  { %2819 = vst [vmem:[%s4304_s3] sm:$0xff] %v2818_v21   ;;  %v2109_v40 = vadd.f32 %v2993_v35, %v1901_v48  ;;  %v1926_v51 = vpop.f32.mrf.mxu0  ;;  %v2259_v15 = vmax.f32 %v2098_v23, 0.0 }
 0x1e8   :  { %v2100_v8 = vpop.f32.mrf.mxu1 }
 0x1e9   :  { %v2262_v34 = vmax.f32 %v2109_v40, 0.0  ;;  %v2101_v37 = vadd.f32 %v2100_v8, %v1893_v60  ;;  %v1929_v63 = vpop.f32.mrf.mxu0 }
 0x1ea   :  { %v2996_v54 = vpop.f32.mrf.mxu1  ;;  %v1930_v43 = vadd.f32 %v1929_v63, %v4022_v32 }
 0x1eb   :  { %v2833_v4 = vpack.c.bf16 %v2262_v34, %v2261_v62  ;;  %v2260_v22 = vmax.f32 %v2101_v37, 0.0  ;;  %v1931_v29 = vpop.f32.mrf.mxu0  ;;  %v2122_v55 = vadd.f32 %v2996_v54, %v1914_v49  ;;  %v1925_v62 = vadd.f32 %v1924_v38, %v4019_v26 }
 0x1ec   :  { %v2113_v18 = vpop.f32.mrf.mxu1 }
 0x1ed   :  { %2922 = vst [vmem:[%s4304_s3 + $0x18] sm:$0xff] %v2833_v4   ;;  %v2828_v19 = vpack.c.bf16 %v2260_v22, %v2259_v15  ;;  %v1932_v33 = vpop.f32.mrf.mxu0  ;;  %v2114_v59 = vadd.f32 %v2113_v18, %v1906_v17  ;;  %v2265_v13 = vmax.f32 %v2122_v55, 0.0 }
 0x1ee   :  { %v2997_v57 = vpop.f32.mrf.mxu1  ;;  %v1933_v60 = vadd.f32 %v1932_v33, %v4037_v45 }
 0x1ef   :  { %2921 = vst [vmem:[%s4304_s3 + $0x10] sm:$0xff] %v2828_v19   ;;  %v2125_v20 = vadd.f32 %v2997_v57, %v1917_v27  ;;  %v1934_v5 = vpop.f32.mrf.mxu0  ;;  %v2263_v48 = vmax.f32 %v2114_v59, 0.0 }
 0x1f0   :  { %v2116_v41 = vpop.f32.mrf.mxu1 }
 0x1f1   :  { %v2266_v7 = vmax.f32 %v2125_v20, 0.0  ;;  %v2117_v1 = vadd.f32 %v2116_v41, %v1909_v36  ;;  %v1937_v2 = vpop.f32.mrf.mxu0 }
 0x1f2   :  { %v3000_v47 = vpop.f32.mrf.mxu1  ;;  %v1938_v38 = vadd.f32 %v1937_v2, %v4040_v53 }
 0x1f3   :  { %v2843_v21 = vpack.c.bf16 %v2266_v7, %v2265_v13  ;;  %v2264_v44 = vmax.f32 %v2117_v1, 0.0  ;;  %v1939_v35 = vpop.f32.mrf.mxu0  ;;  %v2138_v40 = vadd.f32 %v3000_v47, %v1930_v43 }
 0x1f4   :  { %v2129_v52 = vpop.f32.mrf.mxu1 }
 0x1f5   :  { %2924 = vst [vmem:[%s4304_s3 + $0x28] sm:$0xff] %v2843_v21   ;;  %v2838_v23 = vpack.c.bf16 %v2264_v44, %v2263_v48  ;;  %v1940_v51 = vpop.f32.mrf.mxu0  ;;  %v2130_v32 = vadd.f32 %v2129_v52, %v1922_v25  ;;  %v2269_v58 = vmax.f32 %v2138_v40, 0.0 }
 0x1f6   :  { %v3001_v8 = vpop.f32.mrf.mxu1 }
 0x1f7   :  { %2923 = vst [vmem:[%s4304_s3 + $0x20] sm:$0xff] %v2838_v23   ;;  %v2141_v34 = vadd.f32 %v3001_v8, %v1933_v60  ;;  %v1942_v37 = vpop.f32.mrf.mxu0  ;;  %v2267_v4 = vmax.f32 %v2130_v32, 0.0 }
 0x1f8   :  { %v2132_v14 = vpop.f32.mrf.mxu1 }
 0x1f9   :  { %v2270_v45 = vmax.f32 %v2141_v34, 0.0  ;;  %v2133_v63 = vadd.f32 %v2132_v14, %v1925_v62  ;;  %v1945_v54 = vpop.f32.mrf.mxu0 }
 0x1fa   :  { %v1946_v49 = vadd.f32 %v1945_v54, %v4058_v11  ;;  %v3004_v15 = vpop.f32.mrf.mxu1  ;;  %v1941_v11 = vadd.f32 %v1940_v51, %v4055_v3 }
 0x1fb   :  { %v2853_v22 = vpack.c.bf16 %v2270_v45, %v2269_v58  ;;  %v2268_v29 = vmax.f32 %v2133_v63, 0.0  ;;  %v1947_v18 = vpop.f32.mrf.mxu0 }
 0x1fc   :  { %v2145_v26 = vpop.f32.mrf.mxu1  ;;  %v2154_v19 = vadd.f32 %v3004_v15, %v1946_v49 }
 0x1fd   :  { %2926 = vst [vmem:[%s4304_s3 + $0x38] sm:$0xff] %v2853_v22   ;;  %v2848_v17 = vpack.c.bf16 %v2268_v29, %v2267_v4  ;;  %v1948_v27 = vpop.f32.mrf.mxu0  ;;  %v2146_v57 = vadd.f32 %v2145_v26, %v1938_v38 }
 0x1fe   :  { %v1949_v55 = vadd.f32 %v1948_v27, %v4073_v24  ;;  %v3005_v33 = vpop.f32.mrf.mxu1  ;;  %v2273_v41 = vmax.f32 %v2154_v19, 0.0 }
 0x1ff   :  { %2925 = vst [vmem:[%s4304_s3 + $0x30] sm:$0xff] %v2848_v17   ;;  %v1950_v36 = vpop.f32.mrf.mxu0  ;;  %v2271_v1 = vmax.f32 %v2146_v57, 0.0 }
 0x200   :  { %v2157_v59 = vadd.f32 %v3005_v33, %v1949_v55  ;;  %v2148_v53 = vpop.f32.mrf.mxu1 }
 0x201   :  { %v2149_v20 = vadd.f32 %v2148_v53, %v1941_v11  ;;  %v1953_v5 = vpop.f32.mrf.mxu0 }
 0x202   :  { %v2274_v13 = vmax.f32 %v2157_v59, 0.0  ;;  %v3008_v7 = vpop.f32.mrf.mxu1  ;;  %v1954_v24 = vadd.f32 %v1953_v5, %v4076_v31 }
 0x203   :  { %v2272_v2 = vmax.f32 %v2149_v20, 0.0  ;;  %v1955_v47 = vpop.f32.mrf.mxu0 }
 0x204   :  { %v2863_v43 = vpack.c.bf16 %v2274_v13, %v2273_v41  ;;  %v2161_v3 = vpop.f32.mrf.mxu1 }
 0x205   :  { %v2858_v48 = vpack.c.bf16 %v2272_v2, %v2271_v1  ;;  %v1956_v21 = vpop.f32.mrf.mxu0  ;;  %v2162_v52 = vadd.f32 %v2161_v3, %v1954_v24 }
 0x206   :  { %2928 = vst [vmem:[%s4304_s3 + $0x48] sm:$0xff] %v2863_v43   ;;  %v1957_v44 = vadd.f32 %v1956_v21, %v4091_v46  ;;  %v3009_v35 = vpop.f32.mrf.mxu1 }
 0x207   :  { %2927 = vst [vmem:[%s4304_s3 + $0x40] sm:$0xff] %v2858_v48   ;;  %v1958_v25 = vpop.f32.mrf.mxu0  ;;  %v2275_v8 = vmax.f32 %v2162_v52, 0.0 }
 0x208   :  { %v2164_v60 = vpop.f32.mrf.mxu1 }
 0x209   :  { %v2165_v31 = vadd.f32 %v2164_v60, %v1957_v44  ;;  %v1961_v23 = vpop.f32.mrf.mxu0 }
 0x20a   :  { %v1962_v40 = vadd.f32 %v1961_v23, %v4094_v56  ;;  %v3012_v51 = vpop.f32.mrf.mxu1 }
 0x20b   :  { %v2276_v62 = vmax.f32 %v2165_v31, 0.0  ;;  %v1963_v32 = vpop.f32.mrf.mxu0 }
 0x20c   :  { %v2177_v34 = vpop.f32.mrf.mxu1  ;;  %v2170_v46 = vadd.f32 %v3008_v7, %v1962_v40 }
 0x20d   :  { %v2868_v37 = vpack.c.bf16 %v2276_v62, %v2275_v8  ;;  %v1964_v14 = vpop.f32.mrf.mxu0 }
 0x20e   :  { %v1965_v58 = vadd.f32 %v1964_v14, %v4109_v6  ;;  %v3013_v45 = vpop.f32.mrf.mxu1  ;;  %v2277_v56 = vmax.f32 %v2170_v46, 0.0 }
 0x20f   :  { %2929 = vst [vmem:[%s4304_s3 + $0x50] sm:$0xff] %v2868_v37   ;;  %v1966_v63 = vpop.f32.mrf.mxu0 }
 0x210   :  { %v2173_v54 = vadd.f32 %v3009_v35, %v1965_v58  ;;  %v2180_v49 = vpop.f32.mrf.mxu1  ;;  %v4313_v58 = vld [vmem:[#allocation6_spill] sm:$0xff] }
 0x211   :  { %v1969_v15 = vpop.f32.mrf.mxu0 }
 0x212   :  { %v2278_v4 = vmax.f32 %v2173_v54, 0.0  ;;  %v1970_v22 = vadd.f32 %v1969_v15, %v4112_v16  ;;  %v4238_v29 = vpop.f32.mrf.mxu1 }
 0x213   :  { %v1971_v18 = vpop.f32.mrf.mxu0 }
 0x214   :  { %v2873_v26 = vpack.c.bf16 %v2278_v4, %v2277_v56  ;;  %v2193_v38 = vpop.f32.mrf.mxu1  ;;  %v2178_v6 = vadd.f32 %v2177_v34, %v1970_v22  ;;  %v4315_v18 = vld [vmem:[#allocation9_spill] sm:$0xff] }
 0x215   :  { %v1972_v17 = vpop.f32.mrf.mxu0 }
 0x216   :  { %2930 = vst [vmem:[%s4304_s3 + $0x58] sm:$0xff] %v2873_v26   ;;  %v1973_v27 = vadd.f32 %v1972_v17, %v4124_v28  ;;  %v4244_v19 = vpop.f32.mrf.mxu1  ;;  %v2279_v16 = vmax.f32 %v2178_v6, 0.0 }
 0x217   :  { %v1974_v55 = vpop.f32.mrf.mxu0 }
 0x218   :  { %v2181_v33 = vadd.f32 %v2180_v49, %v1973_v27  ;;  %v2196_v11 = vpop.f32.mrf.mxu1  ;;  %v4314_v49 = vld [vmem:[#allocation2_spill] sm:$0xff] }
 0x219   :  { %v1977_v57 = vpop.f32.mrf.mxu0 }
 0x21a   :  { %v2280_v36 = vmax.f32 %v2181_v33, 0.0  ;;  %v1978_v59 = vadd.f32 %v1977_v57, %v4127_v39  ;;  %v3020_v53 = vpop.f32.mrf.mxu1  ;;  %v4316_v33 = vld [vmem:[#allocation3_spill] sm:$0xff] }
 0x21b   :  { %v1979_v20 = vpop.f32.mrf.mxu0  ;;  %v2218_v13 = vadd.f32 %v3020_v53, %v4162_v12 }
 0x21c   :  { %v2878_v5 = vpack.c.bf16 %v2280_v36, %v2279_v16  ;;  %v4247_v41 = vpop.f32.mrf.mxu1  ;;  %v2186_v28 = vadd.f32 %v3012_v51, %v1978_v59  ;;  %v4317_v36 = vld [vmem:[#allocation7_spill] sm:$0xff] }
 0x21d   :  { %v1980_v7 = vpop.f32.mrf.mxu0  ;;  %v2289_v3 = vmax.f32 %v2218_v13, 0.0  ;;  %v4318_v13 = vld [vmem:[#allocation8_spill] sm:$0xff] }
 0x21e   :  { %2931 = vst [vmem:[%s4304_s3 + $0x60] sm:$0xff] %v2878_v5   ;;  %v1981_v1 = vadd.f32 %v1980_v7, %v4133_v50  ;;  %v3021_v2 = vpop.f32.mrf.mxu1  ;;  %v2281_v44 = vmax.f32 %v2186_v28, 0.0 }
 0x21f   :  { %v2221_v24 = vadd.f32 %v3021_v2, %v4164_v0  ;;  %v1982_v47 = vpop.f32.mrf.mxu0  ;;  %v4319_v2 = vld [vmem:[#allocation4_spill] sm:$0xff] }
 0x220   :  { %v2189_v39 = vadd.f32 %v3013_v45, %v1981_v1  ;;  %v4255_v43 = vpop.f32.mrf.mxu1 }
 0x221   :  { %v2290_v48 = vmax.f32 %v2221_v24, 0.0  ;;  %v1985_v21 = vpop.f32.mrf.mxu0 }
 0x222   :  { %v2282_v12 = vmax.f32 %v2189_v39, 0.0  ;;  %v1986_v35 = vadd.f32 %v1985_v21, %v4136_v61  ;;  %v3024_v52 = vpop.f32.mrf.mxu1 }
 0x223   :  { %v2903_v25 = vpack.c.bf16 %v2290_v48, %v2289_v3  ;;  %v1987_v60 = vpop.f32.mrf.mxu0  ;;  %v2234_v50 = vadd.f32 %v3024_v52, %v4170_v10 }
 0x224   :  { %v2883_v31 = vpack.c.bf16 %v2282_v12, %v2281_v44  ;;  %v2225_v23 = vpop.f32.mrf.mxu1  ;;  %v2194_v40 = vadd.f32 %v2193_v38, %v1986_v35  ;;  %v4320_v12 = vld [vmem:[#allocation5_spill] sm:$0xff] }
 0x225   :  { %2936 = vst [vmem:[%s4304_s3 + $0x88] sm:$0xff] %v2903_v25   ;;  %v1988_v0 = vpop.f32.mrf.mxu0  ;;  %v2226_v8 = vadd.f32 %v2225_v23, %v4166_v42  ;;  %v2293_v14 = vmax.f32 %v2234_v50, 0.0 }
 0x226   :  { %2932 = vst [vmem:[%s4304_s3 + $0x68] sm:$0xff] %v2883_v31   ;;  %v1989_v51 = vadd.f32 %v1988_v0, %v4139_v9  ;;  %v3025_v61 = vpop.f32.mrf.mxu1  ;;  %v2283_v63 = vmax.f32 %v2194_v40, 0.0 }
 0x227   :  { %v2237_v62 = vadd.f32 %v3025_v61, %v4172_v30  ;;  %v1990_v32 = vpop.f32.mrf.mxu0  ;;  %v2291_v4 = vmax.f32 %v2226_v8, 0.0 }
 0x228   :  { %v2197_v34 = vadd.f32 %v2196_v11, %v1989_v51  ;;  %v2228_v37 = vpop.f32.mrf.mxu1 }
 0x229   :  { %v2294_v46 = vmax.f32 %v2237_v62, 0.0  ;;  %v2229_v10 = vadd.f32 %v2228_v37, %v4313_v58  ;;  %v1993_v45 = vpop.f32.mrf.mxu0 }
 0x22a   :  { %v2284_v54 = vmax.f32 %v2197_v34, 0.0  ;;  %v1994_v15 = vadd.f32 %v1993_v45, %v4314_v49  ;;  %v3028_v56 = vpop.f32.mrf.mxu1 }
 0x22b   :  { %v2913_v9 = vpack.c.bf16 %v2294_v46, %v2293_v14  ;;  %v2292_v22 = vmax.f32 %v2229_v10, 0.0  ;;  %v2250_v42 = vadd.f32 %v3028_v56, %v4315_v18  ;;  %v1995_v26 = vpop.f32.mrf.mxu0 }
 0x22c   :  { %v2888_v30 = vpack.c.bf16 %v2284_v54, %v2283_v63  ;;  %v2241_v38 = vpop.f32.mrf.mxu1  ;;  %v2202_v55 = vadd.f32 %v4238_v29, %v1994_v15 }
 0x22d   :  { %2938 = vst [vmem:[%s4304_s3 + $0x98] sm:$0xff] %v2913_v9   ;;  %v2908_v17 = vpack.c.bf16 %v2292_v22, %v2291_v4  ;;  %v2297_v6 = vmax.f32 %v2250_v42, 0.0  ;;  %v1996_v27 = vpop.f32.mrf.mxu0  ;;  %v2242_v59 = vadd.f32 %v2241_v38, %v4317_v36 }
 0x22e   :  { %2933 = vst [vmem:[%s4304_s3 + $0x70] sm:$0xff] %v2888_v30   ;;  %v1997_v11 = vadd.f32 %v1996_v27, %v4316_v33  ;;  %v3029_v57 = vpop.f32.mrf.mxu1  ;;  %v2285_v28 = vmax.f32 %v2202_v55, 0.0 }
 0x22f   :  { %2937 = vst [vmem:[%s4304_s3 + $0x90] sm:$0xff] %v2908_v17   ;;  %v2814_v16 = vpack.c.bf16 %v2297_v6, %v2297_v6  ;;  %v1998_v53 = vpop.f32.mrf.mxu0  ;;  %v2295_v47 = vmax.f32 %v2242_v59, 0.0 }
 0x230   :  { %v2205_v20 = vadd.f32 %v4244_v19, %v1997_v11  ;;  %v2244_v5 = vpop.f32.mrf.mxu1 }
 0x231   :  { %2513 = vst [vmem:[%s4304_s3 + $0xa8] sm:$0xf] %v2814_v16  ;;  %v2245_v29 = vadd.f32 %v2244_v5, %v4318_v13  ;;  %v2001_v7 = vpop.f32.mrf.mxu0 }
 0x232   :  { %v2286_v1 = vmax.f32 %v2205_v20, 0.0  ;;  %v2002_v24 = vadd.f32 %v2001_v7, %v4319_v2 }
 0x233   :  { %v2296_v39 = vmax.f32 %v2245_v29, 0.0  ;;  %v2003_v3 = vpop.f32.mrf.mxu0 }
 0x234   :  { %v2893_v48 = vpack.c.bf16 %v2286_v1, %v2285_v28  ;;  %v2210_v19 = vadd.f32 %v4247_v41, %v2002_v24 }
 0x235   :  { %v2918_v21 = vpack.c.bf16 %v2296_v39, %v2295_v47  ;;  %v2004_v44 = vpop.f32.mrf.mxu0 }
 0x236   :  { %2934 = vst [vmem:[%s4304_s3 + $0x78] sm:$0xff] %v2893_v48   ;;  %v2005_v35 = vadd.f32 %v2004_v44, %v4320_v12  ;;  %v2287_v60 = vmax.f32 %v2210_v19, 0.0 }
 0x237   :  { %2939 = vst [vmem:[%s4304_s3 + $0xa0] sm:$0xff] %v2918_v21   ;;  %v2006_v52 = vpop.f32.mrf.mxu0 }
 0x238   :  { %v2213_v25 = vadd.f32 %v4255_v43, %v2005_v35 }
 0x23a   :  { %v2288_v31 = vmax.f32 %v2213_v25, 0.0 }
 0x23c   :  { %v2898_v23 = vpack.c.bf16 %v2288_v31, %v2287_v60 }
 0x23e   :  { %2935 = vst [vmem:[%s4304_s3 + $0x80] sm:$0xff] %v2898_v23  }

// kernel: convnet_forward.7
= control target key start
LH: loop header
LB: loop body
LE: loop exit
PB: predicated region body
PF: predicated region fallthrough
CT: control target
= control target key end

     0   :  { %v1105_v34 = vmov 0.0   ;;  %vm1106_vm0 = vmmov 0   ;;  %s1393_s1 = inlined_call_operand.vmem [shape: bf16[640,128], index: 1, kind: input, shape index: {}]   ;;  %s1394_s0 = inlined_call_operand.vmem [shape: bf16[72,640], index: 0, kind: input, shape index: {}]   ;;  %s1395_s2 = inlined_call_operand.vmem [shape: f32[1,128], index: 2, kind: input, shape index: {}]   ;;  %s1396_s3 = inlined_call_operand.vmem [shape: bf16[72,128], index: 3, kind: output, shape index: {}]  }
   0x1   :  { %v1032_v0 = vld [vmem:[%s1393_s1 + $0x78] sm:$0xff]   ;;  %v1036_v4 = vld [vmem:[%s1393_s1 + $0x70] sm:$0xff]   ;;  %v1040_v8 = vld [vmem:[%s1393_s1 + $0x68] sm:$0xff]  }
   0x2   :  { %v1033_v1 = vld [vmem:[%s1393_s1 + $0xf8] sm:$0xff]   ;;  %873 = vmatprep.subr.bf16.mxu0 %v1032_v0  ;;  %v1037_v5 = vld [vmem:[%s1393_s1 + $0xf0] sm:$0xff]   ;;  %v1041_v9 = vld [vmem:[%s1393_s1 + $0xe8] sm:$0xff]  }
   0x3   :  { %v1034_v2 = vld [vmem:[%s1393_s1 + $0x38] sm:$0xff]   ;;  %919 = vmatprep.subr.bf16.mxu1 %v1033_v1  ;;  %v1038_v6 = vld [vmem:[%s1393_s1 + $0x30] sm:$0xff]   ;;  %v1042_v10 = vld [vmem:[%s1393_s1 + $0x28] sm:$0xff]  }
   0x4   :  { %v1035_v3 = vld [vmem:[%s1393_s1 + $0xb8] sm:$0xff]   ;;  %874 = vmatpush3.bf16.msra.mxu0 %v1034_v2  ;;  %v1039_v7 = vld [vmem:[%s1393_s1 + $0xb0] sm:$0xff]   ;;  %v1043_v11 = vld [vmem:[%s1393_s1 + $0xa8] sm:$0xff]  }
   0x5   :  { %920 = vmatpush3.bf16.msra.mxu1 %v1035_v3  ;;  %875 = vmatprep.subr.bf16.mxu0 %v1036_v4  ;;  %v1044_v12 = vld [vmem:[%s1393_s1 + $0x60] sm:$0xff]   ;;  %v1048_v16 = vld [vmem:[%s1393_s1 + $0x58] sm:$0xff]   ;;  %v1052_v20 = vld [vmem:[%s1393_s1 + $0x50] sm:$0xff]  }
   0x6   :  { %921 = vmatprep.subr.bf16.mxu1 %v1037_v5  ;;  %v1045_v13 = vld [vmem:[%s1393_s1 + $0xe0] sm:$0xff]   ;;  %v1049_v17 = vld [vmem:[%s1393_s1 + $0xd8] sm:$0xff]   ;;  %v1053_v21 = vld [vmem:[%s1393_s1 + $0xd0] sm:$0xff]  }
   0x7   :  { %v1046_v14 = vld [vmem:[%s1393_s1 + $0x20] sm:$0xff]   ;;  %v1050_v18 = vld [vmem:[%s1393_s1 + $0x18] sm:$0xff]   ;;  %v1054_v22 = vld [vmem:[%s1393_s1 + $0x10] sm:$0xff]  }
   0x8   :  { %876 = vmatpush3.bf16.msra.mxu0 %v1038_v6  ;;  %v1047_v15 = vld [vmem:[%s1393_s1 + $0xa0] sm:$0xff]   ;;  %v1051_v19 = vld [vmem:[%s1393_s1 + $0x98] sm:$0xff]   ;;  %v1055_v23 = vld [vmem:[%s1393_s1 + $0x90] sm:$0xff]  }
   0x9   :  { %922 = vmatpush3.bf16.msra.mxu1 %v1039_v7  ;;  %877 = vmatprep.subr.bf16.mxu0 %v1040_v8  ;;  %v1056_v24 = vld [vmem:[%s1393_s1 + $0x48] sm:$0xff]   ;;  %v1060_v28 = vld [vmem:[%s1393_s1 + $0x40] sm:$0xff]   ;;  %v1070_v37 = vld [vmem:[%s1393_s1 + $0x138] sm:$0xff]  }
   0xa   :  { %923 = vmatprep.subr.bf16.mxu1 %v1041_v9  ;;  %v1057_v25 = vld [vmem:[%s1393_s1 + $0xc8] sm:$0xff]   ;;  %v1061_v29 = vld [vmem:[%s1393_s1 + $0xc0] sm:$0xff]   ;;  %v1071_v38 = vld [vmem:[%s1393_s1 + $0x130] sm:$0xff]  }
   0xb   :  { %v1058_v26 = vld [vmem:[%s1393_s1 + $0x8] sm:$0xff]   ;;  %v1062_v30 = vld [vmem:[%s1393_s1] sm:$0xff]   ;;  %v1081_v45 = vld [vmem:[%s1394_s0 + $0x5c] ss:$20 sps:$4 sm:$0xff]  }
   0xc   :  { %878 = vmatpush3.bf16.msra.mxu0 %v1042_v10  ;;  %v1059_v27 = vld [vmem:[%s1393_s1 + $0x88] sm:$0xff]   ;;  %v1063_v31 = vld [vmem:[%s1393_s1 + $0x80] sm:$0xff]   ;;  %v1086_v49 = vld [vmem:[%s1393_s1 + $0x118] sm:$0xff]  }
   0xd   :  { %924 = vmatpush3.bf16.msra.mxu1 %v1043_v11  ;;  %879 = vmatprep.subr.bf16.mxu0 %v1044_v12  ;;  %v1064_v32 = vld [vmem:[%s1394_s0] ss:$20 sps:$4 sm:$0xff]   ;;  %v1066_v33 = vld [vmem:[%s1394_s0 + $0x4] ss:$20 sps:$4 sm:$0xff]   ;;  %v1067_v35 = vld [vmem:[%s1394_s0 + $0x8] ss:$20 sps:$4 sm:$0xff]  }
   0xe   :  { %925 = vmatprep.subr.bf16.mxu1 %v1045_v13  ;;  %v1069_v36 = vld [vmem:[%s1394_s0 + $0xc] ss:$20 sps:$4 sm:$0xff]   ;;  %523 = vmatprep.mubr.bf16.mxu0 %v1066_v33  ;;  %v1074_v40 = vld [vmem:[%s1394_s0 + $0x34] ss:$20 sps:$4 sm:$0xff]   ;;  %v1077_v42 = vld [vmem:[%s1394_s0 + $0x30] ss:$20 sps:$4 sm:$0xff]  }
   0xf   :  { %595 = vmatprep.mubr.bf16.mxu1 %v1069_v36  ;;  %v1072_v39 = vld [vmem:[%s1394_s0 + $0x2c] ss:$20 sps:$4 sm:$0xff]   ;;  %v1076_v41 = vld [vmem:[%s1394_s0 + $0x28] ss:$20 sps:$4 sm:$0xff]   ;;  %v1083_v47 = vld [vmem:[%s1394_s0 + $0x50] ss:$20 sps:$4 sm:$0xff]  }
  0x10   :  { %880 = vmatpush3.bf16.msra.mxu0 %v1046_v14  ;;  %v1078_v43 = vld [vmem:[%s1393_s1 + $0x128] sm:$0xff]   ;;  %v1085_v46 = vld [vmem:[%s1393_s1 + $0x120] sm:$0xff]   ;;  %v1087_v50 = vld [vmem:[%s1394_s0 + $0x7c] ss:$20 sps:$4 sm:$0xff]  }
  0x11   :  { %926 = vmatpush3.bf16.msra.mxu1 %v1047_v15  ;;  %881 = vmatprep.subr.bf16.mxu0 %v1048_v16  ;;  %v1079_v44 = vld [vmem:[%s1394_s0 + $0x54] ss:$20 sps:$4 sm:$0xff]   ;;  %v1084_v48 = vld [vmem:[%s1394_s0 + $0x58] ss:$20 sps:$4 sm:$0xff]   ;;  %v39_v53 = vld [vmem:[%s1394_s0 + $0xa0] sm:$0xff] }
  0x12   :  { %927 = vmatprep.subr.bf16.mxu1 %v1049_v17  ;;  %v1089_v51 = vld [vmem:[%s1394_s0 + $0x84] ss:$20 sps:$4 sm:$0xff]   ;;  %v1093_v52 = vld [vmem:[%s1393_s1 + $0x110] sm:$0xff]   ;;  %v40_v54 = vld [vmem:[%s1394_s0 + $0xa8] sm:$0xff]  ;;  %v788_v57 = vcombine.high %v39_v53, %v39_v53  ;;  %v787_v61 = vcombine.low %v39_v53, %v39_v53 }
  0x13   :  { %v1091_v55 = vld [vmem:[%s1394_s0 + $0x78] ss:$20 sps:$4 sm:$0xff]   ;;  %v1092_v56 = vld [vmem:[%s1394_s0 + $0x80] ss:$20 sps:$4 sm:$0xff]   ;;  %v790_v58 = vcombine.high %v40_v54, %v40_v54  ;;  %v789_v62 = vcombine.low %v40_v54, %v40_v54  ;;  %v1100_v63 = vld [vmem:[%s1394_s0 + $0x10] ss:$20 sps:$4 sm:$0xff]  }
  0x14   :  { %882 = vmatpush3.bf16.msra.mxu0 %v1050_v18  ;;  %v1096_v59 = vld [vmem:[%s1393_s1 + $0x108] sm:$0xff]   ;;  %v1099_v60 = vld [vmem:[%s1393_s1 + $0x100] sm:$0xff]   ;;  %v1103_v2 = vld [vmem:[%s1394_s0 + $0xb0] ss:$0 sps:$4 sm:$0xff]  }
  0x15   :  { %928 = vmatpush3.bf16.msra.mxu1 %v1051_v19  ;;  %883 = vmatprep.subr.bf16.mxu0 %v1052_v20  ;;  %v1101_v0 = vld [vmem:[%s1394_s0 + $0x88] ss:$20 sps:$4 sm:$0xff]   ;;  %v1102_v1 = vld [vmem:[%s1394_s0 + $0x38] ss:$20 sps:$4 sm:$0xff]   ;;  %v1104_v3 = vld [vmem:[%s1394_s0 + $0x60] ss:$20 sps:$4 sm:$0xff]  }
  0x16   :  { %929 = vmatprep.subr.bf16.mxu1 %v1053_v21 }
  0x18   :  { %884 = vmatpush3.bf16.msra.mxu0 %v1054_v22 }
  0x19   :  { %930 = vmatpush3.bf16.msra.mxu1 %v1055_v23  ;;  %885 = vmatprep.subr.bf16.mxu0 %v1056_v24 }
  0x1a   :  { %931 = vmatprep.subr.bf16.mxu1 %v1057_v25 }
  0x1c   :  { %886 = vmatpush3.bf16.msra.mxu0 %v1058_v26 }
  0x1d   :  { %932 = vmatpush3.bf16.msra.mxu1 %v1059_v27  ;;  %887 = vmatprep.subr.bf16.mxu0 %v1060_v28 }
  0x1e   :  { %933 = vmatprep.subr.bf16.mxu1 %v1061_v29 }
  0x20   :  { %888 = vmatpush3.bf16.msra.mxu0 %v1062_v30 }
  0x21   :  { %934 = vmatpush3.bf16.msra.mxu1 %v1063_v31  ;;  %978 = vmatprep.subr.bf16.mxu0 %v1105_v34 }
  0x22   :  { %1014 = vmatprep.subr.bf16.mxu1 %v1105_v34 }
  0x23   :  { %524 = vmatmul.mubr.bf16.vlgmr.msra.gmra.mxu0 %v1064_v32 }
  0x24   :  { %596 = vmatmul.mubr.bf16.vlgmr.msra.gmra.mxu1 %v1067_v35  ;;  %979 = vmatpush3.bf16.msra.mxu0 %v1070_v37 }
  0x25   :  { %980 = vmatprep.subr.bf16.mxu0 %v1105_v34  ;;  %1022 = vmatpush3.bf16.msra.mxu1 %v1070_v37 }
  0x26   :  { %531 = vmatprep.mubr.bf16.mxu0 %v1072_v39  ;;  %1015 = vmatprep.subr.bf16.mxu1 %v1105_v34  ;;  %v1358_v39 = vld [vmem:[%s1395_s2] ss:$0 sm:$0xff] }
  0x27   :  { %603 = vmatprep.mubr.bf16.mxu1 %v1074_v40 }
  0x28   :  { %981 = vmatpush3.bf16.msra.mxu0 %v1071_v38 }
  0x29   :  { %982 = vmatprep.subr.bf16.mxu0 %v1105_v34  ;;  %1023 = vmatpush3.bf16.msra.mxu1 %v1071_v38 }
  0x2a   :  { %1016 = vmatprep.subr.bf16.mxu1 %v1105_v34 }
  0x2b   :  { %532 = vmatmul.mubr.bf16.gmra.mxu0 %v1076_v41 }
  0x2c   :  { %604 = vmatmul.mubr.bf16.gmra.mxu1 %v1077_v42  ;;  %983 = vmatpush3.bf16.msra.mxu0 %v1078_v43 }
  0x2d   :  { %539 = vmatprep.mubr.bf16.mxu0 %v1079_v44  ;;  %611 = vmatprep.mubr.bf16.mxu1 %v1081_v45 }
  0x2e   :  { %984 = vmatprep.subr.bf16.mxu0 %v1105_v34  ;;  %1024 = vmatpush3.bf16.msra.mxu1 %v1078_v43 }
  0x2f   :  { %1017 = vmatprep.subr.bf16.mxu1 %v1105_v34 }
  0x30   :  { %985 = vmatpush3.bf16.msra.mxu0 %v1085_v46 }
  0x31   :  { %986 = vmatprep.subr.bf16.mxu0 %v1105_v34 }
  0x32   :  { %1025 = vmatpush3.bf16.msra.mxu1 %v1085_v46 }
  0x33   :  { %540 = vmatmul.mubr.bf16.gmra.mxu0 %v1083_v47  ;;  %1018 = vmatprep.subr.bf16.mxu1 %v1105_v34 }
  0x34   :  { %612 = vmatmul.mubr.bf16.gmra.mxu1 %v1084_v48  ;;  %987 = vmatpush3.bf16.msra.mxu0 %v1086_v49 }
  0x35   :  { %547 = vmatprep.mubr.bf16.mxu0 %v1087_v50  ;;  %619 = vmatprep.mubr.bf16.mxu1 %v1089_v51 }
  0x36   :  { %1026 = vmatpush3.bf16.msra.mxu1 %v1086_v49  ;;  %988 = vmatprep.subr.bf16.mxu0 %v1105_v34 }
  0x37   :  { %1019 = vmatprep.subr.bf16.mxu1 %v1105_v34 }
  0x38   :  { %989 = vmatpush3.bf16.msra.mxu0 %v1093_v52 }
  0x39   :  { %990 = vmatprep.subr.bf16.mxu0 %v1105_v34 }
  0x3a   :  { %1027 = vmatpush3.bf16.msra.mxu1 %v1093_v52 }
  0x3b   :  { %548 = vmatmul.mubr.bf16.gmra.mxu0 %v1091_v55  ;;  %1020 = vmatprep.subr.bf16.mxu1 %v1105_v34 }
  0x3c   :  { %620 = vmatmul.mubr.bf16.gmra.mxu1 %v1092_v56  ;;  %555 = vmatprep.mubr.bf16.mxu0 %v788_v57 }
  0x3d   :  { %627 = vmatprep.mubr.bf16.mxu1 %v790_v58  ;;  %991 = vmatpush3.bf16.msra.mxu0 %v1096_v59 }
  0x3e   :  { %1028 = vmatpush3.bf16.msra.mxu1 %v1096_v59  ;;  %992 = vmatprep.subr.bf16.mxu0 %v1105_v34 }
  0x3f   :  { %1021 = vmatprep.subr.bf16.mxu1 %v1105_v34 }
  0x41   :  { %993 = vmatpush3.bf16.msra.mxu0 %v1099_v60 }
  0x42   :  { %1029 = vmatpush3.bf16.msra.mxu1 %v1099_v60 }
  0x43   :  { %556 = vmatmul.mubr.bf16.gmra.mxu0 %v787_v61 }
  0x44   :  { %628 = vmatmul.mubr.bf16.gmra.mxu1 %v789_v62  ;;  %994 = vmatprep.mubr.msk.bf16.mxu0 %vm1106_vm0, %v1105_v34 }
  0x45   :  { %1006 = vmatprep.mubr.msk.bf16.mxu1 %vm1106_vm0, %v1105_v34 }
  0x4b   :  { %995 = vmatmul.mubr.bf16.vlgmr.msra.gmra.mxu0 %v1100_v63 }
  0x4c   :  { %1007 = vmatmul.mubr.bf16.vlgmr.msra.gmra.mxu1 %v1101_v0  ;;  %998 = vmatprep.mubr.msk.bf16.mxu0 %vm1106_vm0, %v1105_v34 }
  0x4d   :  { %1010 = vmatprep.mubr.msk.bf16.mxu1 %vm1106_vm0, %v1105_v34 }
  0x53   :  { %999 = vmatmul.mubr.bf16.gmra.mxu0 %v1102_v1 }
  0x54   :  { %1011 = vmatmul.mubr.bf16.gmra.mxu1 %v1103_v2  ;;  %1002 = vmatprep.mubr.msk.bf16.mxu0 %vm1106_vm0, %v1105_v34 }
  0x5b   :  { %1003 = vmatmul.mubr.bf16.gmra.mxu0 %v1104_v3 }
  0xe3   :  { %v889_v4 = vpop.f32.mrf.mxu0 }
  0xe4   :  { %v935_v5 = vpop.f32.mrf.mxu1 }
  0xe5   :  { %v890_v6 = vpop.f32.mrf.mxu0 }
  0xe6   :  { %v936_v7 = vpop.f32.mrf.mxu1  ;;  %v891_v37 = vadd.f32 %v890_v6, %v889_v4 }
  0xe7   :  { %v892_v8 = vpop.f32.mrf.mxu0  ;;  %v937_v47 = vadd.f32 %v936_v7, %v935_v5 }
  0xe8   :  { %v938_v9 = vpop.f32.mrf.mxu1  ;;  %v526_v46 = vadd.f32 %v891_v37, %v1358_v39 }
  0xe9   :  { %v893_v10 = vpop.f32.mrf.mxu0 }
  0xea   :  { %v939_v11 = vpop.f32.mrf.mxu1  ;;  %v894_v42 = vadd.f32 %v893_v10, %v892_v8  ;;  %v598_v60 = vadd.f32 %v937_v47, %v526_v46 }
  0xeb   :  { %v895_v12 = vpop.f32.mrf.mxu0  ;;  %v940_v53 = vadd.f32 %v939_v11, %v938_v9 }
  0xec   :  { %v941_v13 = vpop.f32.mrf.mxu1  ;;  %v529_v52 = vadd.f32 %v894_v42, %v1358_v39 }
  0xed   :  { %v896_v14 = vpop.f32.mrf.mxu0 }
  0xee   :  { %v942_v15 = vpop.f32.mrf.mxu1  ;;  %v897_v59 = vadd.f32 %v896_v14, %v895_v12  ;;  %v601_v3 = vadd.f32 %v940_v53, %v529_v52 }
  0xef   :  { %v898_v16 = vpop.f32.mrf.mxu0  ;;  %v943_v10 = vadd.f32 %v942_v15, %v941_v13 }
  0xf0   :  { %v1337_v17 = vpop.f32.mrf.mxu1  ;;  %v534_v9 = vadd.f32 %v897_v59, %v1358_v39 }
  0xf1   :  { %v899_v18 = vpop.f32.mrf.mxu0 }
  0xf2   :  { %v945_v19 = vpop.f32.mrf.mxu1  ;;  %v900_v0 = vadd.f32 %v899_v18, %v898_v16  ;;  %v606_v13 = vadd.f32 %v943_v10, %v534_v9 }
  0xf3   :  { %v1339_v20 = vpop.f32.mrf.mxu0  ;;  %v946_v16 = vadd.f32 %v945_v19, %v1337_v17 }
  0xf4   :  { %v1341_v21 = vpop.f32.mrf.mxu1 }
  0xf5   :  { %v1343_v22 = vpop.f32.mrf.mxu0 }
  0xf6   :  { %v1345_v23 = vpop.f32.mrf.mxu1 }
  0xf7   :  { %v1347_v24 = vpop.f32.mrf.mxu0 }
  0xf8   :  { %v1349_v25 = vpop.f32.mrf.mxu1 }
  0xf9   :  { %v1351_v26 = vpop.f32.mrf.mxu0 }
  0xfa   :  { %v1353_v27 = vpop.f32.mrf.mxu1  ;;  %v906_v42 = vadd.f32 %v1351_v26, %v1347_v24 }
  0xfb   :  { %v907_v28 = vpop.f32.mrf.mxu0 }
  0xfc   :  { %v953_v29 = vpop.f32.mrf.mxu1 }
  0xfd   :  { %v908_v30 = vpop.f32.mrf.mxu0 }
  0xfe   :  { %v954_v31 = vpop.f32.mrf.mxu1  ;;  %v909_v40 = vadd.f32 %v908_v30, %v907_v28 }
  0xff   :  { %v910_v32 = vpop.f32.mrf.mxu0  ;;  %v955_v50 = vadd.f32 %v954_v31, %v953_v29  ;;  %v537_v29 = vadd.f32 %v900_v0, %v1358_v39 }
 0x100   :  { %v956_v33 = vpop.f32.mrf.mxu1  ;;  %v550_v49 = vadd.f32 %v909_v40, %v1358_v39 }
 0x101   :  { %v911_v34 = vpop.f32.mrf.mxu0  ;;  %v609_v19 = vadd.f32 %v946_v16, %v537_v29 }
 0x102   :  { %v957_v35 = vpop.f32.mrf.mxu1  ;;  %v912_v44 = vadd.f32 %v911_v34, %v910_v32  ;;  %v622_v62 = vadd.f32 %v955_v50, %v550_v49  ;;  %v952_v49 = vadd.f32 %v1353_v27, %v1349_v25 }
 0x103   :  { %v913_v36 = vpop.f32.mrf.mxu0  ;;  %v958_v56 = vadd.f32 %v957_v35, %v956_v33 }
 0x104   :  { %v959_v38 = vpop.f32.mrf.mxu1  ;;  %v553_v55 = vadd.f32 %v912_v44, %v1358_v39 }
 0x105   :  { %v914_v41 = vpop.f32.mrf.mxu0 }
 0x106   :  { %v960_v43 = vpop.f32.mrf.mxu1  ;;  %v915_v57 = vadd.f32 %v914_v41, %v913_v36  ;;  %v625_v8 = vadd.f32 %v958_v56, %v553_v55  ;;  %v903_v36 = vadd.f32 %v1343_v22, %v1339_v20 }
 0x107   :  { %v916_v45 = vpop.f32.mrf.mxu0  ;;  %v961_v5 = vadd.f32 %v960_v43, %v959_v38 }
 0x108   :  { %v962_v48 = vpop.f32.mrf.mxu1  ;;  %v558_v4 = vadd.f32 %v915_v57, %v1358_v39  ;;  %v542_v44 = vadd.f32 %v903_v36, %v1358_v39  ;;  %v949_v45 = vadd.f32 %v1345_v23, %v1341_v21 }
 0x109   :  { %v917_v51 = vpop.f32.mrf.mxu0  ;;  %v545_v48 = vadd.f32 %v906_v42, %v1358_v39 }
 0x10a   :  { %v963_v54 = vpop.f32.mrf.mxu1  ;;  %v630_v35 = vadd.f32 %v961_v5, %v558_v4  ;;  %v614_v55 = vadd.f32 %v949_v45, %v542_v44 }
 0x10b   :  { %v669_v58 = vpop.f32.mrf.mxu0  ;;  %v617_v39 = vadd.f32 %v952_v49, %v545_v48 }
 0x10c   :  { %v693_v61 = vpop.f32.mrf.mxu1  ;;  %v670_v1 = vadd.f32 %v669_v58, %v598_v60 }
 0x10d   :  { %v996_v63 = vpop.f32.mrf.mxu0  ;;  %v694_v6 = vadd.f32 %v693_v61, %v622_v62 }
 0x10e   :  { %v1008_v2 = vpop.f32.mrf.mxu1  ;;  %v707_v18 = vmax.f32 %v670_v1, 0.0 }
 0x10f   :  { %v672_v7 = vpop.f32.mrf.mxu0  ;;  %v713_v32 = vmax.f32 %v694_v6, 0.0 }
 0x110   :  { %v673_v11 = vadd.f32 %v672_v7, %v601_v3  ;;  %v696_v28 = vpop.f32.mrf.mxu1 }
 0x111   :  { %v697_v12 = vadd.f32 %v696_v28, %v625_v8  ;;  %v997_v14 = vpop.f32.mrf.mxu0 }
 0x112   :  { %v708_v30 = vmax.f32 %v673_v11, 0.0  ;;  %v1009_v31 = vpop.f32.mrf.mxu1 }
 0x113   :  { %v714_v33 = vmax.f32 %v697_v12, 0.0  ;;  %v677_v34 = vpop.f32.mrf.mxu0 }
 0x114   :  { %v853_v37 = vpack.c.bf16 %v708_v30, %v707_v18  ;;  %v701_v15 = vpop.f32.mrf.mxu1  ;;  %v678_v17 = vadd.f32 %v677_v34, %v606_v13 }
 0x115   :  { %v868_v38 = vpack.c.bf16 %v714_v33, %v713_v32  ;;  %v702_v40 = vadd.f32 %v701_v15, %v630_v35  ;;  %v1000_v41 = vpop.f32.mrf.mxu0 }
 0x116   :  { %854 = vst [vmem:[%s1396_s3] sm:$0xff] %v853_v37   ;;  %v1012_v43 = vpop.f32.mrf.mxu1  ;;  %v709_v50 = vmax.f32 %v678_v17, 0.0 }
 0x117   :  { %872 = vst [vmem:[%s1396_s3 + $0x18] sm:$0xff] %v868_v38   ;;  %v715_v20 = vmax.f32 %v702_v40, 0.0  ;;  %v680_v22 = vpop.f32.mrf.mxu0 }
 0x118   :  { %v681_v46 = vadd.f32 %v680_v22, %v609_v19  ;;  %v704_v24 = vpop.f32.mrf.mxu1 }
 0x119   :  { %v849_v26 = vpack.c.bf16 %v715_v20, %v715_v20  ;;  %v1001_v47 = vpop.f32.mrf.mxu0 }
 0x11a   :  { %v710_v51 = vmax.f32 %v681_v46, 0.0  ;;  %v1013_v52 = vpop.f32.mrf.mxu1 }
 0x11b   :  { %761 = vst [vmem:[%s1396_s3 + $0x20] sm:$0xf] %v849_v26  ;;  %v685_v53 = vpop.f32.mrf.mxu0 }
 0x11c   :  { %v858_v54 = vpack.c.bf16 %v710_v51, %v709_v50  ;;  %v686_v23 = vadd.f32 %v685_v53, %v614_v55 }
 0x11d   :  { %v1004_v21 = vpop.f32.mrf.mxu0 }
 0x11e   :  { %870 = vst [vmem:[%s1396_s3 + $0x8] sm:$0xff] %v858_v54   ;;  %v711_v27 = vmax.f32 %v686_v23, 0.0 }
 0x11f   :  { %v688_v56 = vpop.f32.mrf.mxu0 }
 0x120   :  { %v689_v57 = vadd.f32 %v688_v56, %v617_v39 }
 0x121   :  { %v1005_v25 = vpop.f32.mrf.mxu0 }
 0x122   :  { %v712_v58 = vmax.f32 %v689_v57, 0.0 }
 0x124   :  { %v863_v59 = vpack.c.bf16 %v712_v58, %v711_v27 }
 0x126   :  { %871 = vst [vmem:[%s1396_s3 + $0x10] sm:$0xff] %v863_v59  }

// kernel: convnet_forward.8
= control target key start
LH: loop header
LB: loop body
LE: loop exit
PB: predicated region body
PF: predicated region fallthrough
CT: control target
= control target key end

     0   :  { %s2015_s1 = inlined_call_operand.vmem [shape: bf16[1152,256], index: 1, kind: input, shape index: {}]   ;;  %s2016_s0 = inlined_call_operand.vmem [shape: bf16[8,1152], index: 0, kind: input, shape index: {}]   ;;  %s2017_s2 = inlined_call_operand.vmem [shape: f32[1,256], index: 2, kind: input, shape index: {}]   ;;  %s2018_s3 = inlined_call_operand.vmem [shape: bf16[8,256], index: 3, kind: output, shape index: {}]  }
   0x1   :  { %v1304_v0 = vld [vmem:[%s2015_s1 + $0x74] ss:$8 sps:$4 sm:$0xff]   ;;  %v1306_v1 = vld [vmem:[%s2015_s1 + $0x70] ss:$8 sps:$4 sm:$0xff]   ;;  %v1310_v4 = vld [vmem:[%s2015_s1 + $0x64] ss:$8 sps:$4 sm:$0xff]  }
   0x2   :  { %928 = vmatprep.subr.bf16.mxu0 %v1304_v0  ;;  %v1307_v2 = vld [vmem:[%s2015_s1 + $0x174] ss:$8 sps:$4 sm:$0xff]   ;;  %v1309_v3 = vld [vmem:[%s2015_s1 + $0x170] ss:$8 sps:$4 sm:$0xff]   ;;  %v1312_v5 = vld [vmem:[%s2015_s1 + $0x60] ss:$8 sps:$4 sm:$0xff]  }
   0x3   :  { %929 = vmatpush1.bf16.msra.mxu0 %v1306_v1  ;;  %969 = vmatprep.subr.bf16.mxu1 %v1307_v2  ;;  %v1313_v6 = vld [vmem:[%s2015_s1 + $0x164] ss:$8 sps:$4 sm:$0xff]   ;;  %v1315_v7 = vld [vmem:[%s2015_s1 + $0x160] ss:$8 sps:$4 sm:$0xff]   ;;  %v1316_v8 = vld [vmem:[%s2015_s1 + $0x54] ss:$8 sps:$4 sm:$0xff]  }
   0x4   :  { %970 = vmatpush1.bf16.msra.mxu1 %v1309_v3  ;;  %930 = vmatprep.subr.bf16.mxu0 %v1310_v4  ;;  %v1318_v9 = vld [vmem:[%s2015_s1 + $0x50] ss:$8 sps:$4 sm:$0xff]   ;;  %v1319_v10 = vld [vmem:[%s2015_s1 + $0x154] ss:$8 sps:$4 sm:$0xff]   ;;  %v1322_v11 = vld [vmem:[%s2015_s1 + $0x44] ss:$8 sps:$4 sm:$0xff]  }
   0x5   :  { %971 = vmatprep.subr.bf16.mxu1 %v1313_v6  ;;  %v1321_v12 = vld [vmem:[%s2015_s1 + $0x150] ss:$8 sps:$4 sm:$0xff]   ;;  %v1325_v13 = vld [vmem:[%s2015_s1 + $0x144] ss:$8 sps:$4 sm:$0xff]   ;;  %v1324_v14 = vld [vmem:[%s2015_s1 + $0x40] ss:$8 sps:$4 sm:$0xff]  }
   0x6   :  { %v1328_v15 = vld [vmem:[%s2015_s1 + $0x34] ss:$8 sps:$4 sm:$0xff]   ;;  %v1327_v16 = vld [vmem:[%s2015_s1 + $0x140] ss:$8 sps:$4 sm:$0xff]   ;;  %v1330_v18 = vld [vmem:[%s2015_s1 + $0x30] ss:$8 sps:$4 sm:$0xff]  }
   0x7   :  { %931 = vmatpush1.bf16.msra.mxu0 %v1312_v5  ;;  %v1331_v17 = vld [vmem:[%s2015_s1 + $0x134] ss:$8 sps:$4 sm:$0xff]   ;;  %v1334_v19 = vld [vmem:[%s2015_s1 + $0x24] ss:$8 sps:$4 sm:$0xff]   ;;  %v1333_v20 = vld [vmem:[%s2015_s1 + $0x130] ss:$8 sps:$4 sm:$0xff]  }
   0x8   :  { %932 = vmatprep.subr.bf16.mxu0 %v1316_v8  ;;  %972 = vmatpush1.bf16.msra.mxu1 %v1315_v7  ;;  %v1337_v21 = vld [vmem:[%s2015_s1 + $0x124] ss:$8 sps:$4 sm:$0xff]   ;;  %v1336_v22 = vld [vmem:[%s2015_s1 + $0x20] ss:$8 sps:$4 sm:$0xff]   ;;  %v1340_v23 = vld [vmem:[%s2015_s1 + $0x14] ss:$8 sps:$4 sm:$0xff]  }
   0x9   :  { %973 = vmatprep.subr.bf16.mxu1 %v1319_v10  ;;  %v1339_v24 = vld [vmem:[%s2015_s1 + $0x120] ss:$8 sps:$4 sm:$0xff]   ;;  %v1343_v25 = vld [vmem:[%s2015_s1 + $0x114] ss:$8 sps:$4 sm:$0xff]   ;;  %v1342_v26 = vld [vmem:[%s2015_s1 + $0x10] ss:$8 sps:$4 sm:$0xff]  }
   0xa   :  { %v1346_v27 = vld [vmem:[%s2015_s1 + $0x4] ss:$8 sps:$4 sm:$0xff]   ;;  %v1345_v28 = vld [vmem:[%s2015_s1 + $0x110] ss:$8 sps:$4 sm:$0xff]   ;;  %v1348_v30 = vld [vmem:[%s2015_s1] ss:$8 sps:$4 sm:$0xff]  }
   0xb   :  { %933 = vmatpush1.bf16.msra.mxu0 %v1318_v9  ;;  %v1349_v29 = vld [vmem:[%s2015_s1 + $0x104] ss:$8 sps:$4 sm:$0xff]   ;;  %v1352_v31 = vld [vmem:[%s2015_s1 + $0xf4] ss:$8 sps:$4 sm:$0xff]   ;;  %v1351_v32 = vld [vmem:[%s2015_s1 + $0x100] ss:$8 sps:$4 sm:$0xff]  }
   0xc   :  { %934 = vmatprep.subr.bf16.mxu0 %v1322_v11  ;;  %974 = vmatpush1.bf16.msra.mxu1 %v1321_v12  ;;  %v1355_v33 = vld [vmem:[%s2015_s1 + $0x1f4] ss:$8 sps:$4 sm:$0xff]   ;;  %v1354_v34 = vld [vmem:[%s2015_s1 + $0xf0] ss:$8 sps:$4 sm:$0xff]   ;;  %v1358_v35 = vld [vmem:[%s2015_s1 + $0xe4] ss:$8 sps:$4 sm:$0xff]  }
   0xd   :  { %975 = vmatprep.subr.bf16.mxu1 %v1325_v13  ;;  %v1357_v36 = vld [vmem:[%s2015_s1 + $0x1f0] ss:$8 sps:$4 sm:$0xff]   ;;  %v1361_v37 = vld [vmem:[%s2015_s1 + $0x1e4] ss:$8 sps:$4 sm:$0xff]   ;;  %v1360_v38 = vld [vmem:[%s2015_s1 + $0xe0] ss:$8 sps:$4 sm:$0xff]  }
   0xe   :  { %v1364_v39 = vld [vmem:[%s2015_s1 + $0xd4] ss:$8 sps:$4 sm:$0xff]   ;;  %v1363_v40 = vld [vmem:[%s2015_s1 + $0x1e0] ss:$8 sps:$4 sm:$0xff]   ;;  %v1366_v42 = vld [vmem:[%s2015_s1 + $0xd0] ss:$8 sps:$4 sm:$0xff]  }
   0xf   :  { %935 = vmatpush1.bf16.msra.mxu0 %v1324_v14  ;;  %v1367_v41 = vld [vmem:[%s2015_s1 + $0x1d4] ss:$8 sps:$4 sm:$0xff]   ;;  %v1370_v43 = vld [vmem:[%s2015_s1 + $0xc4] ss:$8 sps:$4 sm:$0xff]   ;;  %v1369_v44 = vld [vmem:[%s2015_s1 + $0x1d0] ss:$8 sps:$4 sm:$0xff]  }
  0x10   :  { %936 = vmatprep.subr.bf16.mxu0 %v1328_v15  ;;  %976 = vmatpush1.bf16.msra.mxu1 %v1327_v16  ;;  %v1373_v45 = vld [vmem:[%s2015_s1 + $0x1c4] ss:$8 sps:$4 sm:$0xff]   ;;  %v1372_v47 = vld [vmem:[%s2015_s1 + $0xc0] ss:$8 sps:$4 sm:$0xff]   ;;  %v1376_v49 = vld [vmem:[%s2015_s1 + $0xb4] ss:$8 sps:$4 sm:$0xff]  }
  0x11   :  { %977 = vmatprep.subr.bf16.mxu1 %v1331_v17  ;;  %v15_v46 = vld [vmem:[%s2016_s0] sm:$0xff]  ;;  %v16_v50 = vld [vmem:[%s2016_s0 + $0x8] sm:$0xff]  ;;  %v1379_v53 = vld [vmem:[%s2015_s1 + $0x1b4] ss:$8 sps:$4 sm:$0xff]  }
  0x12   :  { %v1149_v48 = vcombine.high %v15_v46, %v15_v46  ;;  %v1375_v51 = vld [vmem:[%s2015_s1 + $0x1c0] ss:$8 sps:$4 sm:$0xff]   ;;  %v1151_v52 = vcombine.high %v16_v50, %v16_v50  ;;  %v1378_v54 = vld [vmem:[%s2015_s1 + $0xb0] ss:$8 sps:$4 sm:$0xff]   ;;  %v1382_v55 = vld [vmem:[%s2015_s1 + $0xa4] ss:$8 sps:$4 sm:$0xff]   ;;  %v1148_v5 = vcombine.low %v15_v46, %v15_v46  ;;  %v1150_v8 = vcombine.low %v16_v50, %v16_v50 }
  0x13   :  { %937 = vmatpush1.bf16.msra.mxu0 %v1330_v18  ;;  %v1381_v56 = vld [vmem:[%s2015_s1 + $0x1b0] ss:$8 sps:$4 sm:$0xff]   ;;  %v1385_v57 = vld [vmem:[%s2015_s1 + $0x1a4] ss:$8 sps:$4 sm:$0xff]   ;;  %v1384_v58 = vld [vmem:[%s2015_s1 + $0xa0] ss:$8 sps:$4 sm:$0xff]  }
  0x14   :  { %938 = vmatprep.subr.bf16.mxu0 %v1334_v19  ;;  %978 = vmatpush1.bf16.msra.mxu1 %v1333_v20  ;;  %v1388_v59 = vld [vmem:[%s2015_s1 + $0x94] ss:$8 sps:$4 sm:$0xff]   ;;  %v1387_v60 = vld [vmem:[%s2015_s1 + $0x1a0] ss:$8 sps:$4 sm:$0xff]   ;;  %v1390_v62 = vld [vmem:[%s2015_s1 + $0x90] ss:$8 sps:$4 sm:$0xff]  }
  0x15   :  { %979 = vmatprep.subr.bf16.mxu1 %v1337_v21  ;;  %960 = vmatprep.mubr.bf16.mxu0 %v1149_v48  ;;  %v1391_v61 = vld [vmem:[%s2015_s1 + $0x194] ss:$8 sps:$4 sm:$0xff]   ;;  %v1394_v63 = vld [vmem:[%s2015_s1 + $0x84] ss:$8 sps:$4 sm:$0xff]   ;;  %v1393_v0 = vld [vmem:[%s2015_s1 + $0x190] ss:$8 sps:$4 sm:$0xff]  }
  0x16   :  { %1001 = vmatprep.mubr.bf16.mxu1 %v1151_v52  ;;  %v1397_v1 = vld [vmem:[%s2015_s1 + $0x184] ss:$8 sps:$4 sm:$0xff]   ;;  %v1396_v2 = vld [vmem:[%s2015_s1 + $0x80] ss:$8 sps:$4 sm:$0xff]   ;;  %v1404_v3 = vld [vmem:[%s2015_s1 + $0x274] ss:$8 sps:$4 sm:$0xff]  }
  0x17   :  { %939 = vmatpush1.bf16.msra.mxu0 %v1336_v22  ;;  %v1401_v4 = vld [vmem:[%s2015_s1 + $0x180] ss:$8 sps:$4 sm:$0xff]   ;;  %v1409_v6 = vld [vmem:[%s2015_s1 + $0x374] ss:$8 sps:$4 sm:$0xff]   ;;  %v1402_v7 = vld [vmem:[%s2015_s1 + $0x270] ss:$8 sps:$4 sm:$0xff]  }
  0x18   :  { %940 = vmatprep.subr.bf16.mxu0 %v1340_v23  ;;  %980 = vmatpush1.bf16.msra.mxu1 %v1339_v24  ;;  %v1412_v9 = vld [vmem:[%s2015_s1 + $0x264] ss:$8 sps:$4 sm:$0xff]   ;;  %v1407_v10 = vld [vmem:[%s2015_s1 + $0x370] ss:$8 sps:$4 sm:$0xff]   ;;  %v1410_v12 = vld [vmem:[%s2015_s1 + $0x260] ss:$8 sps:$4 sm:$0xff]  }
  0x19   :  { %981 = vmatprep.subr.bf16.mxu1 %v1343_v25  ;;  %v1415_v11 = vld [vmem:[%s2015_s1 + $0x364] ss:$8 sps:$4 sm:$0xff]   ;;  %v1418_v13 = vld [vmem:[%s2015_s1 + $0x254] ss:$8 sps:$4 sm:$0xff]   ;;  %v1413_v14 = vld [vmem:[%s2015_s1 + $0x360] ss:$8 sps:$4 sm:$0xff]  }
  0x1a   :  { %v1421_v15 = vld [vmem:[%s2015_s1 + $0x354] ss:$8 sps:$4 sm:$0xff]   ;;  %v1416_v16 = vld [vmem:[%s2015_s1 + $0x250] ss:$8 sps:$4 sm:$0xff]   ;;  %v1424_v17 = vld [vmem:[%s2015_s1 + $0x244] ss:$8 sps:$4 sm:$0xff]  }
  0x1b   :  { %941 = vmatpush1.bf16.msra.mxu0 %v1342_v26  ;;  %v1419_v18 = vld [vmem:[%s2015_s1 + $0x350] ss:$8 sps:$4 sm:$0xff]   ;;  %v1427_v19 = vld [vmem:[%s2015_s1 + $0x344] ss:$8 sps:$4 sm:$0xff]   ;;  %v1422_v20 = vld [vmem:[%s2015_s1 + $0x240] ss:$8 sps:$4 sm:$0xff]  }
  0x1c   :  { %942 = vmatprep.subr.bf16.mxu0 %v1346_v27  ;;  %982 = vmatpush1.bf16.msra.mxu1 %v1345_v28  ;;  %v1430_v21 = vld [vmem:[%s2015_s1 + $0x234] ss:$8 sps:$4 sm:$0xff]   ;;  %v1425_v22 = vld [vmem:[%s2015_s1 + $0x340] ss:$8 sps:$4 sm:$0xff]   ;;  %v1428_v24 = vld [vmem:[%s2015_s1 + $0x230] ss:$8 sps:$4 sm:$0xff]  }
  0x1d   :  { %983 = vmatprep.subr.bf16.mxu1 %v1349_v29  ;;  %v1433_v23 = vld [vmem:[%s2015_s1 + $0x334] ss:$8 sps:$4 sm:$0xff]   ;;  %v1436_v25 = vld [vmem:[%s2015_s1 + $0x224] ss:$8 sps:$4 sm:$0xff]   ;;  %v1431_v26 = vld [vmem:[%s2015_s1 + $0x330] ss:$8 sps:$4 sm:$0xff]  }
  0x1e   :  { %v1439_v27 = vld [vmem:[%s2015_s1 + $0x324] ss:$8 sps:$4 sm:$0xff]   ;;  %v1434_v28 = vld [vmem:[%s2015_s1 + $0x220] ss:$8 sps:$4 sm:$0xff]   ;;  %v1442_v29 = vld [vmem:[%s2015_s1 + $0x214] ss:$8 sps:$4 sm:$0xff]  }
  0x1f   :  { %943 = vmatpush1.bf16.msra.mxu0 %v1348_v30  ;;  %v1437_v30 = vld [vmem:[%s2015_s1 + $0x320] ss:$8 sps:$4 sm:$0xff]   ;;  %v1455_v46 = vld [vmem:[%s2015_s1 + $0x3f0] ss:$8 sps:$4 sm:$0xff]  }
  0x20   :  { %944 = vmatprep.subr.bf16.mxu0 %v1352_v31  ;;  %984 = vmatpush1.bf16.msra.mxu1 %v1351_v32  ;;  %v1445_v31 = vld [vmem:[%s2015_s1 + $0x314] ss:$8 sps:$4 sm:$0xff]   ;;  %v1458_v48 = vld [vmem:[%s2015_s1 + $0x2e0] ss:$8 sps:$4 sm:$0xff]   ;;  %v1464_v52 = vld [vmem:[%s2015_s1 + $0x2d0] ss:$8 sps:$4 sm:$0xff]  }
  0x21   :  { %985 = vmatprep.subr.bf16.mxu1 %v1355_v33  ;;  %v1829_v32 = vld [vmem:[%s2016_s0 + $0x10] sm:$0xff]  ;;  %v1461_v50 = vld [vmem:[%s2015_s1 + $0x3e0] ss:$8 sps:$4 sm:$0xff]  }
  0x22   :  { %v1440_v33 = vld [vmem:[%s2015_s1 + $0x210] ss:$8 sps:$4 sm:$0xff]  }
  0x23   :  { %945 = vmatpush2.bf16.msra.mxu0 %v1354_v34  ;;  %v1153_v34 = vcombine.high %v1829_v32, %v1829_v32 }
  0x24   :  { %946 = vmatprep.subr.bf16.mxu0 %v1358_v35  ;;  %986 = vmatpush2.bf16.msra.mxu1 %v1357_v36  ;;  %v1839_v35 = vld [vmem:[%s2016_s0 + $0x18] sm:$0xff]  ;;  %v1448_v36 = vld [vmem:[%s2015_s1 + $0x204] ss:$8 sps:$4 sm:$0xff]  }
  0x25   :  { %987 = vmatprep.subr.bf16.mxu1 %v1361_v37  ;;  %v1155_v37 = vcombine.high %v1839_v35, %v1839_v35 }
  0x27   :  { %947 = vmatpush2.bf16.msra.mxu0 %v1360_v38  ;;  %v1443_v38 = vld [vmem:[%s2015_s1 + $0x310] ss:$8 sps:$4 sm:$0xff]  }
  0x28   :  { %948 = vmatprep.subr.bf16.mxu0 %v1364_v39  ;;  %988 = vmatpush2.bf16.msra.mxu1 %v1363_v40  ;;  %v1451_v39 = vld [vmem:[%s2015_s1 + $0x304] ss:$8 sps:$4 sm:$0xff]   ;;  %v1446_v40 = vld [vmem:[%s2015_s1 + $0x200] ss:$8 sps:$4 sm:$0xff]  }
  0x29   :  { %989 = vmatprep.subr.bf16.mxu1 %v1367_v41  ;;  %v1454_v41 = vld [vmem:[%s2015_s1 + $0x2f4] ss:$8 sps:$4 sm:$0xff]  }
  0x2b   :  { %949 = vmatpush2.bf16.msra.mxu0 %v1366_v42  ;;  %v1449_v42 = vld [vmem:[%s2015_s1 + $0x300] ss:$8 sps:$4 sm:$0xff]  }
  0x2c   :  { %950 = vmatprep.subr.bf16.mxu0 %v1370_v43  ;;  %990 = vmatpush2.bf16.msra.mxu1 %v1369_v44  ;;  %v1457_v43 = vld [vmem:[%s2015_s1 + $0x3f4] ss:$8 sps:$4 sm:$0xff]   ;;  %v1452_v44 = vld [vmem:[%s2015_s1 + $0x2f0] ss:$8 sps:$4 sm:$0xff]  }
  0x2d   :  { %991 = vmatprep.subr.bf16.mxu1 %v1373_v45  ;;  %v1460_v45 = vld [vmem:[%s2015_s1 + $0x2e4] ss:$8 sps:$4 sm:$0xff]  }
  0x2f   :  { %951 = vmatpush2.bf16.msra.mxu0 %v1372_v47  ;;  %v1463_v47 = vld [vmem:[%s2015_s1 + $0x3e4] ss:$8 sps:$4 sm:$0xff]  }
  0x30   :  { %952 = vmatprep.subr.bf16.mxu0 %v1376_v49  ;;  %992 = vmatpush2.bf16.msra.mxu1 %v1375_v51  ;;  %v1466_v49 = vld [vmem:[%s2015_s1 + $0x2d4] ss:$8 sps:$4 sm:$0xff]  }
  0x31   :  { %993 = vmatprep.subr.bf16.mxu1 %v1379_v53  ;;  %v1469_v51 = vld [vmem:[%s2015_s1 + $0x3d4] ss:$8 sps:$4 sm:$0xff]   ;;  %v1472_v53 = vld [vmem:[%s2015_s1 + $0x2c4] ss:$8 sps:$4 sm:$0xff]  }
  0x33   :  { %953 = vmatpush2.bf16.msra.mxu0 %v1378_v54  ;;  %v1467_v54 = vld [vmem:[%s2015_s1 + $0x3d0] ss:$8 sps:$4 sm:$0xff]  }
  0x34   :  { %954 = vmatprep.subr.bf16.mxu0 %v1382_v55  ;;  %994 = vmatpush2.bf16.msra.mxu1 %v1381_v56  ;;  %v1475_v55 = vld [vmem:[%s2015_s1 + $0x3c4] ss:$8 sps:$4 sm:$0xff]   ;;  %v1470_v56 = vld [vmem:[%s2015_s1 + $0x2c0] ss:$8 sps:$4 sm:$0xff]  }
  0x35   :  { %995 = vmatprep.subr.bf16.mxu1 %v1385_v57  ;;  %v1478_v57 = vld [vmem:[%s2015_s1 + $0x2b4] ss:$8 sps:$4 sm:$0xff]  }
  0x37   :  { %955 = vmatpush2.bf16.msra.mxu0 %v1384_v58  ;;  %v1473_v58 = vld [vmem:[%s2015_s1 + $0x3c0] ss:$8 sps:$4 sm:$0xff]  }
  0x38   :  { %956 = vmatprep.subr.bf16.mxu0 %v1388_v59  ;;  %996 = vmatpush2.bf16.msra.mxu1 %v1387_v60  ;;  %v1481_v59 = vld [vmem:[%s2015_s1 + $0x3b4] ss:$8 sps:$4 sm:$0xff]   ;;  %v1476_v60 = vld [vmem:[%s2015_s1 + $0x2b0] ss:$8 sps:$4 sm:$0xff]  }
  0x39   :  { %997 = vmatprep.subr.bf16.mxu1 %v1391_v61  ;;  %v1484_v61 = vld [vmem:[%s2015_s1 + $0x2a4] ss:$8 sps:$4 sm:$0xff]  }
  0x3b   :  { %957 = vmatpush2.bf16.msra.mxu0 %v1390_v62  ;;  %v1479_v62 = vld [vmem:[%s2015_s1 + $0x3b0] ss:$8 sps:$4 sm:$0xff]  }
  0x3c   :  { %958 = vmatprep.subr.bf16.mxu0 %v1394_v63  ;;  %998 = vmatpush2.bf16.msra.mxu1 %v1393_v0  ;;  %v1487_v63 = vld [vmem:[%s2015_s1 + $0x3a4] ss:$8 sps:$4 sm:$0xff]   ;;  %v1482_v0 = vld [vmem:[%s2015_s1 + $0x2a0] ss:$8 sps:$4 sm:$0xff]  }
  0x3d   :  { %999 = vmatprep.subr.bf16.mxu1 %v1397_v1  ;;  %v1490_v1 = vld [vmem:[%s2015_s1 + $0x294] ss:$8 sps:$4 sm:$0xff]  }
  0x3f   :  { %959 = vmatpush2.bf16.msra.mxu0 %v1396_v2  ;;  %v1485_v2 = vld [vmem:[%s2015_s1 + $0x3a0] ss:$8 sps:$4 sm:$0xff]  }
  0x40   :  { %1010 = vmatprep.subr.bf16.mxu0 %v1404_v3  ;;  %1000 = vmatpush2.bf16.msra.mxu1 %v1401_v4  ;;  %v1493_v3 = vld [vmem:[%s2015_s1 + $0x394] ss:$8 sps:$4 sm:$0xff]   ;;  %v1488_v4 = vld [vmem:[%s2015_s1 + $0x290] ss:$8 sps:$4 sm:$0xff]  }
  0x41   :  { %1051 = vmatprep.subr.bf16.mxu1 %v1409_v6  ;;  %v1491_v6 = vld [vmem:[%s2015_s1 + $0x390] ss:$8 sps:$4 sm:$0xff]  }
  0x42   :  { %961 = vmatmul.mubr.bf16.vlgmr.msra.gmra.mxu0 %v1148_v5  ;;  %v1496_v5 = vld [vmem:[%s2015_s1 + $0x284] ss:$8 sps:$4 sm:$0xff]  }
  0x43   :  { %1011 = vmatpush1.bf16.msra.mxu0 %v1402_v7  ;;  %1002 = vmatmul.mubr.bf16.vlgmr.msra.gmra.mxu1 %v1150_v8  ;;  %v1499_v7 = vld [vmem:[%s2015_s1 + $0x384] ss:$8 sps:$4 sm:$0xff]   ;;  %v1494_v8 = vld [vmem:[%s2015_s1 + $0x280] ss:$8 sps:$4 sm:$0xff]  }
  0x44   :  { %1012 = vmatprep.subr.bf16.mxu0 %v1412_v9  ;;  %1052 = vmatpush1.bf16.msra.mxu1 %v1407_v10  ;;  %v1504_v9 = vld [vmem:[%s2015_s1 + $0x474] ss:$8 sps:$4 sm:$0xff]   ;;  %v1497_v10 = vld [vmem:[%s2015_s1 + $0x380] ss:$8 sps:$4 sm:$0xff]  }
  0x45   :  { %1053 = vmatprep.subr.bf16.mxu1 %v1415_v11  ;;  %1042 = vmatprep.mubr.bf16.mxu0 %v1153_v34  ;;  %v1152_v11 = vcombine.low %v1829_v32, %v1829_v32 }
  0x46   :  { %1083 = vmatprep.mubr.bf16.mxu1 %v1155_v37 }
  0x47   :  { %1013 = vmatpush1.bf16.msra.mxu0 %v1410_v12  ;;  %v1502_v12 = vld [vmem:[%s2015_s1 + $0x470] ss:$8 sps:$4 sm:$0xff]  }
  0x48   :  { %1014 = vmatprep.subr.bf16.mxu0 %v1418_v13  ;;  %1054 = vmatpush1.bf16.msra.mxu1 %v1413_v14  ;;  %v1154_v13 = vcombine.low %v1839_v35, %v1839_v35  ;;  %v1509_v14 = vld [vmem:[%s2015_s1 + $0x464] ss:$8 sps:$4 sm:$0xff]  }
  0x49   :  { %1055 = vmatprep.subr.bf16.mxu1 %v1421_v15  ;;  %v1507_v15 = vld [vmem:[%s2015_s1 + $0x460] ss:$8 sps:$4 sm:$0xff]  }
  0x4b   :  { %1015 = vmatpush1.bf16.msra.mxu0 %v1416_v16  ;;  %v1529_v16 = vmov 0  }
  0x4c   :  { %1016 = vmatprep.subr.bf16.mxu0 %v1424_v17  ;;  %1056 = vmatpush1.bf16.msra.mxu1 %v1419_v18  ;;  %v1512_v17 = vld [vmem:[%s2015_s1 + $0x454] ss:$8 sps:$4 sm:$0xff]   ;;  %v1510_v18 = vld [vmem:[%s2015_s1 + $0x450] ss:$8 sps:$4 sm:$0xff]  }
  0x4d   :  { %1057 = vmatprep.subr.bf16.mxu1 %v1427_v19  ;;  %v1515_v19 = vld [vmem:[%s2015_s1 + $0x444] ss:$8 sps:$4 sm:$0xff]  }
  0x4f   :  { %1017 = vmatpush1.bf16.msra.mxu0 %v1422_v20  ;;  %v1513_v20 = vld [vmem:[%s2015_s1 + $0x440] ss:$8 sps:$4 sm:$0xff]  }
  0x50   :  { %1018 = vmatprep.subr.bf16.mxu0 %v1430_v21  ;;  %1058 = vmatpush1.bf16.msra.mxu1 %v1425_v22  ;;  %v1518_v21 = vld [vmem:[%s2015_s1 + $0x434] ss:$8 sps:$4 sm:$0xff]   ;;  %v1516_v22 = vld [vmem:[%s2015_s1 + $0x430] ss:$8 sps:$4 sm:$0xff]  }
  0x51   :  { %1059 = vmatprep.subr.bf16.mxu1 %v1433_v23  ;;  %v1521_v23 = vld [vmem:[%s2015_s1 + $0x424] ss:$8 sps:$4 sm:$0xff]  }
  0x53   :  { %1019 = vmatpush1.bf16.msra.mxu0 %v1428_v24  ;;  %v1519_v24 = vld [vmem:[%s2015_s1 + $0x420] ss:$8 sps:$4 sm:$0xff]  }
  0x54   :  { %1020 = vmatprep.subr.bf16.mxu0 %v1436_v25  ;;  %1060 = vmatpush1.bf16.msra.mxu1 %v1431_v26  ;;  %v1524_v25 = vld [vmem:[%s2015_s1 + $0x414] ss:$8 sps:$4 sm:$0xff]   ;;  %v1522_v26 = vld [vmem:[%s2015_s1 + $0x410] ss:$8 sps:$4 sm:$0xff]  }
  0x55   :  { %1061 = vmatprep.subr.bf16.mxu1 %v1439_v27  ;;  %v1527_v27 = vld [vmem:[%s2015_s1 + $0x404] ss:$8 sps:$4 sm:$0xff]  }
  0x57   :  { %1021 = vmatpush1.bf16.msra.mxu0 %v1434_v28  ;;  %v1525_v28 = vld [vmem:[%s2015_s1 + $0x400] ss:$8 sps:$4 sm:$0xff]  }
  0x58   :  { %1022 = vmatprep.subr.bf16.mxu0 %v1442_v29  ;;  %1062 = vmatpush1.bf16.msra.mxu1 %v1437_v30  ;;  %v1528_v29 = vld [vmem:[%s2016_s0 + $0x20] ss:$0 sps:$4 sm:$0xff]   ;;  %v166_v30 = vlaneseq }
  0x59   :  { %1063 = vmatprep.subr.bf16.mxu1 %v1445_v31 }
  0x5a   :  { %v167_v31 = vshrl.u32 %v166_v30, 7 }
  0x5b   :  { %1023 = vmatpush1.bf16.msra.mxu0 %v1440_v33  ;;  %v164_v33 = vld [vmem:[%s2017_s2] sm:$0x3] }
  0x5c   :  { %1024 = vmatprep.subr.bf16.mxu0 %v1448_v36  ;;  %1064 = vmatpush1.bf16.msra.mxu1 %v1443_v38  ;;  %v168_v32 = vsub.s32 0, %v167_v31  ;;  %v172_v34 = vsub.s32 1, %v167_v31 }
  0x5d   :  { %1065 = vmatprep.subr.bf16.mxu1 %v1451_v39 }
  0x5e   :  { %v169_v35 = vrot.slane %v164_v33, %v168_v32  ;;  %v173_v36 = vrot.slane %v164_v33, %v172_v34 }
  0x5f   :  { %1025 = vmatpush1.bf16.msra.mxu0 %v1446_v40 }
  0x60   :  { %1026 = vmatprep.subr.bf16.mxu0 %v1454_v41  ;;  %1066 = vmatpush1.bf16.msra.mxu1 %v1449_v42 }
  0x61   :  { %1067 = vmatprep.subr.bf16.mxu1 %v1457_v43 }
  0x63   :  { %1027 = vmatpush2.bf16.msra.mxu0 %v1452_v44 }
  0x64   :  { %1028 = vmatprep.subr.bf16.mxu0 %v1460_v45  ;;  %1068 = vmatpush2.bf16.msra.mxu1 %v1455_v46 }
  0x65   :  { %1069 = vmatprep.subr.bf16.mxu1 %v1463_v47 }
  0x67   :  { %1029 = vmatpush2.bf16.msra.mxu0 %v1458_v48 }
  0x68   :  { %1030 = vmatprep.subr.bf16.mxu0 %v1466_v49  ;;  %1070 = vmatpush2.bf16.msra.mxu1 %v1461_v50 }
  0x69   :  { %1071 = vmatprep.subr.bf16.mxu1 %v1469_v51 }
  0x6b   :  { %1031 = vmatpush2.bf16.msra.mxu0 %v1464_v52 }
  0x6c   :  { %1032 = vmatprep.subr.bf16.mxu0 %v1472_v53  ;;  %1072 = vmatpush2.bf16.msra.mxu1 %v1467_v54 }
  0x6d   :  { %1073 = vmatprep.subr.bf16.mxu1 %v1475_v55 }
  0x6f   :  { %1033 = vmatpush2.bf16.msra.mxu0 %v1470_v56 }
  0x70   :  { %1034 = vmatprep.subr.bf16.mxu0 %v1478_v57  ;;  %1074 = vmatpush2.bf16.msra.mxu1 %v1473_v58 }
  0x71   :  { %1075 = vmatprep.subr.bf16.mxu1 %v1481_v59 }
  0x73   :  { %1035 = vmatpush2.bf16.msra.mxu0 %v1476_v60 }
  0x74   :  { %1036 = vmatprep.subr.bf16.mxu0 %v1484_v61  ;;  %1076 = vmatpush2.bf16.msra.mxu1 %v1479_v62 }
  0x75   :  { %1077 = vmatprep.subr.bf16.mxu1 %v1487_v63 }
  0x77   :  { %1037 = vmatpush2.bf16.msra.mxu0 %v1482_v0 }
  0x78   :  { %1038 = vmatprep.subr.bf16.mxu0 %v1490_v1  ;;  %1078 = vmatpush2.bf16.msra.mxu1 %v1485_v2 }
  0x79   :  { %1079 = vmatprep.subr.bf16.mxu1 %v1493_v3 }
  0x7b   :  { %1039 = vmatpush2.bf16.msra.mxu0 %v1488_v4 }
  0x7c   :  { %1040 = vmatprep.subr.bf16.mxu0 %v1496_v5  ;;  %1080 = vmatpush2.bf16.msra.mxu1 %v1491_v6 }
  0x7d   :  { %1081 = vmatprep.subr.bf16.mxu1 %v1499_v7 }
  0x7f   :  { %1041 = vmatpush2.bf16.msra.mxu0 %v1494_v8 }
  0x80   :  { %1092 = vmatprep.subr.bf16.mxu0 %v1504_v9  ;;  %1082 = vmatpush2.bf16.msra.mxu1 %v1497_v10 }
  0x82   :  { %1043 = vmatmul.mubr.bf16.vlgmr.msra.gmra.mxu0 %v1152_v11 }
  0x83   :  { %1093 = vmatpush1.bf16.msra.mxu0 %v1502_v12  ;;  %1124 = vmatprep.mubr.bf16.mxu0 %v1529_v16 }
  0x84   :  { %1084 = vmatmul.mubr.bf16.vlgmr.msra.gmra.mxu1 %v1154_v13  ;;  %1094 = vmatprep.subr.bf16.mxu0 %v1509_v14 }
  0x87   :  { %1095 = vmatpush1.bf16.msra.mxu0 %v1507_v15 }
  0x88   :  { %1096 = vmatprep.subr.bf16.mxu0 %v1512_v17 }
  0x8b   :  { %1097 = vmatpush1.bf16.msra.mxu0 %v1510_v18 }
  0x8c   :  { %1098 = vmatprep.subr.bf16.mxu0 %v1515_v19 }
  0x8f   :  { %1099 = vmatpush1.bf16.msra.mxu0 %v1513_v20 }
  0x90   :  { %1100 = vmatprep.subr.bf16.mxu0 %v1518_v21 }
  0x93   :  { %1101 = vmatpush1.bf16.msra.mxu0 %v1516_v22 }
  0x94   :  { %1102 = vmatprep.subr.bf16.mxu0 %v1521_v23 }
  0x97   :  { %1103 = vmatpush1.bf16.msra.mxu0 %v1519_v24 }
  0x98   :  { %1104 = vmatprep.subr.bf16.mxu0 %v1524_v25 }
  0x9b   :  { %1105 = vmatpush1.bf16.msra.mxu0 %v1522_v26 }
  0x9c   :  { %1106 = vmatprep.subr.bf16.mxu0 %v1527_v27 }
  0x9f   :  { %1107 = vmatpush1.bf16.msra.mxu0 %v1525_v28 }
  0xa2   :  { %1125 = vmatmul.mubr.bf16.vlgmr.msra.gmra.mxu0 %v1528_v29 }
 0x102   :  { %v962_v37 = vpop.f32.mrf.mxu0 }
 0x103   :  { %v963_v38 = vadd.f32 %v962_v37, %v169_v35  ;;  %v1003_v40 = vpop.f32.mrf.mxu1 }
 0x104   :  { %v964_v39 = vpop.f32.mrf.mxu0 }
 0x105   :  { %v965_v41 = vadd.f32 %v964_v39, %v173_v36  ;;  %v1004_v42 = vadd.f32 %v1003_v40, %v963_v38  ;;  %v1005_v44 = vpop.f32.mrf.mxu1 }
 0x106   :  { %v966_v43 = vpop.f32.mrf.mxu0 }
 0x107   :  { %v1006_v45 = vadd.f32 %v1005_v44, %v965_v41  ;;  %v1007_v47 = vpop.f32.mrf.mxu1 }
 0x108   :  { %v967_v46 = vpop.f32.mrf.mxu0 }
 0x109   :  { %v1008_v48 = vpop.f32.mrf.mxu1 }
 0x142   :  { %v1044_v49 = vpop.f32.mrf.mxu0 }
 0x143   :  { %v1045_v57 = vadd.f32 %v1044_v49, %v1004_v42 }
 0x144   :  { %v1046_v50 = vpop.f32.mrf.mxu0  ;;  %v1085_v51 = vpop.f32.mrf.mxu1 }
 0x145   :  { %v1047_v58 = vadd.f32 %v1046_v50, %v1006_v45  ;;  %v1086_v59 = vadd.f32 %v1085_v51, %v1045_v57 }
 0x146   :  { %v1048_v52 = vpop.f32.mrf.mxu0  ;;  %v1087_v53 = vpop.f32.mrf.mxu1 }
 0x147   :  { %v1088_v61 = vadd.f32 %v1087_v53, %v1047_v58 }
 0x148   :  { %v1049_v54 = vpop.f32.mrf.mxu0  ;;  %v1089_v55 = vpop.f32.mrf.mxu1 }
 0x14a   :  { %v1090_v56 = vpop.f32.mrf.mxu1 }
 0x162   :  { %v1126_v60 = vpop.f32.mrf.mxu0 }
 0x163   :  { %v1127_v62 = vadd.f32 %v1126_v60, %v1086_v59 }
 0x164   :  { %v1128_v63 = vpop.f32.mrf.mxu0 }
 0x165   :  { %v1129_v0 = vadd.f32 %v1128_v63, %v1088_v61  ;;  %v1133_v2 = vmax.f32 %v1127_v62, 0.0 }
 0x166   :  { %v1130_v1 = vpop.f32.mrf.mxu0 }
 0x167   :  { %v1134_v3 = vmax.f32 %v1129_v0, 0.0 }
 0x168   :  { %v1131_v4 = vpop.f32.mrf.mxu0 }
 0x169   :  { %v1302_v5 = vpack.c.bf16 %v1134_v3, %v1133_v2 }
 0x16b   :  { %1143 = vst [vmem:[%s2018_s3] sm:$0xff] %v1302_v5 }

// kernel: convnet_forward.9
= control target key start
LH: loop header
LB: loop body
LE: loop exit
PB: predicated region body
PF: predicated region fallthrough
CT: control target
= control target key end

     0   :  { %s3306_s1 = inlined_call_operand.vmem [shape: bf16[1024,256], index: 1, kind: input, shape index: {}]   ;;  %s3307_s0 = inlined_call_operand.vmem [shape: bf16[8,1024], index: 0, kind: input, shape index: {}]   ;;  %s3308_s3 = inlined_call_operand.vmem [shape: bf16[256,256], index: 3, kind: input, shape index: {}]   ;;  %s3309_s2 = inlined_call_operand.vmem [shape: f32[1,256], index: 2, kind: input, shape index: {}]   ;;  %s3310_s4 = inlined_call_operand.vmem [shape: f32[1,256], index: 4, kind: input, shape index: {}]   ;;  %s3311_s5 = inlined_call_operand.vmem [shape: bf16[256,128], index: 5, kind: input, shape index: {}]   ;;  %s3312_s6 = inlined_call_operand.vmem [shape: f32[1,128], index: 6, kind: input, shape index: {}]   ;;  %s3313_s7 = inlined_call_operand.vmem [shape: f32[8,128], index: 7, kind: output, shape index: {}]  }
   0x1   :  { %v2026_v0 = vld [vmem:[%s3306_s1 + $0x74] ss:$8 sps:$4 sm:$0xff]   ;;  %v2030_v2 = vld [vmem:[%s3306_s1 + $0x70] ss:$8 sps:$4 sm:$0xff]   ;;  %v2032_v4 = vld [vmem:[%s3306_s1 + $0x64] ss:$8 sps:$4 sm:$0xff]  }
   0x2   :  { %v2028_v1 = vld [vmem:[%s3306_s1 + $0x174] ss:$8 sps:$4 sm:$0xff]   ;;  %839 = vmatprep.subr.bf16.mxu0 %v2026_v0  ;;  %v2031_v3 = vld [vmem:[%s3306_s1 + $0x170] ss:$8 sps:$4 sm:$0xff]   ;;  %v2034_v5 = vld [vmem:[%s3306_s1 + $0x164] ss:$8 sps:$4 sm:$0xff]  }
   0x3   :  { %880 = vmatprep.subr.bf16.mxu1 %v2028_v1  ;;  %840 = vmatpush1.bf16.msra.mxu0 %v2030_v2  ;;  %v2036_v6 = vld [vmem:[%s3306_s1 + $0x60] ss:$8 sps:$4 sm:$0xff]   ;;  %v2038_v8 = vld [vmem:[%s3306_s1 + $0x54] ss:$8 sps:$4 sm:$0xff]   ;;  %v2042_v10 = vld [vmem:[%s3306_s1 + $0x50] ss:$8 sps:$4 sm:$0xff]  }
   0x4   :  { %881 = vmatpush1.bf16.msra.mxu1 %v2031_v3  ;;  %841 = vmatprep.subr.bf16.mxu0 %v2032_v4  ;;  %v2037_v7 = vld [vmem:[%s3306_s1 + $0x160] ss:$8 sps:$4 sm:$0xff]   ;;  %v2040_v9 = vld [vmem:[%s3306_s1 + $0x154] ss:$8 sps:$4 sm:$0xff]   ;;  %v2043_v11 = vld [vmem:[%s3306_s1 + $0x150] ss:$8 sps:$4 sm:$0xff]  }
   0x5   :  { %882 = vmatprep.subr.bf16.mxu1 %v2034_v5  ;;  %v2044_v12 = vld [vmem:[%s3306_s1 + $0x44] ss:$8 sps:$4 sm:$0xff]   ;;  %v2048_v14 = vld [vmem:[%s3306_s1 + $0x40] ss:$8 sps:$4 sm:$0xff]   ;;  %v2050_v16 = vld [vmem:[%s3306_s1 + $0x34] ss:$8 sps:$4 sm:$0xff]  }
   0x6   :  { %v2046_v13 = vld [vmem:[%s3306_s1 + $0x144] ss:$8 sps:$4 sm:$0xff]   ;;  %v2049_v15 = vld [vmem:[%s3306_s1 + $0x140] ss:$8 sps:$4 sm:$0xff]   ;;  %v2052_v17 = vld [vmem:[%s3306_s1 + $0x134] ss:$8 sps:$4 sm:$0xff]  }
   0x7   :  { %842 = vmatpush1.bf16.msra.mxu0 %v2036_v6  ;;  %v2054_v18 = vld [vmem:[%s3306_s1 + $0x30] ss:$8 sps:$4 sm:$0xff]   ;;  %v2056_v20 = vld [vmem:[%s3306_s1 + $0x24] ss:$8 sps:$4 sm:$0xff]   ;;  %v2060_v22 = vld [vmem:[%s3306_s1 + $0x20] ss:$8 sps:$4 sm:$0xff]  }
   0x8   :  { %883 = vmatpush1.bf16.msra.mxu1 %v2037_v7  ;;  %843 = vmatprep.subr.bf16.mxu0 %v2038_v8  ;;  %v2055_v19 = vld [vmem:[%s3306_s1 + $0x130] ss:$8 sps:$4 sm:$0xff]   ;;  %v2058_v21 = vld [vmem:[%s3306_s1 + $0x124] ss:$8 sps:$4 sm:$0xff]   ;;  %v2061_v23 = vld [vmem:[%s3306_s1 + $0x120] ss:$8 sps:$4 sm:$0xff]  }
   0x9   :  { %884 = vmatprep.subr.bf16.mxu1 %v2040_v9  ;;  %v2062_v24 = vld [vmem:[%s3306_s1 + $0x14] ss:$8 sps:$4 sm:$0xff]   ;;  %v2066_v26 = vld [vmem:[%s3306_s1 + $0x10] ss:$8 sps:$4 sm:$0xff]   ;;  %v2068_v28 = vld [vmem:[%s3306_s1 + $0x4] ss:$8 sps:$4 sm:$0xff]  }
   0xa   :  { %v2064_v25 = vld [vmem:[%s3306_s1 + $0x114] ss:$8 sps:$4 sm:$0xff]   ;;  %v2067_v27 = vld [vmem:[%s3306_s1 + $0x110] ss:$8 sps:$4 sm:$0xff]   ;;  %v2070_v29 = vld [vmem:[%s3306_s1 + $0x104] ss:$8 sps:$4 sm:$0xff]  }
   0xb   :  { %844 = vmatpush1.bf16.msra.mxu0 %v2042_v10  ;;  %v2072_v30 = vld [vmem:[%s3306_s1] ss:$8 sps:$4 sm:$0xff]   ;;  %v2074_v32 = vld [vmem:[%s3306_s1 + $0xf4] ss:$8 sps:$4 sm:$0xff]   ;;  %v2078_v34 = vld [vmem:[%s3306_s1 + $0xf0] ss:$8 sps:$4 sm:$0xff]  }
   0xc   :  { %885 = vmatpush1.bf16.msra.mxu1 %v2043_v11  ;;  %845 = vmatprep.subr.bf16.mxu0 %v2044_v12  ;;  %v2073_v31 = vld [vmem:[%s3306_s1 + $0x100] ss:$8 sps:$4 sm:$0xff]   ;;  %v2076_v33 = vld [vmem:[%s3306_s1 + $0x1f4] ss:$8 sps:$4 sm:$0xff]   ;;  %v2079_v35 = vld [vmem:[%s3306_s1 + $0x1f0] ss:$8 sps:$4 sm:$0xff]  }
   0xd   :  { %886 = vmatprep.subr.bf16.mxu1 %v2046_v13  ;;  %v2080_v36 = vld [vmem:[%s3306_s1 + $0xe4] ss:$8 sps:$4 sm:$0xff]   ;;  %v2084_v38 = vld [vmem:[%s3306_s1 + $0xe0] ss:$8 sps:$4 sm:$0xff]   ;;  %v2086_v40 = vld [vmem:[%s3306_s1 + $0xd4] ss:$8 sps:$4 sm:$0xff]  }
   0xe   :  { %v2082_v37 = vld [vmem:[%s3306_s1 + $0x1e4] ss:$8 sps:$4 sm:$0xff]   ;;  %v2085_v39 = vld [vmem:[%s3306_s1 + $0x1e0] ss:$8 sps:$4 sm:$0xff]   ;;  %v2088_v41 = vld [vmem:[%s3306_s1 + $0x1d4] ss:$8 sps:$4 sm:$0xff]  }
   0xf   :  { %846 = vmatpush1.bf16.msra.mxu0 %v2048_v14  ;;  %v2090_v42 = vld [vmem:[%s3306_s1 + $0xd0] ss:$8 sps:$4 sm:$0xff]   ;;  %v2092_v44 = vld [vmem:[%s3306_s1 + $0xc4] ss:$8 sps:$4 sm:$0xff]   ;;  %v2096_v49 = vld [vmem:[%s3306_s1 + $0xc0] ss:$8 sps:$4 sm:$0xff]  }
  0x10   :  { %887 = vmatpush1.bf16.msra.mxu1 %v2049_v15  ;;  %847 = vmatprep.subr.bf16.mxu0 %v2050_v16  ;;  %v2091_v43 = vld [vmem:[%s3306_s1 + $0x1d0] ss:$8 sps:$4 sm:$0xff]   ;;  %v2094_v45 = vld [vmem:[%s3306_s1 + $0x1c4] ss:$8 sps:$4 sm:$0xff]   ;;  %v2097_v50 = vld [vmem:[%s3306_s1 + $0x1c0] ss:$8 sps:$4 sm:$0xff]  }
  0x11   :  { %888 = vmatprep.subr.bf16.mxu1 %v2052_v17  ;;  %v27_v46 = vld [vmem:[%s3307_s0] sm:$0xff]  ;;  %v28_v48 = vld [vmem:[%s3307_s0 + $0x8] sm:$0xff]  ;;  %v2098_v52 = vld [vmem:[%s3306_s1 + $0xb4] ss:$8 sps:$4 sm:$0xff]  }
  0x12   :  { %v1820_v47 = vcombine.high %v27_v46, %v27_v46  ;;  %v1822_v51 = vcombine.high %v28_v48, %v28_v48  ;;  %v2100_v53 = vld [vmem:[%s3306_s1 + $0x1b4] ss:$8 sps:$4 sm:$0xff]   ;;  %v2102_v54 = vld [vmem:[%s3306_s1 + $0xb0] ss:$8 sps:$4 sm:$0xff]   ;;  %v2104_v56 = vld [vmem:[%s3306_s1 + $0xa4] ss:$8 sps:$4 sm:$0xff]   ;;  %v1819_v6 = vcombine.low %v27_v46, %v27_v46  ;;  %v1821_v7 = vcombine.low %v28_v48, %v28_v48 }
  0x13   :  { %848 = vmatpush1.bf16.msra.mxu0 %v2054_v18  ;;  %v2103_v55 = vld [vmem:[%s3306_s1 + $0x1b0] ss:$8 sps:$4 sm:$0xff]   ;;  %v2106_v57 = vld [vmem:[%s3306_s1 + $0x1a4] ss:$8 sps:$4 sm:$0xff]   ;;  %v2108_v58 = vld [vmem:[%s3306_s1 + $0xa0] ss:$8 sps:$4 sm:$0xff]  }
  0x14   :  { %889 = vmatpush1.bf16.msra.mxu1 %v2055_v19  ;;  %849 = vmatprep.subr.bf16.mxu0 %v2056_v20  ;;  %v2109_v59 = vld [vmem:[%s3306_s1 + $0x1a0] ss:$8 sps:$4 sm:$0xff]   ;;  %v2110_v60 = vld [vmem:[%s3306_s1 + $0x94] ss:$8 sps:$4 sm:$0xff]   ;;  %v2114_v62 = vld [vmem:[%s3306_s1 + $0x90] ss:$8 sps:$4 sm:$0xff]  }
  0x15   :  { %890 = vmatprep.subr.bf16.mxu1 %v2058_v21  ;;  %871 = vmatprep.mubr.bf16.mxu0 %v1820_v47  ;;  %v2112_v61 = vld [vmem:[%s3306_s1 + $0x194] ss:$8 sps:$4 sm:$0xff]   ;;  %v2115_v63 = vld [vmem:[%s3306_s1 + $0x190] ss:$8 sps:$4 sm:$0xff]   ;;  %v2116_v0 = vld [vmem:[%s3306_s1 + $0x84] ss:$8 sps:$4 sm:$0xff]  }
  0x16   :  { %912 = vmatprep.mubr.bf16.mxu1 %v1822_v51  ;;  %v2118_v1 = vld [vmem:[%s3306_s1 + $0x184] ss:$8 sps:$4 sm:$0xff]   ;;  %v2120_v2 = vld [vmem:[%s3306_s1 + $0x80] ss:$8 sps:$4 sm:$0xff]   ;;  %v2128_v4 = vld [vmem:[%s3306_s1 + $0x274] ss:$8 sps:$4 sm:$0xff]  }
  0x17   :  { %850 = vmatpush1.bf16.msra.mxu0 %v2060_v22  ;;  %v2121_v3 = vld [vmem:[%s3306_s1 + $0x180] ss:$8 sps:$4 sm:$0xff]   ;;  %v2131_v5 = vld [vmem:[%s3306_s1 + $0x374] ss:$8 sps:$4 sm:$0xff]   ;;  %v2126_v8 = vld [vmem:[%s3306_s1 + $0x270] ss:$8 sps:$4 sm:$0xff]  }
  0x18   :  { %891 = vmatpush1.bf16.msra.mxu1 %v2061_v23  ;;  %851 = vmatprep.subr.bf16.mxu0 %v2062_v24  ;;  %v2129_v9 = vld [vmem:[%s3306_s1 + $0x370] ss:$8 sps:$4 sm:$0xff]   ;;  %v2134_v10 = vld [vmem:[%s3306_s1 + $0x264] ss:$8 sps:$4 sm:$0xff]   ;;  %v2132_v12 = vld [vmem:[%s3306_s1 + $0x260] ss:$8 sps:$4 sm:$0xff]  }
  0x19   :  { %892 = vmatprep.subr.bf16.mxu1 %v2064_v25  ;;  %v2137_v11 = vld [vmem:[%s3306_s1 + $0x364] ss:$8 sps:$4 sm:$0xff]   ;;  %v2135_v13 = vld [vmem:[%s3306_s1 + $0x360] ss:$8 sps:$4 sm:$0xff]   ;;  %v2140_v14 = vld [vmem:[%s3306_s1 + $0x254] ss:$8 sps:$4 sm:$0xff]  }
  0x1a   :  { %v2143_v15 = vld [vmem:[%s3306_s1 + $0x354] ss:$8 sps:$4 sm:$0xff]   ;;  %v2138_v16 = vld [vmem:[%s3306_s1 + $0x250] ss:$8 sps:$4 sm:$0xff]   ;;  %v2146_v18 = vld [vmem:[%s3306_s1 + $0x244] ss:$8 sps:$4 sm:$0xff]  }
  0x1b   :  { %852 = vmatpush1.bf16.msra.mxu0 %v2066_v26  ;;  %v2141_v17 = vld [vmem:[%s3306_s1 + $0x350] ss:$8 sps:$4 sm:$0xff]   ;;  %v2149_v19 = vld [vmem:[%s3306_s1 + $0x344] ss:$8 sps:$4 sm:$0xff]   ;;  %v2144_v20 = vld [vmem:[%s3306_s1 + $0x240] ss:$8 sps:$4 sm:$0xff]  }
  0x1c   :  { %893 = vmatpush1.bf16.msra.mxu1 %v2067_v27  ;;  %853 = vmatprep.subr.bf16.mxu0 %v2068_v28  ;;  %v2147_v21 = vld [vmem:[%s3306_s1 + $0x340] ss:$8 sps:$4 sm:$0xff]   ;;  %v2152_v22 = vld [vmem:[%s3306_s1 + $0x234] ss:$8 sps:$4 sm:$0xff]   ;;  %v2150_v24 = vld [vmem:[%s3306_s1 + $0x230] ss:$8 sps:$4 sm:$0xff]  }
  0x1d   :  { %894 = vmatprep.subr.bf16.mxu1 %v2070_v29  ;;  %v2155_v23 = vld [vmem:[%s3306_s1 + $0x334] ss:$8 sps:$4 sm:$0xff]   ;;  %v2153_v25 = vld [vmem:[%s3306_s1 + $0x330] ss:$8 sps:$4 sm:$0xff]   ;;  %v2158_v26 = vld [vmem:[%s3306_s1 + $0x224] ss:$8 sps:$4 sm:$0xff]  }
  0x1e   :  { %v2161_v27 = vld [vmem:[%s3306_s1 + $0x324] ss:$8 sps:$4 sm:$0xff]   ;;  %v2156_v28 = vld [vmem:[%s3306_s1 + $0x220] ss:$8 sps:$4 sm:$0xff]   ;;  %v2191_v51 = vld [vmem:[%s3306_s1 + $0x3d4] ss:$8 sps:$4 sm:$0xff]  }
  0x1f   :  { %854 = vmatpush1.bf16.msra.mxu0 %v2072_v30  ;;  %v2159_v29 = vld [vmem:[%s3306_s1 + $0x320] ss:$8 sps:$4 sm:$0xff]   ;;  %v2164_v30 = vld [vmem:[%s3306_s1 + $0x214] ss:$8 sps:$4 sm:$0xff]   ;;  %v2182_v46 = vld [vmem:[%s3306_s1 + $0x2e4] ss:$8 sps:$4 sm:$0xff]  }
  0x20   :  { %895 = vmatpush1.bf16.msra.mxu1 %v2073_v31  ;;  %855 = vmatprep.subr.bf16.mxu0 %v2074_v32  ;;  %v2167_v31 = vld [vmem:[%s3306_s1 + $0x314] ss:$8 sps:$4 sm:$0xff]   ;;  %v2185_v47 = vld [vmem:[%s3306_s1 + $0x3e4] ss:$8 sps:$4 sm:$0xff]   ;;  %v2180_v48 = vld [vmem:[%s3306_s1 + $0x2e0] ss:$8 sps:$4 sm:$0xff]  }
  0x21   :  { %896 = vmatprep.subr.bf16.mxu1 %v2076_v33  ;;  %v2609_v32 = vld [vmem:[%s3307_s0 + $0x10] sm:$0xff]  ;;  %v2614_v33 = vld [vmem:[%s3307_s0 + $0x18] sm:$0xff] }
  0x23   :  { %856 = vmatpush2.bf16.msra.mxu0 %v2078_v34  ;;  %v1824_v34 = vcombine.high %v2609_v32, %v2609_v32 }
  0x24   :  { %897 = vmatpush2.bf16.msra.mxu1 %v2079_v35  ;;  %857 = vmatprep.subr.bf16.mxu0 %v2080_v36  ;;  %v1826_v35 = vcombine.high %v2614_v33, %v2614_v33  ;;  %v2162_v36 = vld [vmem:[%s3306_s1 + $0x210] ss:$8 sps:$4 sm:$0xff]  }
  0x25   :  { %898 = vmatprep.subr.bf16.mxu1 %v2082_v37  ;;  %v2165_v37 = vld [vmem:[%s3306_s1 + $0x310] ss:$8 sps:$4 sm:$0xff]  }
  0x27   :  { %858 = vmatpush2.bf16.msra.mxu0 %v2084_v38  ;;  %v2170_v38 = vld [vmem:[%s3306_s1 + $0x204] ss:$8 sps:$4 sm:$0xff]  }
  0x28   :  { %899 = vmatpush2.bf16.msra.mxu1 %v2085_v39  ;;  %859 = vmatprep.subr.bf16.mxu0 %v2086_v40  ;;  %v2173_v39 = vld [vmem:[%s3306_s1 + $0x304] ss:$8 sps:$4 sm:$0xff]   ;;  %v2168_v40 = vld [vmem:[%s3306_s1 + $0x200] ss:$8 sps:$4 sm:$0xff]  }
  0x29   :  { %900 = vmatprep.subr.bf16.mxu1 %v2088_v41  ;;  %v2171_v41 = vld [vmem:[%s3306_s1 + $0x300] ss:$8 sps:$4 sm:$0xff]  }
  0x2b   :  { %860 = vmatpush2.bf16.msra.mxu0 %v2090_v42  ;;  %v2176_v42 = vld [vmem:[%s3306_s1 + $0x2f4] ss:$8 sps:$4 sm:$0xff]  }
  0x2c   :  { %901 = vmatpush2.bf16.msra.mxu1 %v2091_v43  ;;  %861 = vmatprep.subr.bf16.mxu0 %v2092_v44  ;;  %v2179_v43 = vld [vmem:[%s3306_s1 + $0x3f4] ss:$8 sps:$4 sm:$0xff]   ;;  %v2174_v44 = vld [vmem:[%s3306_s1 + $0x2f0] ss:$8 sps:$4 sm:$0xff]  }
  0x2d   :  { %902 = vmatprep.subr.bf16.mxu1 %v2094_v45  ;;  %v2177_v45 = vld [vmem:[%s3306_s1 + $0x3f0] ss:$8 sps:$4 sm:$0xff]  }
  0x2f   :  { %862 = vmatpush2.bf16.msra.mxu0 %v2096_v49  ;;  %v2183_v49 = vld [vmem:[%s3306_s1 + $0x3e0] ss:$8 sps:$4 sm:$0xff]  }
  0x30   :  { %903 = vmatpush2.bf16.msra.mxu1 %v2097_v50  ;;  %863 = vmatprep.subr.bf16.mxu0 %v2098_v52  ;;  %v2188_v50 = vld [vmem:[%s3306_s1 + $0x2d4] ss:$8 sps:$4 sm:$0xff]   ;;  %v2186_v52 = vld [vmem:[%s3306_s1 + $0x2d0] ss:$8 sps:$4 sm:$0xff]  }
  0x31   :  { %904 = vmatprep.subr.bf16.mxu1 %v2100_v53  ;;  %v2189_v53 = vld [vmem:[%s3306_s1 + $0x3d0] ss:$8 sps:$4 sm:$0xff]  }
  0x33   :  { %864 = vmatpush2.bf16.msra.mxu0 %v2102_v54  ;;  %v2194_v54 = vld [vmem:[%s3306_s1 + $0x2c4] ss:$8 sps:$4 sm:$0xff]  }
  0x34   :  { %905 = vmatpush2.bf16.msra.mxu1 %v2103_v55  ;;  %865 = vmatprep.subr.bf16.mxu0 %v2104_v56  ;;  %v2197_v55 = vld [vmem:[%s3306_s1 + $0x3c4] ss:$8 sps:$4 sm:$0xff]   ;;  %v2192_v56 = vld [vmem:[%s3306_s1 + $0x2c0] ss:$8 sps:$4 sm:$0xff]  }
  0x35   :  { %906 = vmatprep.subr.bf16.mxu1 %v2106_v57  ;;  %v2195_v57 = vld [vmem:[%s3306_s1 + $0x3c0] ss:$8 sps:$4 sm:$0xff]  }
  0x37   :  { %866 = vmatpush2.bf16.msra.mxu0 %v2108_v58  ;;  %v2200_v58 = vld [vmem:[%s3306_s1 + $0x2b4] ss:$8 sps:$4 sm:$0xff]  }
  0x38   :  { %907 = vmatpush2.bf16.msra.mxu1 %v2109_v59  ;;  %867 = vmatprep.subr.bf16.mxu0 %v2110_v60  ;;  %v2203_v59 = vld [vmem:[%s3306_s1 + $0x3b4] ss:$8 sps:$4 sm:$0xff]   ;;  %v2198_v60 = vld [vmem:[%s3306_s1 + $0x2b0] ss:$8 sps:$4 sm:$0xff]  }
  0x39   :  { %908 = vmatprep.subr.bf16.mxu1 %v2112_v61  ;;  %v2201_v61 = vld [vmem:[%s3306_s1 + $0x3b0] ss:$8 sps:$4 sm:$0xff]  }
  0x3b   :  { %868 = vmatpush2.bf16.msra.mxu0 %v2114_v62  ;;  %v2206_v62 = vld [vmem:[%s3306_s1 + $0x2a4] ss:$8 sps:$4 sm:$0xff]  }
  0x3c   :  { %909 = vmatpush2.bf16.msra.mxu1 %v2115_v63  ;;  %869 = vmatprep.subr.bf16.mxu0 %v2116_v0  ;;  %v2209_v63 = vld [vmem:[%s3306_s1 + $0x3a4] ss:$8 sps:$4 sm:$0xff]   ;;  %v2204_v0 = vld [vmem:[%s3306_s1 + $0x2a0] ss:$8 sps:$4 sm:$0xff]  }
  0x3d   :  { %910 = vmatprep.subr.bf16.mxu1 %v2118_v1  ;;  %v2207_v1 = vld [vmem:[%s3306_s1 + $0x3a0] ss:$8 sps:$4 sm:$0xff]  }
  0x3f   :  { %870 = vmatpush2.bf16.msra.mxu0 %v2120_v2  ;;  %v2212_v2 = vld [vmem:[%s3306_s1 + $0x294] ss:$8 sps:$4 sm:$0xff]  }
  0x40   :  { %911 = vmatpush2.bf16.msra.mxu1 %v2121_v3  ;;  %921 = vmatprep.subr.bf16.mxu0 %v2128_v4  ;;  %v2215_v3 = vld [vmem:[%s3306_s1 + $0x394] ss:$8 sps:$4 sm:$0xff]   ;;  %v2210_v4 = vld [vmem:[%s3306_s1 + $0x290] ss:$8 sps:$4 sm:$0xff]  }
  0x41   :  { %962 = vmatprep.subr.bf16.mxu1 %v2131_v5  ;;  %v2213_v5 = vld [vmem:[%s3306_s1 + $0x390] ss:$8 sps:$4 sm:$0xff]  }
  0x42   :  { %872 = vmatmul.mubr.bf16.vlgmr.msra.gmra.mxu0 %v1819_v6  ;;  %v2218_v6 = vld [vmem:[%s3306_s1 + $0x284] ss:$8 sps:$4 sm:$0xff]  }
  0x43   :  { %913 = vmatmul.mubr.bf16.vlgmr.msra.gmra.mxu1 %v1821_v7  ;;  %922 = vmatpush1.bf16.msra.mxu0 %v2126_v8  ;;  %v2221_v7 = vld [vmem:[%s3306_s1 + $0x384] ss:$8 sps:$4 sm:$0xff]   ;;  %v2216_v8 = vld [vmem:[%s3306_s1 + $0x280] ss:$8 sps:$4 sm:$0xff]  }
  0x44   :  { %963 = vmatpush1.bf16.msra.mxu1 %v2129_v9  ;;  %923 = vmatprep.subr.bf16.mxu0 %v2134_v10  ;;  %v2219_v9 = vld [vmem:[%s3306_s1 + $0x380] ss:$8 sps:$4 sm:$0xff]   ;;  %v1823_v10 = vcombine.low %v2609_v32, %v2609_v32  ;;  %v2878_v32 = vld [vmem:[%s3308_s3 + $0xd4] ss:$8 sps:$4 sm:$0xff]  }
  0x45   :  { %964 = vmatprep.subr.bf16.mxu1 %v2137_v11  ;;  %953 = vmatprep.mubr.bf16.mxu0 %v1824_v34  ;;  %v1825_v11 = vcombine.low %v2614_v33, %v2614_v33  ;;  %v2885_v33 = vld [vmem:[%s3308_s3 + $0xd0] ss:$8 sps:$4 sm:$0xff]   ;;  %v2892_v34 = vld [vmem:[%s3308_s3 + $0xc4] ss:$8 sps:$4 sm:$0xff]  }
  0x46   :  { %994 = vmatprep.mubr.bf16.mxu1 %v1826_v35  ;;  %v2899_v35 = vld [vmem:[%s3308_s3 + $0xc0] ss:$8 sps:$4 sm:$0xff]  }
  0x47   :  { %924 = vmatpush1.bf16.msra.mxu0 %v2132_v12  ;;  %v2741_v12 = vld [vmem:[%s3308_s3 + $0x74] ss:$8 sps:$4 sm:$0xff]  }
  0x48   :  { %965 = vmatpush1.bf16.msra.mxu1 %v2135_v13  ;;  %925 = vmatprep.subr.bf16.mxu0 %v2140_v14  ;;  %v2746_v13 = vld [vmem:[%s3308_s3 + $0x70] ss:$8 sps:$4 sm:$0xff]   ;;  %v2752_v14 = vld [vmem:[%s3308_s3 + $0x64] ss:$8 sps:$4 sm:$0xff]  }
  0x49   :  { %966 = vmatprep.subr.bf16.mxu1 %v2143_v15  ;;  %v2759_v15 = vld [vmem:[%s3308_s3 + $0x60] ss:$8 sps:$4 sm:$0xff]  }
  0x4b   :  { %926 = vmatpush1.bf16.msra.mxu0 %v2138_v16  ;;  %v2766_v16 = vld [vmem:[%s3308_s3 + $0x54] ss:$8 sps:$4 sm:$0xff]  }
  0x4c   :  { %967 = vmatpush1.bf16.msra.mxu1 %v2141_v17  ;;  %927 = vmatprep.subr.bf16.mxu0 %v2146_v18  ;;  %v2773_v17 = vld [vmem:[%s3308_s3 + $0x50] ss:$8 sps:$4 sm:$0xff]   ;;  %v2780_v18 = vld [vmem:[%s3308_s3 + $0x44] ss:$8 sps:$4 sm:$0xff]  }
  0x4d   :  { %968 = vmatprep.subr.bf16.mxu1 %v2149_v19  ;;  %v2787_v19 = vld [vmem:[%s3308_s3 + $0x40] ss:$8 sps:$4 sm:$0xff]  }
  0x4f   :  { %928 = vmatpush1.bf16.msra.mxu0 %v2144_v20  ;;  %v2794_v20 = vld [vmem:[%s3308_s3 + $0x34] ss:$8 sps:$4 sm:$0xff]  }
  0x50   :  { %969 = vmatpush1.bf16.msra.mxu1 %v2147_v21  ;;  %929 = vmatprep.subr.bf16.mxu0 %v2152_v22  ;;  %v2801_v21 = vld [vmem:[%s3308_s3 + $0x30] ss:$8 sps:$4 sm:$0xff]   ;;  %v2808_v22 = vld [vmem:[%s3308_s3 + $0x24] ss:$8 sps:$4 sm:$0xff]  }
  0x51   :  { %970 = vmatprep.subr.bf16.mxu1 %v2155_v23  ;;  %v2814_v23 = vld [vmem:[%s3308_s3 + $0x20] ss:$8 sps:$4 sm:$0xff]  }
  0x53   :  { %930 = vmatpush1.bf16.msra.mxu0 %v2150_v24  ;;  %v2822_v24 = vld [vmem:[%s3308_s3 + $0x14] ss:$8 sps:$4 sm:$0xff]  }
  0x54   :  { %971 = vmatpush1.bf16.msra.mxu1 %v2153_v25  ;;  %931 = vmatprep.subr.bf16.mxu0 %v2158_v26  ;;  %v2829_v25 = vld [vmem:[%s3308_s3 + $0x10] ss:$8 sps:$4 sm:$0xff]   ;;  %v2836_v26 = vld [vmem:[%s3308_s3 + $0x4] ss:$8 sps:$4 sm:$0xff]  }
  0x55   :  { %972 = vmatprep.subr.bf16.mxu1 %v2161_v27  ;;  %v2843_v27 = vld [vmem:[%s3308_s3] ss:$8 sps:$4 sm:$0xff]  }
  0x57   :  { %932 = vmatpush1.bf16.msra.mxu0 %v2156_v28  ;;  %v2850_v28 = vld [vmem:[%s3308_s3 + $0xf4] ss:$8 sps:$4 sm:$0xff]  }
  0x58   :  { %973 = vmatpush1.bf16.msra.mxu1 %v2159_v29  ;;  %933 = vmatprep.subr.bf16.mxu0 %v2164_v30  ;;  %v2857_v29 = vld [vmem:[%s3308_s3 + $0xf0] ss:$8 sps:$4 sm:$0xff]   ;;  %v2864_v30 = vld [vmem:[%s3308_s3 + $0xe4] ss:$8 sps:$4 sm:$0xff]  }
  0x59   :  { %974 = vmatprep.subr.bf16.mxu1 %v2167_v31  ;;  %v2871_v31 = vld [vmem:[%s3308_s3 + $0xe0] ss:$8 sps:$4 sm:$0xff]  }
  0x5b   :  { %934 = vmatpush1.bf16.msra.mxu0 %v2162_v36  ;;  %v2906_v36 = vld [vmem:[%s3308_s3 + $0xb4] ss:$8 sps:$4 sm:$0xff]  }
  0x5c   :  { %975 = vmatpush1.bf16.msra.mxu1 %v2165_v37  ;;  %935 = vmatprep.subr.bf16.mxu0 %v2170_v38  ;;  %v2913_v37 = vld [vmem:[%s3308_s3 + $0xb0] ss:$8 sps:$4 sm:$0xff]   ;;  %v2920_v38 = vld [vmem:[%s3308_s3 + $0xa4] ss:$8 sps:$4 sm:$0xff]  }
  0x5d   :  { %976 = vmatprep.subr.bf16.mxu1 %v2173_v39  ;;  %v2927_v39 = vld [vmem:[%s3308_s3 + $0xa0] ss:$8 sps:$4 sm:$0xff]  }
  0x5f   :  { %936 = vmatpush1.bf16.msra.mxu0 %v2168_v40  ;;  %v2937_v40 = vld [vmem:[%s3308_s3 + $0x94] ss:$8 sps:$4 sm:$0xff]  }
  0x60   :  { %977 = vmatpush1.bf16.msra.mxu1 %v2171_v41  ;;  %937 = vmatprep.subr.bf16.mxu0 %v2176_v42  ;;  %v2942_v41 = vld [vmem:[%s3308_s3 + $0x90] ss:$8 sps:$4 sm:$0xff]   ;;  %v2951_v42 = vld [vmem:[%s3308_s3 + $0x84] ss:$8 sps:$4 sm:$0xff]  }
  0x61   :  { %978 = vmatprep.subr.bf16.mxu1 %v2179_v43  ;;  %v2956_v43 = vld [vmem:[%s3308_s3 + $0x80] ss:$8 sps:$4 sm:$0xff]  }
  0x63   :  { %938 = vmatpush2.bf16.msra.mxu0 %v2174_v44 }
  0x64   :  { %979 = vmatpush2.bf16.msra.mxu1 %v2177_v45  ;;  %939 = vmatprep.subr.bf16.mxu0 %v2182_v46 }
  0x65   :  { %980 = vmatprep.subr.bf16.mxu1 %v2185_v47 }
  0x67   :  { %940 = vmatpush2.bf16.msra.mxu0 %v2180_v48 }
  0x68   :  { %981 = vmatpush2.bf16.msra.mxu1 %v2183_v49  ;;  %941 = vmatprep.subr.bf16.mxu0 %v2188_v50 }
  0x69   :  { %982 = vmatprep.subr.bf16.mxu1 %v2191_v51 }
  0x6b   :  { %942 = vmatpush2.bf16.msra.mxu0 %v2186_v52  ;;  %v161_v52 = vlaneseq }
  0x6c   :  { %983 = vmatpush2.bf16.msra.mxu1 %v2189_v53  ;;  %943 = vmatprep.subr.bf16.mxu0 %v2194_v54 }
  0x6d   :  { %984 = vmatprep.subr.bf16.mxu1 %v2197_v55  ;;  %v2964_v53 = vshrl.u32 %v161_v52, 7  ;;  %v159_v55 = vld [vmem:[%s3309_s2] sm:$0x3] }
  0x6f   :  { %944 = vmatpush2.bf16.msra.mxu0 %v2192_v56  ;;  %v163_v54 = vsub.s32 0, %v2964_v53  ;;  %v167_v56 = vsub.s32 1, %v2964_v53 }
  0x70   :  { %985 = vmatpush2.bf16.msra.mxu1 %v2195_v57  ;;  %945 = vmatprep.subr.bf16.mxu0 %v2200_v58 }
  0x71   :  { %986 = vmatprep.subr.bf16.mxu1 %v2203_v59  ;;  %v164_v57 = vrot.slane %v159_v55, %v163_v54  ;;  %v168_v58 = vrot.slane %v159_v55, %v167_v56 }
  0x73   :  { %946 = vmatpush2.bf16.msra.mxu0 %v2198_v60 }
  0x74   :  { %987 = vmatpush2.bf16.msra.mxu1 %v2201_v61  ;;  %947 = vmatprep.subr.bf16.mxu0 %v2206_v62 }
  0x75   :  { %988 = vmatprep.subr.bf16.mxu1 %v2209_v63 }
  0x77   :  { %948 = vmatpush2.bf16.msra.mxu0 %v2204_v0 }
  0x78   :  { %989 = vmatpush2.bf16.msra.mxu1 %v2207_v1  ;;  %949 = vmatprep.subr.bf16.mxu0 %v2212_v2 }
  0x79   :  { %990 = vmatprep.subr.bf16.mxu1 %v2215_v3 }
  0x7b   :  { %950 = vmatpush2.bf16.msra.mxu0 %v2210_v4 }
  0x7c   :  { %991 = vmatpush2.bf16.msra.mxu1 %v2213_v5  ;;  %951 = vmatprep.subr.bf16.mxu0 %v2218_v6 }
  0x7d   :  { %992 = vmatprep.subr.bf16.mxu1 %v2221_v7 }
  0x7f   :  { %952 = vmatpush2.bf16.msra.mxu0 %v2216_v8 }
  0x80   :  { %993 = vmatpush2.bf16.msra.mxu1 %v2219_v9  ;;  %1209 = vmatprep.subr.bf16.mxu0 %v2741_v12 }
  0x81   :  { %1252 = vmatprep.subr.bf16.mxu1 %v2741_v12 }
  0x82   :  { %954 = vmatmul.mubr.bf16.vlgmr.msra.gmra.mxu0 %v1823_v10 }
  0x83   :  { %995 = vmatmul.mubr.bf16.vlgmr.msra.gmra.mxu1 %v1825_v11  ;;  %1210 = vmatpush1.bf16.msra.mxu0 %v2746_v13 }
  0x84   :  { %1253 = vmatpush1.bf16.msra.mxu1 %v2746_v13  ;;  %1211 = vmatprep.subr.bf16.mxu0 %v2752_v14 }
  0x85   :  { %1254 = vmatprep.subr.bf16.mxu1 %v2752_v14 }
  0x87   :  { %1212 = vmatpush1.bf16.msra.mxu0 %v2759_v15 }
  0x88   :  { %1255 = vmatpush1.bf16.msra.mxu1 %v2759_v15  ;;  %1213 = vmatprep.subr.bf16.mxu0 %v2766_v16 }
  0x89   :  { %1256 = vmatprep.subr.bf16.mxu1 %v2766_v16 }
  0x8b   :  { %1214 = vmatpush1.bf16.msra.mxu0 %v2773_v17 }
  0x8c   :  { %1257 = vmatpush1.bf16.msra.mxu1 %v2773_v17  ;;  %1215 = vmatprep.subr.bf16.mxu0 %v2780_v18 }
  0x8d   :  { %1258 = vmatprep.subr.bf16.mxu1 %v2780_v18 }
  0x8f   :  { %1216 = vmatpush1.bf16.msra.mxu0 %v2787_v19 }
  0x90   :  { %1259 = vmatpush1.bf16.msra.mxu1 %v2787_v19  ;;  %1217 = vmatprep.subr.bf16.mxu0 %v2794_v20 }
  0x91   :  { %1260 = vmatprep.subr.bf16.mxu1 %v2794_v20 }
  0x93   :  { %1218 = vmatpush1.bf16.msra.mxu0 %v2801_v21 }
  0x94   :  { %1261 = vmatpush1.bf16.msra.mxu1 %v2801_v21  ;;  %1219 = vmatprep.subr.bf16.mxu0 %v2808_v22 }
  0x95   :  { %1262 = vmatprep.subr.bf16.mxu1 %v2808_v22 }
  0x97   :  { %1220 = vmatpush1.bf16.msra.mxu0 %v2814_v23 }
  0x98   :  { %1263 = vmatpush1.bf16.msra.mxu1 %v2814_v23  ;;  %1221 = vmatprep.subr.bf16.mxu0 %v2822_v24 }
  0x99   :  { %1264 = vmatprep.subr.bf16.mxu1 %v2822_v24 }
  0x9b   :  { %1222 = vmatpush1.bf16.msra.mxu0 %v2829_v25 }
  0x9c   :  { %1265 = vmatpush1.bf16.msra.mxu1 %v2829_v25  ;;  %1223 = vmatprep.subr.bf16.mxu0 %v2836_v26 }
  0x9d   :  { %1266 = vmatprep.subr.bf16.mxu1 %v2836_v26 }
  0x9f   :  { %1224 = vmatpush1.bf16.msra.mxu0 %v2843_v27 }
  0xa0   :  { %1267 = vmatpush1.bf16.msra.mxu1 %v2843_v27  ;;  %1225 = vmatprep.subr.bf16.mxu0 %v2850_v28 }
  0xa1   :  { %1268 = vmatprep.subr.bf16.mxu1 %v2850_v28 }
  0xa3   :  { %1226 = vmatpush2.bf16.msra.mxu0 %v2857_v29 }
  0xa4   :  { %1269 = vmatpush2.bf16.msra.mxu1 %v2857_v29  ;;  %1227 = vmatprep.subr.bf16.mxu0 %v2864_v30 }
  0xa5   :  { %1270 = vmatprep.subr.bf16.mxu1 %v2864_v30 }
  0xa7   :  { %1228 = vmatpush2.bf16.msra.mxu0 %v2871_v31 }
  0xa8   :  { %1271 = vmatpush2.bf16.msra.mxu1 %v2871_v31  ;;  %1229 = vmatprep.subr.bf16.mxu0 %v2878_v32 }
  0xa9   :  { %1272 = vmatprep.subr.bf16.mxu1 %v2878_v32 }
  0xab   :  { %1230 = vmatpush2.bf16.msra.mxu0 %v2885_v33 }
  0xac   :  { %1273 = vmatpush2.bf16.msra.mxu1 %v2885_v33  ;;  %1231 = vmatprep.subr.bf16.mxu0 %v2892_v34 }
  0xad   :  { %1274 = vmatprep.subr.bf16.mxu1 %v2892_v34 }
  0xaf   :  { %1232 = vmatpush2.bf16.msra.mxu0 %v2899_v35 }
  0xb0   :  { %1275 = vmatpush2.bf16.msra.mxu1 %v2899_v35  ;;  %1233 = vmatprep.subr.bf16.mxu0 %v2906_v36 }
  0xb1   :  { %1276 = vmatprep.subr.bf16.mxu1 %v2906_v36 }
  0xb3   :  { %1234 = vmatpush2.bf16.msra.mxu0 %v2913_v37 }
  0xb4   :  { %1277 = vmatpush2.bf16.msra.mxu1 %v2913_v37  ;;  %1235 = vmatprep.subr.bf16.mxu0 %v2920_v38 }
  0xb5   :  { %1278 = vmatprep.subr.bf16.mxu1 %v2920_v38 }
  0xb7   :  { %1236 = vmatpush2.bf16.msra.mxu0 %v2927_v39 }
  0xb8   :  { %1279 = vmatpush2.bf16.msra.mxu1 %v2927_v39  ;;  %1237 = vmatprep.subr.bf16.mxu0 %v2937_v40 }
  0xb9   :  { %1280 = vmatprep.subr.bf16.mxu1 %v2937_v40 }
  0xbb   :  { %1238 = vmatpush2.bf16.msra.mxu0 %v2942_v41 }
  0xbc   :  { %1281 = vmatpush2.bf16.msra.mxu1 %v2942_v41  ;;  %1239 = vmatprep.subr.bf16.mxu0 %v2951_v42 }
  0xbd   :  { %1282 = vmatprep.subr.bf16.mxu1 %v2951_v42 }
  0xbf   :  { %1240 = vmatpush2.bf16.msra.mxu0 %v2956_v43 }
  0xc0   :  { %1283 = vmatpush2.bf16.msra.mxu1 %v2956_v43  ;;  %1295 = vmatprep.subr.bf16.mxu0 %v2741_v12 }
  0xc1   :  { %1338 = vmatprep.subr.bf16.mxu1 %v2741_v12 }
 0x102   :  { %v873_v44 = vpop.f32.mrf.mxu0 }
 0x103   :  { %v914_v45 = vpop.f32.mrf.mxu1  ;;  %v874_v59 = vadd.f32 %v873_v44, %v164_v57  ;;  %v1035_v44 = vld [vmem:[%s3310_s4] sm:$0x3] }
 0x104   :  { %v875_v46 = vpop.f32.mrf.mxu0 }
 0x105   :  { %v916_v47 = vpop.f32.mrf.mxu1  ;;  %v876_v60 = vadd.f32 %v875_v46, %v168_v58  ;;  %v915_v61 = vadd.f32 %v914_v45, %v874_v59  ;;  %v3006_v45 = vrot.slane %v1035_v44, %v163_v54  ;;  %v3008_v46 = vrot.slane %v1035_v44, %v167_v56 }
 0x106   :  { %v877_v48 = vpop.f32.mrf.mxu0 }
 0x107   :  { %v918_v49 = vpop.f32.mrf.mxu1  ;;  %v917_v0 = vadd.f32 %v916_v47, %v876_v60 }
 0x108   :  { %v878_v50 = vpop.f32.mrf.mxu0 }
 0x109   :  { %v919_v51 = vpop.f32.mrf.mxu1 }
 0x142   :  { %v955_v62 = vpop.f32.mrf.mxu0 }
 0x143   :  { %v996_v63 = vpop.f32.mrf.mxu1  ;;  %v956_v1 = vadd.f32 %v955_v62, %v915_v61 }
 0x144   :  { %v957_v2 = vpop.f32.mrf.mxu0 }
 0x145   :  { %v998_v3 = vpop.f32.mrf.mxu1  ;;  %v958_v4 = vadd.f32 %v957_v2, %v917_v0  ;;  %v997_v5 = vadd.f32 %v996_v63, %v956_v1 }
 0x146   :  { %v959_v6 = vpop.f32.mrf.mxu0 }
 0x147   :  { %v1000_v7 = vpop.f32.mrf.mxu1  ;;  %v999_v8 = vadd.f32 %v998_v3, %v958_v4  ;;  %v1036_v48 = vpack.c.bf16 %v997_v5, %v997_v5 }
 0x148   :  { %v960_v9 = vpop.f32.mrf.mxu0 }
 0x149   :  { %v1001_v10 = vpop.f32.mrf.mxu1  ;;  %v1037_v11 = vpack.c.bf16 %v999_v8, %v999_v8 }
 0x14b   :  { %1241 = vmatprep.mubr.bf16.mxu0 %v1037_v11 }
 0x14c   :  { %1242 = vmatmul.mubr.bf16.vlgmr.msra.gmra.mxu0 %v1036_v48 }
 0x14d   :  { %1296 = vmatpush1.bf16.msra.mxu0 %v2746_v13 }
 0x14e   :  { %1297 = vmatprep.subr.bf16.mxu0 %v2752_v14 }
 0x151   :  { %1298 = vmatpush1.bf16.msra.mxu0 %v2759_v15 }
 0x152   :  { %1299 = vmatprep.subr.bf16.mxu0 %v2766_v16 }
 0x155   :  { %1300 = vmatpush1.bf16.msra.mxu0 %v2773_v17 }
 0x156   :  { %1301 = vmatprep.subr.bf16.mxu0 %v2780_v18 }
 0x159   :  { %1302 = vmatpush1.bf16.msra.mxu0 %v2787_v19 }
 0x15a   :  { %1303 = vmatprep.subr.bf16.mxu0 %v2794_v20 }
 0x15d   :  { %1304 = vmatpush1.bf16.msra.mxu0 %v2801_v21 }
 0x15e   :  { %1305 = vmatprep.subr.bf16.mxu0 %v2808_v22 }
 0x161   :  { %1306 = vmatpush1.bf16.msra.mxu0 %v2814_v23 }
 0x162   :  { %1307 = vmatprep.subr.bf16.mxu0 %v2822_v24 }
 0x165   :  { %1308 = vmatpush1.bf16.msra.mxu0 %v2829_v25 }
 0x166   :  { %1309 = vmatprep.subr.bf16.mxu0 %v2836_v26 }
 0x169   :  { %1310 = vmatpush1.bf16.msra.mxu0 %v2843_v27 }
 0x16a   :  { %1311 = vmatprep.subr.bf16.mxu0 %v2850_v28 }
 0x16d   :  { %1312 = vmatpush2.bf16.msra.mxu0 %v2857_v29 }
 0x16e   :  { %1313 = vmatprep.subr.bf16.mxu0 %v2864_v30 }
 0x171   :  { %1314 = vmatpush2.bf16.msra.mxu0 %v2871_v31 }
 0x172   :  { %1315 = vmatprep.subr.bf16.mxu0 %v2878_v32 }
 0x175   :  { %1316 = vmatpush2.bf16.msra.mxu0 %v2885_v33 }
 0x176   :  { %1317 = vmatprep.subr.bf16.mxu0 %v2892_v34 }
 0x179   :  { %1318 = vmatpush2.bf16.msra.mxu0 %v2899_v35 }
 0x17a   :  { %1319 = vmatprep.subr.bf16.mxu0 %v2906_v36 }
 0x17d   :  { %1320 = vmatpush2.bf16.msra.mxu0 %v2913_v37 }
 0x17e   :  { %1321 = vmatprep.subr.bf16.mxu0 %v2920_v38 }
 0x181   :  { %1322 = vmatpush2.bf16.msra.mxu0 %v2927_v39 }
 0x182   :  { %1323 = vmatprep.subr.bf16.mxu0 %v2937_v40 }
 0x185   :  { %1324 = vmatpush2.bf16.msra.mxu0 %v2942_v41 }
 0x186   :  { %1325 = vmatprep.subr.bf16.mxu0 %v2951_v42 }
 0x189   :  { %1326 = vmatpush2.bf16.msra.mxu0 %v2956_v43 }
 0x18a   :  { %1381 = vmatprep.subr.bf16.mxu0 %v2741_v12 }
 0x20c   :  { %v1243_v47 = vpop.f32.mrf.mxu0 }
 0x20d   :  { %v1244_v49 = vadd.f32 %v1243_v47, %v3006_v45 }
 0x20e   :  { %v1245_v50 = vpop.f32.mrf.mxu0 }
 0x20f   :  { %v1246_v51 = vadd.f32 %v1245_v50, %v3008_v46  ;;  %v1250_v55 = vpack.c.bf16 %v1244_v49, %v1244_v49 }
 0x210   :  { %v1247_v52 = vpop.f32.mrf.mxu0 }
 0x211   :  { %v1251_v53 = vpack.c.bf16 %v1246_v51, %v1246_v51 }
 0x212   :  { %v1248_v57 = vpop.f32.mrf.mxu0 }
 0x213   :  { %1284 = vmatprep.mubr.bf16.mxu1 %v1251_v53 }
 0x214   :  { %1285 = vmatmul.mubr.bf16.vlgmr.msra.gmra.mxu1 %v1250_v55 }
 0x215   :  { %1339 = vmatpush1.bf16.msra.mxu1 %v2746_v13 }
 0x216   :  { %1340 = vmatprep.subr.bf16.mxu1 %v2752_v14 }
 0x219   :  { %1341 = vmatpush1.bf16.msra.mxu1 %v2759_v15 }
 0x21a   :  { %1342 = vmatprep.subr.bf16.mxu1 %v2766_v16 }
 0x21d   :  { %1343 = vmatpush1.bf16.msra.mxu1 %v2773_v17 }
 0x21e   :  { %1344 = vmatprep.subr.bf16.mxu1 %v2780_v18 }
 0x221   :  { %1345 = vmatpush1.bf16.msra.mxu1 %v2787_v19 }
 0x222   :  { %1346 = vmatprep.subr.bf16.mxu1 %v2794_v20 }
 0x225   :  { %1347 = vmatpush1.bf16.msra.mxu1 %v2801_v21 }
 0x226   :  { %1348 = vmatprep.subr.bf16.mxu1 %v2808_v22 }
 0x229   :  { %1349 = vmatpush1.bf16.msra.mxu1 %v2814_v23 }
 0x22a   :  { %1350 = vmatprep.subr.bf16.mxu1 %v2822_v24 }
 0x22d   :  { %1351 = vmatpush1.bf16.msra.mxu1 %v2829_v25 }
 0x22e   :  { %1352 = vmatprep.subr.bf16.mxu1 %v2836_v26 }
 0x231   :  { %1353 = vmatpush1.bf16.msra.mxu1 %v2843_v27 }
 0x232   :  { %1354 = vmatprep.subr.bf16.mxu1 %v2850_v28 }
 0x235   :  { %1355 = vmatpush2.bf16.msra.mxu1 %v2857_v29 }
 0x236   :  { %1356 = vmatprep.subr.bf16.mxu1 %v2864_v30 }
 0x239   :  { %1357 = vmatpush2.bf16.msra.mxu1 %v2871_v31 }
 0x23a   :  { %1358 = vmatprep.subr.bf16.mxu1 %v2878_v32 }
 0x23d   :  { %1359 = vmatpush2.bf16.msra.mxu1 %v2885_v33 }
 0x23e   :  { %1360 = vmatprep.subr.bf16.mxu1 %v2892_v34 }
 0x241   :  { %1361 = vmatpush2.bf16.msra.mxu1 %v2899_v35 }
 0x242   :  { %1362 = vmatprep.subr.bf16.mxu1 %v2906_v36 }
 0x245   :  { %1363 = vmatpush2.bf16.msra.mxu1 %v2913_v37 }
 0x246   :  { %1364 = vmatprep.subr.bf16.mxu1 %v2920_v38 }
 0x249   :  { %1365 = vmatpush2.bf16.msra.mxu1 %v2927_v39 }
 0x24a   :  { %1366 = vmatprep.subr.bf16.mxu1 %v2937_v40 }
 0x24d   :  { %1367 = vmatpush2.bf16.msra.mxu1 %v2942_v41 }
 0x24e   :  { %1368 = vmatprep.subr.bf16.mxu1 %v2951_v42 }
 0x251   :  { %1369 = vmatpush2.bf16.msra.mxu1 %v2956_v43 }
 0x252   :  { %1424 = vmatprep.subr.bf16.mxu1 %v2741_v12 }
 0x2d4   :  { %v1286_v54 = vpop.f32.mrf.mxu1 }
 0x2d5   :  { %v1287_v56 = vadd.f32 %v1286_v54, %v3006_v45 }
 0x2d6   :  { %v1288_v58 = vpop.f32.mrf.mxu1 }
 0x2d7   :  { %v1289_v59 = vadd.f32 %v1288_v58, %v3008_v46  ;;  %v1293_v62 = vpack.c.bf16 %v1287_v56, %v1287_v56 }
 0x2d8   :  { %v1290_v60 = vpop.f32.mrf.mxu1 }
 0x2d9   :  { %v1294_v61 = vpack.c.bf16 %v1289_v59, %v1289_v59 }
 0x2da   :  { %v1291_v63 = vpop.f32.mrf.mxu1 }
 0x2db   :  { %1327 = vmatprep.mubr.bf16.mxu0 %v1294_v61 }
 0x2dc   :  { %1328 = vmatmul.mubr.bf16.vlgmr.msra.gmra.mxu0 %v1293_v62 }
 0x2dd   :  { %1382 = vmatpush1.bf16.msra.mxu0 %v2746_v13 }
 0x2de   :  { %1383 = vmatprep.subr.bf16.mxu0 %v2752_v14 }
 0x2e1   :  { %1384 = vmatpush1.bf16.msra.mxu0 %v2759_v15 }
 0x2e2   :  { %1385 = vmatprep.subr.bf16.mxu0 %v2766_v16 }
 0x2e5   :  { %1386 = vmatpush1.bf16.msra.mxu0 %v2773_v17 }
 0x2e6   :  { %1387 = vmatprep.subr.bf16.mxu0 %v2780_v18 }
 0x2e9   :  { %1388 = vmatpush1.bf16.msra.mxu0 %v2787_v19 }
 0x2ea   :  { %1389 = vmatprep.subr.bf16.mxu0 %v2794_v20 }
 0x2ed   :  { %1390 = vmatpush1.bf16.msra.mxu0 %v2801_v21 }
 0x2ee   :  { %1391 = vmatprep.subr.bf16.mxu0 %v2808_v22 }
 0x2f1   :  { %1392 = vmatpush1.bf16.msra.mxu0 %v2814_v23 }
 0x2f2   :  { %1393 = vmatprep.subr.bf16.mxu0 %v2822_v24 }
 0x2f5   :  { %1394 = vmatpush1.bf16.msra.mxu0 %v2829_v25 }
 0x2f6   :  { %1395 = vmatprep.subr.bf16.mxu0 %v2836_v26 }
 0x2f9   :  { %1396 = vmatpush1.bf16.msra.mxu0 %v2843_v27 }
 0x2fa   :  { %1397 = vmatprep.subr.bf16.mxu0 %v2850_v28 }
 0x2fd   :  { %1398 = vmatpush2.bf16.msra.mxu0 %v2857_v29 }
 0x2fe   :  { %1399 = vmatprep.subr.bf16.mxu0 %v2864_v30 }
 0x301   :  { %1400 = vmatpush2.bf16.msra.mxu0 %v2871_v31 }
 0x302   :  { %1401 = vmatprep.subr.bf16.mxu0 %v2878_v32 }
 0x305   :  { %1402 = vmatpush2.bf16.msra.mxu0 %v2885_v33 }
 0x306   :  { %1403 = vmatprep.subr.bf16.mxu0 %v2892_v34 }
 0x309   :  { %1404 = vmatpush2.bf16.msra.mxu0 %v2899_v35 }
 0x30a   :  { %1405 = vmatprep.subr.bf16.mxu0 %v2906_v36 }
 0x30d   :  { %1406 = vmatpush2.bf16.msra.mxu0 %v2913_v37 }
 0x30e   :  { %1407 = vmatprep.subr.bf16.mxu0 %v2920_v38 }
 0x311   :  { %1408 = vmatpush2.bf16.msra.mxu0 %v2927_v39 }
 0x312   :  { %1409 = vmatprep.subr.bf16.mxu0 %v2937_v40 }
 0x315   :  { %1410 = vmatpush2.bf16.msra.mxu0 %v2942_v41 }
 0x316   :  { %1411 = vmatprep.subr.bf16.mxu0 %v2951_v42 }
 0x319   :  { %1412 = vmatpush2.bf16.msra.mxu0 %v2956_v43 }
 0x31a   :  { %1467 = vmatprep.subr.bf16.mxu0 %v2741_v12 }
 0x39c   :  { %v1329_v0 = vpop.f32.mrf.mxu0 }
 0x39d   :  { %v1330_v1 = vadd.f32 %v1329_v0, %v3006_v45 }
 0x39e   :  { %v1331_v2 = vpop.f32.mrf.mxu0 }
 0x39f   :  { %v1332_v3 = vadd.f32 %v1331_v2, %v3008_v46  ;;  %v1336_v6 = vpack.c.bf16 %v1330_v1, %v1330_v1 }
 0x3a0   :  { %v1333_v4 = vpop.f32.mrf.mxu0 }
 0x3a1   :  { %v1337_v5 = vpack.c.bf16 %v1332_v3, %v1332_v3 }
 0x3a2   :  { %v1334_v7 = vpop.f32.mrf.mxu0 }
 0x3a3   :  { %1370 = vmatprep.mubr.bf16.mxu1 %v1337_v5 }
 0x3a4   :  { %1371 = vmatmul.mubr.bf16.vlgmr.msra.gmra.mxu1 %v1336_v6 }
 0x3a5   :  { %1425 = vmatpush1.bf16.msra.mxu1 %v2746_v13 }
 0x3a6   :  { %1426 = vmatprep.subr.bf16.mxu1 %v2752_v14 }
 0x3a9   :  { %1427 = vmatpush1.bf16.msra.mxu1 %v2759_v15 }
 0x3aa   :  { %1428 = vmatprep.subr.bf16.mxu1 %v2766_v16 }
 0x3ad   :  { %1429 = vmatpush1.bf16.msra.mxu1 %v2773_v17 }
 0x3ae   :  { %1430 = vmatprep.subr.bf16.mxu1 %v2780_v18 }
 0x3b1   :  { %1431 = vmatpush1.bf16.msra.mxu1 %v2787_v19 }
 0x3b2   :  { %1432 = vmatprep.subr.bf16.mxu1 %v2794_v20 }
 0x3b5   :  { %1433 = vmatpush1.bf16.msra.mxu1 %v2801_v21 }
 0x3b6   :  { %1434 = vmatprep.subr.bf16.mxu1 %v2808_v22 }
 0x3b9   :  { %1435 = vmatpush1.bf16.msra.mxu1 %v2814_v23 }
 0x3ba   :  { %1436 = vmatprep.subr.bf16.mxu1 %v2822_v24 }
 0x3bd   :  { %1437 = vmatpush1.bf16.msra.mxu1 %v2829_v25 }
 0x3be   :  { %1438 = vmatprep.subr.bf16.mxu1 %v2836_v26 }
 0x3c1   :  { %1439 = vmatpush1.bf16.msra.mxu1 %v2843_v27 }
 0x3c2   :  { %1440 = vmatprep.subr.bf16.mxu1 %v2850_v28 }
 0x3c5   :  { %1441 = vmatpush2.bf16.msra.mxu1 %v2857_v29 }
 0x3c6   :  { %1442 = vmatprep.subr.bf16.mxu1 %v2864_v30 }
 0x3c9   :  { %1443 = vmatpush2.bf16.msra.mxu1 %v2871_v31 }
 0x3ca   :  { %1444 = vmatprep.subr.bf16.mxu1 %v2878_v32 }
 0x3cd   :  { %1445 = vmatpush2.bf16.msra.mxu1 %v2885_v33 }
 0x3ce   :  { %1446 = vmatprep.subr.bf16.mxu1 %v2892_v34 }
 0x3d1   :  { %1447 = vmatpush2.bf16.msra.mxu1 %v2899_v35 }
 0x3d2   :  { %1448 = vmatprep.subr.bf16.mxu1 %v2906_v36 }
 0x3d5   :  { %1449 = vmatpush2.bf16.msra.mxu1 %v2913_v37 }
 0x3d6   :  { %1450 = vmatprep.subr.bf16.mxu1 %v2920_v38 }
 0x3d9   :  { %1451 = vmatpush2.bf16.msra.mxu1 %v2927_v39 }
 0x3da   :  { %1452 = vmatprep.subr.bf16.mxu1 %v2937_v40 }
 0x3dd   :  { %1453 = vmatpush2.bf16.msra.mxu1 %v2942_v41 }
 0x3de   :  { %1454 = vmatprep.subr.bf16.mxu1 %v2951_v42 }
 0x3e1   :  { %1455 = vmatpush2.bf16.msra.mxu1 %v2956_v43 }
 0x3e2   :  { %1510 = vmatprep.subr.bf16.mxu1 %v2741_v12 }
 0x464   :  { %v1372_v8 = vpop.f32.mrf.mxu1 }
 0x465   :  { %v1373_v9 = vadd.f32 %v1372_v8, %v3006_v45 }
 0x466   :  { %v1374_v10 = vpop.f32.mrf.mxu1 }
 0x467   :  { %v1375_v11 = vadd.f32 %v1374_v10, %v3008_v46  ;;  %v1379_v47 = vpack.c.bf16 %v1373_v9, %v1373_v9  ;;  %v2289_v9 = vld [vmem:[%s3311_s5] sm:$0xff]  }
 0x468   :  { %v1376_v48 = vpop.f32.mrf.mxu1 }
 0x469   :  { %v1380_v44 = vpack.c.bf16 %v1375_v11, %v1375_v11 }
 0x46a   :  { %v1377_v49 = vpop.f32.mrf.mxu1 }
 0x46b   :  { %1413 = vmatprep.mubr.bf16.mxu0 %v1380_v44 }
 0x46c   :  { %1414 = vmatmul.mubr.bf16.vlgmr.msra.gmra.mxu0 %v1379_v47 }
 0x46d   :  { %1468 = vmatpush1.bf16.msra.mxu0 %v2746_v13 }
 0x46e   :  { %1469 = vmatprep.subr.bf16.mxu0 %v2752_v14 }
 0x471   :  { %1470 = vmatpush1.bf16.msra.mxu0 %v2759_v15 }
 0x472   :  { %1471 = vmatprep.subr.bf16.mxu0 %v2766_v16 }
 0x475   :  { %1472 = vmatpush1.bf16.msra.mxu0 %v2773_v17 }
 0x476   :  { %1473 = vmatprep.subr.bf16.mxu0 %v2780_v18 }
 0x479   :  { %1474 = vmatpush1.bf16.msra.mxu0 %v2787_v19 }
 0x47a   :  { %1475 = vmatprep.subr.bf16.mxu0 %v2794_v20 }
 0x47d   :  { %1476 = vmatpush1.bf16.msra.mxu0 %v2801_v21 }
 0x47e   :  { %1477 = vmatprep.subr.bf16.mxu0 %v2808_v22 }
 0x481   :  { %1478 = vmatpush1.bf16.msra.mxu0 %v2814_v23 }
 0x482   :  { %1479 = vmatprep.subr.bf16.mxu0 %v2822_v24 }
 0x485   :  { %1480 = vmatpush1.bf16.msra.mxu0 %v2829_v25 }
 0x486   :  { %1481 = vmatprep.subr.bf16.mxu0 %v2836_v26 }
 0x489   :  { %1482 = vmatpush1.bf16.msra.mxu0 %v2843_v27 }
 0x48a   :  { %1483 = vmatprep.subr.bf16.mxu0 %v2850_v28 }
 0x48d   :  { %1484 = vmatpush2.bf16.msra.mxu0 %v2857_v29 }
 0x48e   :  { %1485 = vmatprep.subr.bf16.mxu0 %v2864_v30 }
 0x491   :  { %1486 = vmatpush2.bf16.msra.mxu0 %v2871_v31 }
 0x492   :  { %1487 = vmatprep.subr.bf16.mxu0 %v2878_v32 }
 0x495   :  { %1488 = vmatpush2.bf16.msra.mxu0 %v2885_v33 }
 0x496   :  { %1489 = vmatprep.subr.bf16.mxu0 %v2892_v34 }
 0x499   :  { %1490 = vmatpush2.bf16.msra.mxu0 %v2899_v35 }
 0x49a   :  { %1491 = vmatprep.subr.bf16.mxu0 %v2906_v36 }
 0x49d   :  { %1492 = vmatpush2.bf16.msra.mxu0 %v2913_v37 }
 0x49e   :  { %1493 = vmatprep.subr.bf16.mxu0 %v2920_v38 }
 0x4a1   :  { %1494 = vmatpush2.bf16.msra.mxu0 %v2927_v39 }
 0x4a2   :  { %1495 = vmatprep.subr.bf16.mxu0 %v2937_v40 }
 0x4a5   :  { %1496 = vmatpush2.bf16.msra.mxu0 %v2942_v41 }
 0x4a6   :  { %1497 = vmatprep.subr.bf16.mxu0 %v2951_v42 }
 0x4a9   :  { %1498 = vmatpush2.bf16.msra.mxu0 %v2956_v43 }
 0x4aa   :  { %1553 = vmatprep.subr.bf16.mxu0 %v2741_v12 }
 0x52c   :  { %v1415_v50 = vpop.f32.mrf.mxu0 }
 0x52d   :  { %v1416_v51 = vadd.f32 %v1415_v50, %v3006_v45 }
 0x52e   :  { %v1417_v52 = vpop.f32.mrf.mxu0 }
 0x52f   :  { %v1418_v53 = vadd.f32 %v1417_v52, %v3008_v46  ;;  %v1422_v54 = vpack.c.bf16 %v1416_v51, %v1416_v51 }
 0x530   :  { %v1419_v55 = vpop.f32.mrf.mxu0 }
 0x531   :  { %v1423_v57 = vpack.c.bf16 %v1418_v53, %v1418_v53  ;;  %v1987_v53 = vld [vmem:[%s3312_s6] ss:$0 sm:$0xff] }
 0x532   :  { %v1420_v56 = vpop.f32.mrf.mxu0 }
 0x533   :  { %1456 = vmatprep.mubr.bf16.mxu1 %v1423_v57 }
 0x534   :  { %1457 = vmatmul.mubr.bf16.vlgmr.msra.gmra.mxu1 %v1422_v54 }
 0x535   :  { %1511 = vmatpush1.bf16.msra.mxu1 %v2746_v13 }
 0x536   :  { %1512 = vmatprep.subr.bf16.mxu1 %v2752_v14 }
 0x539   :  { %1513 = vmatpush1.bf16.msra.mxu1 %v2759_v15 }
 0x53a   :  { %1514 = vmatprep.subr.bf16.mxu1 %v2766_v16 }
 0x53d   :  { %1515 = vmatpush1.bf16.msra.mxu1 %v2773_v17 }
 0x53e   :  { %1516 = vmatprep.subr.bf16.mxu1 %v2780_v18 }
 0x541   :  { %1517 = vmatpush1.bf16.msra.mxu1 %v2787_v19 }
 0x542   :  { %1518 = vmatprep.subr.bf16.mxu1 %v2794_v20 }
 0x545   :  { %1519 = vmatpush1.bf16.msra.mxu1 %v2801_v21 }
 0x546   :  { %1520 = vmatprep.subr.bf16.mxu1 %v2808_v22 }
 0x549   :  { %1521 = vmatpush1.bf16.msra.mxu1 %v2814_v23 }
 0x54a   :  { %1522 = vmatprep.subr.bf16.mxu1 %v2822_v24 }
 0x54d   :  { %1523 = vmatpush1.bf16.msra.mxu1 %v2829_v25 }
 0x54e   :  { %1524 = vmatprep.subr.bf16.mxu1 %v2836_v26 }
 0x551   :  { %1525 = vmatpush1.bf16.msra.mxu1 %v2843_v27 }
 0x552   :  { %1526 = vmatprep.subr.bf16.mxu1 %v2850_v28 }
 0x555   :  { %1527 = vmatpush2.bf16.msra.mxu1 %v2857_v29 }
 0x556   :  { %1528 = vmatprep.subr.bf16.mxu1 %v2864_v30 }
 0x559   :  { %1529 = vmatpush2.bf16.msra.mxu1 %v2871_v31 }
 0x55a   :  { %1530 = vmatprep.subr.bf16.mxu1 %v2878_v32 }
 0x55d   :  { %1531 = vmatpush2.bf16.msra.mxu1 %v2885_v33 }
 0x55e   :  { %1532 = vmatprep.subr.bf16.mxu1 %v2892_v34 }
 0x561   :  { %1533 = vmatpush2.bf16.msra.mxu1 %v2899_v35 }
 0x562   :  { %1534 = vmatprep.subr.bf16.mxu1 %v2906_v36 }
 0x565   :  { %1535 = vmatpush2.bf16.msra.mxu1 %v2913_v37 }
 0x566   :  { %1536 = vmatprep.subr.bf16.mxu1 %v2920_v38 }
 0x569   :  { %1537 = vmatpush2.bf16.msra.mxu1 %v2927_v39 }
 0x56a   :  { %1538 = vmatprep.subr.bf16.mxu1 %v2937_v40 }
 0x56d   :  { %1539 = vmatpush2.bf16.msra.mxu1 %v2942_v41 }
 0x56e   :  { %1540 = vmatprep.subr.bf16.mxu1 %v2951_v42 }
 0x571   :  { %1541 = vmatpush2.bf16.msra.mxu1 %v2956_v43 }
 0x572   :  { %1596 = vmatprep.subr.bf16.mxu1 %v2741_v12 }
 0x5f4   :  { %v1458_v58 = vpop.f32.mrf.mxu1 }
 0x5f5   :  { %v1459_v59 = vadd.f32 %v1458_v58, %v3006_v45 }
 0x5f6   :  { %v1460_v60 = vpop.f32.mrf.mxu1 }
 0x5f7   :  { %v1461_v61 = vadd.f32 %v1460_v60, %v3008_v46  ;;  %v1465_v0 = vpack.c.bf16 %v1459_v59, %v1459_v59 }
 0x5f8   :  { %v1462_v62 = vpop.f32.mrf.mxu1 }
 0x5f9   :  { %v1466_v63 = vpack.c.bf16 %v1461_v61, %v1461_v61 }
 0x5fa   :  { %v1463_v1 = vpop.f32.mrf.mxu1 }
 0x5fb   :  { %1499 = vmatprep.mubr.bf16.mxu0 %v1466_v63 }
 0x5fc   :  { %1500 = vmatmul.mubr.bf16.vlgmr.msra.gmra.mxu0 %v1465_v0 }
 0x5fd   :  { %1554 = vmatpush1.bf16.msra.mxu0 %v2746_v13 }
 0x5fe   :  { %1555 = vmatprep.subr.bf16.mxu0 %v2752_v14 }
 0x601   :  { %1556 = vmatpush1.bf16.msra.mxu0 %v2759_v15 }
 0x602   :  { %1557 = vmatprep.subr.bf16.mxu0 %v2766_v16 }
 0x605   :  { %1558 = vmatpush1.bf16.msra.mxu0 %v2773_v17 }
 0x606   :  { %1559 = vmatprep.subr.bf16.mxu0 %v2780_v18 }
 0x609   :  { %1560 = vmatpush1.bf16.msra.mxu0 %v2787_v19 }
 0x60a   :  { %1561 = vmatprep.subr.bf16.mxu0 %v2794_v20 }
 0x60d   :  { %1562 = vmatpush1.bf16.msra.mxu0 %v2801_v21 }
 0x60e   :  { %1563 = vmatprep.subr.bf16.mxu0 %v2808_v22 }
 0x611   :  { %1564 = vmatpush1.bf16.msra.mxu0 %v2814_v23 }
 0x612   :  { %1565 = vmatprep.subr.bf16.mxu0 %v2822_v24 }
 0x615   :  { %1566 = vmatpush1.bf16.msra.mxu0 %v2829_v25 }
 0x616   :  { %1567 = vmatprep.subr.bf16.mxu0 %v2836_v26 }
 0x619   :  { %1568 = vmatpush1.bf16.msra.mxu0 %v2843_v27 }
 0x61a   :  { %1569 = vmatprep.subr.bf16.mxu0 %v2850_v28 }
 0x61d   :  { %1570 = vmatpush2.bf16.msra.mxu0 %v2857_v29 }
 0x61e   :  { %1571 = vmatprep.subr.bf16.mxu0 %v2864_v30 }
 0x621   :  { %1572 = vmatpush2.bf16.msra.mxu0 %v2871_v31 }
 0x622   :  { %1573 = vmatprep.subr.bf16.mxu0 %v2878_v32 }
 0x625   :  { %1574 = vmatpush2.bf16.msra.mxu0 %v2885_v33 }
 0x626   :  { %1575 = vmatprep.subr.bf16.mxu0 %v2892_v34 }
 0x629   :  { %1576 = vmatpush2.bf16.msra.mxu0 %v2899_v35 }
 0x62a   :  { %1577 = vmatprep.subr.bf16.mxu0 %v2906_v36 }
 0x62d   :  { %1578 = vmatpush2.bf16.msra.mxu0 %v2913_v37 }
 0x62e   :  { %1579 = vmatprep.subr.bf16.mxu0 %v2920_v38 }
 0x631   :  { %1580 = vmatpush2.bf16.msra.mxu0 %v2927_v39 }
 0x632   :  { %1581 = vmatprep.subr.bf16.mxu0 %v2937_v40 }
 0x635   :  { %1582 = vmatpush2.bf16.msra.mxu0 %v2942_v41 }
 0x636   :  { %1583 = vmatprep.subr.bf16.mxu0 %v2951_v42 }
 0x639   :  { %1584 = vmatpush2.bf16.msra.mxu0 %v2956_v43 }
 0x6bc   :  { %v1501_v12 = vpop.f32.mrf.mxu0 }
 0x6bd   :  { %v1502_v2 = vadd.f32 %v1501_v12, %v3006_v45 }
 0x6be   :  { %v1503_v3 = vpop.f32.mrf.mxu0 }
 0x6bf   :  { %v1504_v4 = vadd.f32 %v1503_v3, %v3008_v46  ;;  %v1508_v7 = vpack.c.bf16 %v1502_v2, %v1502_v2 }
 0x6c0   :  { %v1505_v5 = vpop.f32.mrf.mxu0 }
 0x6c1   :  { %v1509_v6 = vpack.c.bf16 %v1504_v4, %v1504_v4 }
 0x6c2   :  { %v1506_v8 = vpop.f32.mrf.mxu0 }
 0x6c3   :  { %1542 = vmatprep.mubr.bf16.mxu1 %v1509_v6 }
 0x6c4   :  { %1543 = vmatmul.mubr.bf16.vlgmr.msra.gmra.mxu1 %v1508_v7 }
 0x6c5   :  { %1597 = vmatpush1.bf16.msra.mxu1 %v2746_v13 }
 0x6c6   :  { %1598 = vmatprep.subr.bf16.mxu1 %v2752_v14 }
 0x6c9   :  { %1599 = vmatpush1.bf16.msra.mxu1 %v2759_v15 }
 0x6ca   :  { %1600 = vmatprep.subr.bf16.mxu1 %v2766_v16 }
 0x6cd   :  { %1601 = vmatpush1.bf16.msra.mxu1 %v2773_v17 }
 0x6ce   :  { %1602 = vmatprep.subr.bf16.mxu1 %v2780_v18 }
 0x6d1   :  { %1603 = vmatpush1.bf16.msra.mxu1 %v2787_v19 }
 0x6d2   :  { %1604 = vmatprep.subr.bf16.mxu1 %v2794_v20 }
 0x6d5   :  { %1605 = vmatpush1.bf16.msra.mxu1 %v2801_v21  ;;  %v2274_v21 = vld [vmem:[%s3311_s5 + $0x78] sm:$0xff]  }
 0x6d6   :  { %1606 = vmatprep.subr.bf16.mxu1 %v2808_v22  ;;  %v2275_v22 = vld [vmem:[%s3311_s5 + $0x38] sm:$0xff]   ;;  %2004 = vmatprep.subr.bf16.mxu0 %v2274_v21 }
 0x6d9   :  { %1607 = vmatpush1.bf16.msra.mxu1 %v2814_v23  ;;  %v2276_v23 = vld [vmem:[%s3311_s5 + $0x70] sm:$0xff]  }
 0x6da   :  { %1608 = vmatprep.subr.bf16.mxu1 %v2822_v24  ;;  %v2277_v24 = vld [vmem:[%s3311_s5 + $0x30] sm:$0xff]  }
 0x6dd   :  { %1609 = vmatpush1.bf16.msra.mxu1 %v2829_v25  ;;  %v2278_v25 = vld [vmem:[%s3311_s5 + $0x68] sm:$0xff]  }
 0x6de   :  { %1610 = vmatprep.subr.bf16.mxu1 %v2836_v26  ;;  %v2279_v26 = vld [vmem:[%s3311_s5 + $0x28] sm:$0xff]  }
 0x6e1   :  { %1611 = vmatpush1.bf16.msra.mxu1 %v2843_v27  ;;  %v2280_v27 = vld [vmem:[%s3311_s5 + $0x60] sm:$0xff]  }
 0x6e2   :  { %1612 = vmatprep.subr.bf16.mxu1 %v2850_v28  ;;  %v2281_v28 = vld [vmem:[%s3311_s5 + $0x20] sm:$0xff]  }
 0x6e5   :  { %1613 = vmatpush2.bf16.msra.mxu1 %v2857_v29  ;;  %v2282_v29 = vld [vmem:[%s3311_s5 + $0x58] sm:$0xff]  }
 0x6e6   :  { %1614 = vmatprep.subr.bf16.mxu1 %v2864_v30  ;;  %v2283_v30 = vld [vmem:[%s3311_s5 + $0x18] sm:$0xff]  }
 0x6e9   :  { %1615 = vmatpush2.bf16.msra.mxu1 %v2871_v31  ;;  %v2284_v31 = vld [vmem:[%s3311_s5 + $0x50] sm:$0xff]  }
 0x6ea   :  { %1616 = vmatprep.subr.bf16.mxu1 %v2878_v32  ;;  %v2285_v32 = vld [vmem:[%s3311_s5 + $0x10] sm:$0xff]  }
 0x6ed   :  { %1617 = vmatpush2.bf16.msra.mxu1 %v2885_v33 }
 0x6ee   :  { %1618 = vmatprep.subr.bf16.mxu1 %v2892_v34 }
 0x6f1   :  { %1619 = vmatpush2.bf16.msra.mxu1 %v2899_v35 }
 0x6f2   :  { %1620 = vmatprep.subr.bf16.mxu1 %v2906_v36 }
 0x6f5   :  { %1621 = vmatpush2.bf16.msra.mxu1 %v2913_v37 }
 0x6f6   :  { %1622 = vmatprep.subr.bf16.mxu1 %v2920_v38 }
 0x6f9   :  { %1623 = vmatpush2.bf16.msra.mxu1 %v2927_v39 }
 0x6fa   :  { %1624 = vmatprep.subr.bf16.mxu1 %v2937_v40 }
 0x6fd   :  { %1625 = vmatpush2.bf16.msra.mxu1 %v2942_v41  ;;  %v2286_v41 = vld [vmem:[%s3311_s5 + $0x48] sm:$0xff]  }
 0x6fe   :  { %1626 = vmatprep.subr.bf16.mxu1 %v2951_v42  ;;  %v2287_v42 = vld [vmem:[%s3311_s5 + $0x8] sm:$0xff]  }
 0x701   :  { %1627 = vmatpush2.bf16.msra.mxu1 %v2956_v43  ;;  %v2288_v43 = vld [vmem:[%s3311_s5 + $0x40] sm:$0xff]  }
 0x784   :  { %v1544_v13 = vpop.f32.mrf.mxu1 }
 0x785   :  { %v1545_v14 = vadd.f32 %v1544_v13, %v3006_v45 }
 0x786   :  { %v1546_v15 = vpop.f32.mrf.mxu1 }
 0x787   :  { %v1547_v16 = vadd.f32 %v1546_v15, %v3008_v46  ;;  %v1551_v19 = vpack.c.bf16 %v1545_v14, %v1545_v14 }
 0x788   :  { %v1548_v17 = vpop.f32.mrf.mxu1 }
 0x789   :  { %v1552_v18 = vpack.c.bf16 %v1547_v16, %v1547_v16 }
 0x78a   :  { %v1549_v20 = vpop.f32.mrf.mxu1 }
 0x78b   :  { %1585 = vmatprep.mubr.bf16.mxu0 %v1552_v18 }
 0x78c   :  { %1586 = vmatmul.mubr.bf16.vlgmr.msra.gmra.mxu0 %v1551_v19 }
 0x78d   :  { %2005 = vmatpush3.bf16.msra.mxu0 %v2275_v22 }
 0x78e   :  { %2006 = vmatprep.subr.bf16.mxu0 %v2276_v23 }
 0x791   :  { %2007 = vmatpush3.bf16.msra.mxu0 %v2277_v24 }
 0x792   :  { %2008 = vmatprep.subr.bf16.mxu0 %v2278_v25 }
 0x795   :  { %2009 = vmatpush3.bf16.msra.mxu0 %v2279_v26 }
 0x796   :  { %2010 = vmatprep.subr.bf16.mxu0 %v2280_v27 }
 0x799   :  { %2011 = vmatpush3.bf16.msra.mxu0 %v2281_v28 }
 0x79a   :  { %2012 = vmatprep.subr.bf16.mxu0 %v2282_v29 }
 0x79d   :  { %2013 = vmatpush3.bf16.msra.mxu0 %v2283_v30 }
 0x79e   :  { %2014 = vmatprep.subr.bf16.mxu0 %v2284_v31 }
 0x7a1   :  { %2015 = vmatpush3.bf16.msra.mxu0 %v2285_v32 }
 0x7a2   :  { %2016 = vmatprep.subr.bf16.mxu0 %v2286_v41 }
 0x7a5   :  { %2017 = vmatpush3.bf16.msra.mxu0 %v2287_v42 }
 0x7a6   :  { %2018 = vmatprep.subr.bf16.mxu0 %v2288_v43 }
 0x7a9   :  { %2019 = vmatpush3.bf16.msra.mxu0 %v2289_v9 }
 0x84c   :  { %v1587_v33 = vpop.f32.mrf.mxu0 }
 0x84d   :  { %v1588_v34 = vadd.f32 %v1587_v33, %v3006_v45 }
 0x84e   :  { %v1589_v35 = vpop.f32.mrf.mxu0 }
 0x84f   :  { %v1590_v36 = vadd.f32 %v1589_v35, %v3008_v46  ;;  %v1594_v39 = vpack.c.bf16 %v1588_v34, %v1588_v34 }
 0x850   :  { %v1591_v37 = vpop.f32.mrf.mxu0 }
 0x851   :  { %v1595_v38 = vpack.c.bf16 %v1590_v36, %v1590_v36 }
 0x852   :  { %v1592_v40 = vpop.f32.mrf.mxu0 }
 0x853   :  { %1628 = vmatprep.mubr.bf16.mxu1 %v1595_v38 }
 0x854   :  { %1629 = vmatmul.mubr.bf16.vlgmr.msra.gmra.mxu1 %v1594_v39 }
 0x914   :  { %v1630_v10 = vpop.f32.mrf.mxu1 }
 0x915   :  { %v1631_v11 = vadd.f32 %v1630_v10, %v3006_v45 }
 0x916   :  { %v1632_v48 = vpop.f32.mrf.mxu1 }
 0x917   :  { %v1633_v44 = vadd.f32 %v1632_v48, %v3008_v46  ;;  %v1637_v50 = vpack.c.bf16 %v1631_v11, %v1631_v11 }
 0x918   :  { %v1634_v47 = vpop.f32.mrf.mxu1 }
 0x919   :  { %v1638_v49 = vpack.c.bf16 %v1633_v44, %v1633_v44 }
 0x91a   :  { %v1635_v51 = vpop.f32.mrf.mxu1 }
 0x91b   :  { %1806 = vmatprep.mubr.bf16.mxu0 %v1638_v49 }
 0x91c   :  { %1807 = vmatmul.mubr.bf16.vlgmr.msra.gmra.mxu0 %v1637_v50 }
 0x9dc   :  { %v2020_v52 = vpop.f32.mrf.mxu0 }
 0x9de   :  { %v2021_v55 = vpop.f32.mrf.mxu0 }
 0x9df   :  { %v2022_v57 = vadd.f32 %v2021_v55, %v2020_v52 }
 0x9e0   :  { %v2023_v54 = vpop.f32.mrf.mxu0 }
 0x9e1   :  { %v1809_v56 = vadd.f32 %v2022_v57, %v1987_v53 }
 0x9e2   :  { %v2024_v58 = vpop.f32.mrf.mxu0 }
 0x9e3   :  { %1814 = vst [vmem:[%s3313_s7] sm:$0xff] %v1809_v56 }

</bundles_post_ra>
